<compile_context>
chip_gen: v7x
topology: tpu7x:2x2x1
jax: 0.10.0
libtpu: 0.0.40
codegen_flags: <defaults>
</compile_context>

<pallas_src>
import functools

import jax
import jax.numpy as jnp
from jax import lax
from jax.experimental import pallas as pl
from jax.experimental.pallas import tpu as pltpu


def _residual_block_kernel(xm_ref, xh_ref, w1_ref, b1_ref, w2_ref, b2_ref,
                           o_ref, xcat_ref, h1cat_ref, *, img_h, img_w, mr):
    # xm_ref   : (1, TH, Wp, Cp)   main input band, padded rows [i*TH, i*TH+TH)
    # xh_ref   : (1, 4,  Wp, Cp)   halo band,       padded rows [i*TH+TH, i*TH+TH+4)
    # w*_ref   : (3, 3*Cp, Cp)     dy-indexed, K = dx-major (dx*Cp + c_in), N = c_out
    # b*_ref   : (1, Cp)           f32
    # o_ref    : (1, TH, Wt, Cp)   f32
    # xcat_ref : VMEM (TH+4, Wt, 3*Cp)  dx-folded input tile (mxu dtype)
    # h1cat_ref: VMEM (TH+2, Wt, 3*Cp)  dx-folded intermediate (mxu dtype)
    _, TH, Wt, Cp = o_ref.shape
    He = TH + 2
    C3 = 3 * Cp

    # ---- dx-folded (im2col along dx) input tile, built straight from the two
    # BlockSpec windows: xcat[r, j, d*Cp:(d+1)*Cp] = x_pad[band_row r, col j+d]
    for d in range(3):
        xcat_ref[0:TH, :, d * Cp:(d + 1) * Cp] = xm_ref[0, :, d:d + Wt, :]
        xcat_ref[TH:TH + 4, :, d * Cp:(d + 1) * Cp] = xh_ref[0, :, d:d + Wt, :]

    # conv2's zero padding in W: only the two 1-column border strips are zeroed.
    zcol = jnp.zeros((He, 1, Cp), h1cat_ref.dtype)
    h1cat_ref[:, 0:1, 0:Cp] = zcol
    h1cat_ref[:, Wt - 1:Wt, 2 * Cp:3 * Cp] = zcol

    b1 = b1_ref[...]
    b2 = b2_ref[...]
    tile_row0 = pl.program_id(1) * TH            # first real image row of tile

    # ---- conv1 + bias + ReLU, M-tiled over the He intermediate rows ---------
    for r0 in range(0, He, mr):
        rows = min(mr, He - r0)
        m = rows * Wt
        acc = jnp.dot(xcat_ref[r0:r0 + rows, :, :].reshape(m, C3), w1_ref[0],
                      preferred_element_type=jnp.float32)
        for dy in (1, 2):
            acc = acc + jnp.dot(
                xcat_ref[r0 + dy:r0 + dy + rows, :, :].reshape(m, C3), w1_ref[dy],
                preferred_element_type=jnp.float32)
        h1 = jnp.maximum(acc + b1, 0.0).reshape(rows, Wt, Cp)

        # conv2's zero padding in H: zero h1 rows outside the real image.
        g = (tile_row0 - 1 + r0
             + lax.broadcasted_iota(jnp.int32, (rows, Wt, Cp), 0))
        h1 = jnp.where(jnp.logical_and(g >= 0, g < img_h), h1, 0.0)
        if Wt != img_w:          # only when W was padded up to a multiple of 8
            col = lax.broadcasted_iota(jnp.int32, (rows, Wt, Cp), 1)
            h1 = jnp.where(col < img_w, h1, 0.0)
        h1 = h1.astype(h1cat_ref.dtype)

        # dx-folded store: three column-shifted copies of the chunk.
        h1cat_ref[r0:r0 + rows, 1:Wt, 0:Cp] = h1[:, 0:Wt - 1, :]
        h1cat_ref[r0:r0 + rows, :, Cp:2 * Cp] = h1
        h1cat_ref[r0:r0 + rows, 0:Wt - 1, 2 * Cp:3 * Cp] = h1[:, 1:Wt, :]

    # ---- conv2 + bias + residual + ReLU, M-tiled over the TH output rows ----
    for r0 in range(0, TH, mr):
        rows = min(mr, TH - r0)
        m = rows * Wt
        acc = jnp.dot(h1cat_ref[r0:r0 + rows, :, :].reshape(m, C3), w2_ref[0],
                      preferred_element_type=jnp.float32)
        for dy in (1, 2):
            acc = acc + jnp.dot(
                h1cat_ref[r0 + dy:r0 + dy + rows, :, :].reshape(m, C3), w2_ref[dy],
                preferred_element_type=jnp.float32)
        # residual = x at the tile's real rows = dx=1 channel block of xcat
        res = xcat_ref[r0 + 2:r0 + 2 + rows, :, Cp:2 * Cp].reshape(m, Cp)
        y = jnp.maximum(acc + b2 + res.astype(jnp.float32), 0.0)
        o_ref[0, r0:r0 + rows, :, :] = y.reshape(rows, Wt, Cp).astype(o_ref.dtype)


def residual_block(x_nchw, w1, b1, w2, b2, *, row_block=32,
                   mxu_dtype=jnp.bfloat16):
    """x_nchw: (N, C, H, W); w*: (C, C, 3, 3) OIHW (PyTorch); b*: (C,).

    mxu_dtype=bfloat16 gives ~2x MXU throughput on every TPU generation with
    f32 accumulation (operands, intermediate and the residual are bf16-rounded).
    Pass mxu_dtype=jnp.float32 for an exact f32 path.
    """
    N, C, H, W = x_nchw.shape
    Cp = -(-C // 128) * 128                                    # lane-dense channels
    Wt = -(-W // 8) * 8                                        # sublane-aligned interior width
    Wp = Wt + 2
    TH = max(4, min(-(-row_block // 4) * 4, -(-H // 4) * 4))   # row tile, multiple of 4
    n_row_tiles = -(-H // TH)
    H_pad = n_row_tiles * TH
    rows_total = H_pad + TH                                    # 2 zero rows top, rest bottom
    mr = max(1, 256 // Wt)                                     # M-chunk rows (acc ~ 256 x Cp)

    # glue: NCHW -> NHWC, pad 2 rows top / rest bottom, 1 col left / (Wt+1-W)
    # right, channels to Cp (all padding is exact zeros).
    x = jnp.transpose(x_nchw, (0, 2, 3, 1)).astype(mxu_dtype)
    x_p = jnp.pad(x, ((0, 0), (2, rows_total - 2 - H), (1, Wp - 1 - W), (0, Cp - C)))

    def prep_w(w):                            # OIHW -> (3 dy, 3*Cp (dx,cin), Cp cout)
        wt = jnp.transpose(w, (2, 3, 1, 0))
        wt = jnp.pad(wt, ((0, 0), (0, 0), (0, Cp - C), (0, Cp - C)))
        return wt.reshape(3, 3 * Cp, Cp).astype(mxu_dtype)

    def prep_b(b):
        return jnp.pad(b, (0, Cp - C)).reshape(1, Cp).astype(jnp.float32)

    kernel = functools.partial(_residual_block_kernel, img_h=H, img_w=W, mr=mr)
    y_p = pl.pallas_call(
        kernel,
        out_shape=jax.ShapeDtypeStruct((N, H_pad, Wt, Cp), jnp.float32),
        grid=(N, n_row_tiles),
        in_specs=[
            # main row band: padded rows [i*TH, i*TH + TH)
            pl.BlockSpec((1, TH, Wp, Cp), lambda n, i: (n, i, 0, 0)),
            # 4-row halo band: padded rows [i*TH + TH, i*TH + TH + 4)
            pl.BlockSpec((1, 4, Wp, Cp),
                         lambda n, i: (n, (i + 1) * (TH // 4), 0, 0)),
            pl.BlockSpec((3, 3 * Cp, Cp), lambda n, i: (0, 0, 0)),   # w1 (resident)
            pl.BlockSpec((1, Cp), lambda n, i: (0, 0)),              # b1
            pl.BlockSpec((3, 3 * Cp, Cp), lambda n, i: (0, 0, 0)),   # w2 (resident)
            pl.BlockSpec((1, Cp), lambda n, i: (0, 0)),              # b2
        ],
        out_specs=pl.BlockSpec((1, TH, Wt, Cp), lambda n, i: (n, i, 0, 0)),
        scratch_shapes=[
            pltpu.VMEM((TH + 4, Wt, 3 * Cp), mxu_dtype),   # dx-folded input tile
            pltpu.VMEM((TH + 2, Wt, 3 * Cp), mxu_dtype),   # dx-folded intermediate
        ],
        compiler_params=pltpu.CompilerParams(
            dimension_semantics=("parallel", "parallel"),
            vmem_limit_bytes=48 * 1024 * 1024),
    )(x_p, x_p, prep_w(w1), prep_b(b1), prep_w(w2), prep_b(b2))

    y = y_p[:, :H, :W, :C]                                   # drop row/col/channel padding
    return jnp.transpose(y, (0, 3, 1, 2)).astype(x_nchw.dtype)


def _reference(x, w1, b1, w2, b2):
    C = x.shape[1]

    def conv(inp, w, b):
        out = lax.conv_general_dilated(
            inp, w, window_strides=(1, 1), padding=((1, 1), (1, 1)),
            dimension_numbers=("NCHW", "OIHW", "NCHW"))
        return out + b.reshape(1, C, 1, 1)

    h = jnp.maximum(conv(x, w1, b1), 0.0)
    return jnp.maximum(conv(h, w2, b2) + x, 0.0)


if __name__ == "__main__":
    N, C, H, W = 2, 4, 16, 16
    key = jax.random.PRNGKey(0)
    k1, k2, k3, k4, k5 = jax.random.split(key, 5)
    x = jax.random.normal(k1, (N, C, H, W), jnp.float32)
    # deterministic synthetic parameters (shapes from nn.Conv2d(C, C, 3, padding=1))
    w1 = jax.random.normal(k2, (C, C, 3, 3), jnp.float32) * 0.1
    b1 = jax.random.normal(k3, (C,), jnp.float32) * 0.1
    w2 = jax.random.normal(k4, (C, C, 3, 3), jnp.float32) * 0.1
    b2 = jax.random.normal(k5, (C,), jnp.float32) * 0.1

    ref = _reference(x, w1, b1, w2, b2)

    # exact-path check (f32 MXU operands)
    y32 = jax.block_until_ready(
        residual_block(x, w1, b1, w2, b2, mxu_dtype=jnp.float32))
    err32 = float(jnp.max(jnp.abs(y32 - ref)))
    assert y32.shape == (N, C, H, W)
    assert err32 < 1e-3, f"f32 path mismatch vs reference: {err32}"

    # default fast path (bf16 operands, f32 accumulation)
    ybf = jax.block_until_ready(residual_block(x, w1, b1, w2, b2))
    errbf = float(jnp.max(jnp.abs(ybf - ref)))
    assert ybf.shape == (N, C, H, W)
    assert errbf < 5e-2, f"bf16 path mismatch vs reference: {errbf}"

    print("KERNEL_OK")
</pallas_src>

<mosaic_0001>
module attributes {stable_mosaic.version = 11 : i64} {
  func.func @_residual_block_kernel(%arg0: i32, %arg1: i32, %arg2: memref<1x16x18x128xf32, #tpu.memory_space<vmem>>, %arg3: memref<1x4x18x128xf32, #tpu.memory_space<vmem>>, %arg4: memref<3x384x128xf32, #tpu.memory_space<vmem>>, %arg5: memref<1x128xf32, #tpu.memory_space<vmem>>, %arg6: memref<3x384x128xf32, #tpu.memory_space<vmem>>, %arg7: memref<1x128xf32, #tpu.memory_space<vmem>>, %arg8: memref<1x16x16x128xf32, #tpu.memory_space<vmem>>, %arg9: memref<20x16x384xf32, #tpu.memory_space<vmem>>, %arg10: memref<18x16x384xf32, #tpu.memory_space<vmem>>) attributes {dimension_semantics = [#tpu.dimension_semantics<parallel>, #tpu.dimension_semantics<parallel>], iteration_bounds = array<i64: 2, 1>, scalar_prefetch = 0 : i64, scratch_operands = 2 : i64, tpu.core_type = #tpu.core_type<tc>, window_params = [{transform_indices = @transform_0, window_bounds = array<i64: 1, 16, 18, 128>}, {transform_indices = @transform_1, window_bounds = array<i64: 1, 4, 18, 128>}, {pipeline_mode = #tpu.pipeline_mode<synchronous>, transform_indices = @transform_2, window_bounds = array<i64: 3, 384, 128>}, {pipeline_mode = #tpu.pipeline_mode<synchronous>, transform_indices = @transform_3, window_bounds = array<i64: 1, 128>}, {pipeline_mode = #tpu.pipeline_mode<synchronous>, transform_indices = @transform_4, window_bounds = array<i64: 3, 384, 128>}, {pipeline_mode = #tpu.pipeline_mode<synchronous>, transform_indices = @transform_5, window_bounds = array<i64: 1, 128>}, {transform_indices = @transform_6, window_bounds = array<i64: 1, 16, 16, 128>}]} {
    %c0 = arith.constant 0 : index
    %c0_0 = arith.constant 0 : index
    %c0_1 = arith.constant 0 : index
    %c0_2 = arith.constant 0 : index
    %0 = vector.load %arg2[%c0, %c0_0, %c0_1, %c0_2] : memref<1x16x18x128xf32, #tpu.memory_space<vmem>>, vector<1x16x16x128xf32>
    %1 = vector.shape_cast %0 : vector<1x16x16x128xf32> to vector<16x16x128xf32>
    %c0_3 = arith.constant 0 : index
    %c0_4 = arith.constant 0 : index
    %c0_5 = arith.constant 0 : index
    %2 = vector.load %arg9[%c0_3, %c0_4, %c0_5] : memref<20x16x384xf32, #tpu.memory_space<vmem>>, vector<16x16x128xf32>
    tpu.vector_store %arg9[%c0_3, %c0_4, %c0_5], %1 {strides = array<i32>} : memref<20x16x384xf32, #tpu.memory_space<vmem>>, vector<16x16x128xf32>,
    %c0_6 = arith.constant 0 : index
    %c0_7 = arith.constant 0 : index
    %c0_8 = arith.constant 0 : index
    %c0_9 = arith.constant 0 : index
    %3 = vector.load %arg3[%c0_6, %c0_7, %c0_8, %c0_9] : memref<1x4x18x128xf32, #tpu.memory_space<vmem>>, vector<1x4x16x128xf32>
    %4 = vector.shape_cast %3 : vector<1x4x16x128xf32> to vector<4x16x128xf32>
    %c16 = arith.constant 16 : index
    %c0_10 = arith.constant 0 : index
    %c0_11 = arith.constant 0 : index
    %5 = vector.load %arg9[%c16, %c0_10, %c0_11] : memref<20x16x384xf32, #tpu.memory_space<vmem>>, vector<4x16x128xf32>
    tpu.vector_store %arg9[%c16, %c0_10, %c0_11], %4 {strides = array<i32>} : memref<20x16x384xf32, #tpu.memory_space<vmem>>, vector<4x16x128xf32>,
    %c0_12 = arith.constant 0 : index
    %c0_13 = arith.constant 0 : index
    %c1 = arith.constant 1 : index
    %c0_14 = arith.constant 0 : index
    %6 = vector.load %arg2[%c0_12, %c0_13, %c1, %c0_14] : memref<1x16x18x128xf32, #tpu.memory_space<vmem>>, vector<1x16x16x128xf32>
    %7 = vector.shape_cast %6 : vector<1x16x16x128xf32> to vector<16x16x128xf32>
    %c0_15 = arith.constant 0 : index
    %c0_16 = arith.constant 0 : index
    %c128 = arith.constant 128 : index
    %8 = vector.load %arg9[%c0_15, %c0_16, %c128] : memref<20x16x384xf32, #tpu.memory_space<vmem>>, vector<16x16x128xf32>
    tpu.vector_store %arg9[%c0_15, %c0_16, %c128], %7 {strides = array<i32>} : memref<20x16x384xf32, #tpu.memory_space<vmem>>, vector<16x16x128xf32>,
    %c0_17 = arith.constant 0 : index
    %c0_18 = arith.constant 0 : index
    %c1_19 = arith.constant 1 : index
    %c0_20 = arith.constant 0 : index
    %9 = vector.load %arg3[%c0_17, %c0_18, %c1_19, %c0_20] : memref<1x4x18x128xf32, #tpu.memory_space<vmem>>, vector<1x4x16x128xf32>
    %10 = vector.shape_cast %9 : vector<1x4x16x128xf32> to vector<4x16x128xf32>
    %c16_21 = arith.constant 16 : index
    %c0_22 = arith.constant 0 : index
    %c128_23 = arith.constant 128 : index
    %11 = vector.load %arg9[%c16_21, %c0_22, %c128_23] : memref<20x16x384xf32, #tpu.memory_space<vmem>>, vector<4x16x128xf32>
    tpu.vector_store %arg9[%c16_21, %c0_22, %c128_23], %10 {strides = array<i32>} : memref<20x16x384xf32, #tpu.memory_space<vmem>>, vector<4x16x128xf32>,
    %c0_24 = arith.constant 0 : index
    %c0_25 = arith.constant 0 : index
    %c2 = arith.constant 2 : index
    %c0_26 = arith.constant 0 : index
    %12 = vector.load %arg2[%c0_24, %c0_25, %c2, %c0_26] : memref<1x16x18x128xf32, #tpu.memory_space<vmem>>, vector<1x16x16x128xf32>
    %13 = vector.shape_cast %12 : vector<1x16x16x128xf32> to vector<16x16x128xf32>
    %c0_27 = arith.constant 0 : index
    %c0_28 = arith.constant 0 : index
    %c256 = arith.constant 256 : index
    %14 = vector.load %arg9[%c0_27, %c0_28, %c256] : memref<20x16x384xf32, #tpu.memory_space<vmem>>, vector<16x16x128xf32>
    tpu.vector_store %arg9[%c0_27, %c0_28, %c256], %13 {strides = array<i32>} : memref<20x16x384xf32, #tpu.memory_space<vmem>>, vector<16x16x128xf32>,
    %c0_29 = arith.constant 0 : index
    %c0_30 = arith.constant 0 : index
    %c2_31 = arith.constant 2 : index
    %c0_32 = arith.constant 0 : index
    %15 = vector.load %arg3[%c0_29, %c0_30, %c2_31, %c0_32] : memref<1x4x18x128xf32, #tpu.memory_space<vmem>>, vector<1x4x16x128xf32>
    %16 = vector.shape_cast %15 : vector<1x4x16x128xf32> to vector<4x16x128xf32>
    %c16_33 = arith.constant 16 : index
    %c0_34 = arith.constant 0 : index
    %c256_35 = arith.constant 256 : index
    %17 = vector.load %arg9[%c16_33, %c0_34, %c256_35] : memref<20x16x384xf32, #tpu.memory_space<vmem>>, vector<4x16x128xf32>
    tpu.vector_store %arg9[%c16_33, %c0_34, %c256_35], %16 {strides = array<i32>} : memref<20x16x384xf32, #tpu.memory_space<vmem>>, vector<4x16x128xf32>,
    %cst = arith.constant 0.000000e+00 : f32
    %18 = vector.broadcast %cst : f32 to vector<18x1x128xf32>
    %c0_36 = arith.constant 0 : index
    %c0_37 = arith.constant 0 : index
    %c0_38 = arith.constant 0 : index
    %19 = vector.load %arg10[%c0_36, %c0_37, %c0_38] : memref<18x16x384xf32, #tpu.memory_space<vmem>>, vector<18x1x128xf32>
    tpu.vector_store %arg10[%c0_36, %c0_37, %c0_38], %18 {strides = array<i32>} : memref<18x16x384xf32, #tpu.memory_space<vmem>>, vector<18x1x128xf32>,
    %c0_39 = arith.constant 0 : index
    %c15 = arith.constant 15 : index
    %c256_40 = arith.constant 256 : index
    %20 = vector.load %arg10[%c0_39, %c15, %c256_40] : memref<18x16x384xf32, #tpu.memory_space<vmem>>, vector<18x1x128xf32>
    tpu.vector_store %arg10[%c0_39, %c15, %c256_40], %18 {strides = array<i32>} : memref<18x16x384xf32, #tpu.memory_space<vmem>>, vector<18x1x128xf32>,
    %c0_41 = arith.constant 0 : index
    %c0_42 = arith.constant 0 : index
    %21 = vector.load %arg5[%c0_41, %c0_42] : memref<1x128xf32, #tpu.memory_space<vmem>>, vector<1x128xf32>
    %c0_43 = arith.constant 0 : index
    %c0_44 = arith.constant 0 : index
    %22 = vector.load %arg7[%c0_43, %c0_44] : memref<1x128xf32, #tpu.memory_space<vmem>>, vector<1x128xf32>
    %c16_i32 = arith.constant 16 : i32
    %23 = arith.muli %arg1, %c16_i32 : i32
    %c0_45 = arith.constant 0 : index
    %c0_46 = arith.constant 0 : index
    %c0_47 = arith.constant 0 : index
    %24 = vector.load %arg9[%c0_45, %c0_46, %c0_47] : memref<20x16x384xf32, #tpu.memory_space<vmem>>, vector<16x16x384xf32>
    %25 = vector.shape_cast %24 : vector<16x16x384xf32> to vector<256x384xf32>
    %c0_48 = arith.constant 0 : index
    %c0_49 = arith.constant 0 : index
    %c0_50 = arith.constant 0 : index
    %26 = vector.load %arg4[%c0_48, %c0_49, %c0_50] : memref<3x384x128xf32, #tpu.memory_space<vmem>>, vector<1x384x128xf32>
    %27 = vector.shape_cast %26 : vector<1x384x128xf32> to vector<384x128xf32>
    %cst_51 = arith.constant dense<0.000000e+00> : vector<256x128xf32>
    %28 = tpu.matmul %25, %27, %cst_51 {dimension_numbers = #tpu.dot_dimension_numbers<[1], [0], [0], [1], [0, 0, 1, 1], [], []>} : vector<256x384xf32>, vector<384x128xf32>, vector<256x128xf32> -> vector<256x128xf32>
    %c1_52 = arith.constant 1 : index
    %c0_53 = arith.constant 0 : index
    %c0_54 = arith.constant 0 : index
    %29 = vector.load %arg9[%c1_52, %c0_53, %c0_54] : memref<20x16x384xf32, #tpu.memory_space<vmem>>, vector<16x16x384xf32>
    %30 = vector.shape_cast %29 : vector<16x16x384xf32> to vector<256x384xf32>
    %c1_55 = arith.constant 1 : index
    %c0_56 = arith.constant 0 : index
    %c0_57 = arith.constant 0 : index
    %31 = vector.load %arg4[%c1_55, %c0_56, %c0_57] : memref<3x384x128xf32, #tpu.memory_space<vmem>>, vector<1x384x128xf32>
    %32 = vector.shape_cast %31 : vector<1x384x128xf32> to vector<384x128xf32>
    %cst_58 = arith.constant dense<0.000000e+00> : vector<256x128xf32>
    %33 = tpu.matmul %30, %32, %cst_58 {dimension_numbers = #tpu.dot_dimension_numbers<[1], [0], [0], [1], [0, 0, 1, 1], [], []>} : vector<256x384xf32>, vector<384x128xf32>, vector<256x128xf32> -> vector<256x128xf32>
    %34 = arith.addf %28, %33 : vector<256x128xf32>
    %c2_59 = arith.constant 2 : index
    %c0_60 = arith.constant 0 : index
    %c0_61 = arith.constant 0 : index
    %35 = vector.load %arg9[%c2_59, %c0_60, %c0_61] : memref<20x16x384xf32, #tpu.memory_space<vmem>>, vector<16x16x384xf32>
    %36 = vector.shape_cast %35 : vector<16x16x384xf32> to vector<256x384xf32>
    %c2_62 = arith.constant 2 : index
    %c0_63 = arith.constant 0 : index
    %c0_64 = arith.constant 0 : index
    %37 = vector.load %arg4[%c2_62, %c0_63, %c0_64] : memref<3x384x128xf32, #tpu.memory_space<vmem>>, vector<1x384x128xf32>
    %38 = vector.shape_cast %37 : vector<1x384x128xf32> to vector<384x128xf32>
    %cst_65 = arith.constant dense<0.000000e+00> : vector<256x128xf32>
    %39 = tpu.matmul %36, %38, %cst_65 {dimension_numbers = #tpu.dot_dimension_numbers<[1], [0], [0], [1], [0, 0, 1, 1], [], []>} : vector<256x384xf32>, vector<384x128xf32>, vector<256x128xf32> -> vector<256x128xf32>
    %40 = arith.addf %34, %39 : vector<256x128xf32>
    %41 = vector.broadcast %21 : vector<1x128xf32> to vector<256x128xf32>
    %42 = arith.addf %40, %41 : vector<256x128xf32>
    %cst_66 = arith.constant 0.000000e+00 : f32
    %43 = vector.broadcast %cst_66 : f32 to vector<256x128xf32>
    %44 = arith.maximumf %42, %43 : vector<256x128xf32>
    %45 = vector.shape_cast %44 : vector<256x128xf32> to vector<16x16x128xf32>
    %c1_i32 = arith.constant 1 : i32
    %46 = arith.subi %23, %c1_i32 : i32
    %c0_i32 = arith.constant 0 : i32
    %47 = arith.addi %46, %c0_i32 : i32
    %48 = tpu.iota {dimensions = array<i32: 0>} : vector<16x16x128xi32>
    %49 = vector.broadcast %47 : i32 to vector<16x16x128xi32>
    %50 = arith.addi %49, %48 : vector<16x16x128xi32>
    %c0_i32_67 = arith.constant 0 : i32
    %51 = vector.broadcast %c0_i32_67 : i32 to vector<16x16x128xi32>
    %52 = arith.cmpi sge, %50, %51 : vector<16x16x128xi32>
    %c16_i32_68 = arith.constant 16 : i32
    %53 = vector.broadcast %c16_i32_68 : i32 to vector<16x16x128xi32>
    %54 = arith.cmpi slt, %50, %53 : vector<16x16x128xi32>
    %55 = arith.andi %52, %54 : vector<16x16x128xi1>
    %cst_69 = arith.constant 0.000000e+00 : f32
    %56 = vector.broadcast %cst_69 : f32 to vector<16x16x128xf32>
    %57 = arith.select %55, %45, %56 : vector<16x16x128xi1>, vector<16x16x128xf32>
    %58 = vector.extract_strided_slice %57 {offsets = [0, 0, 0], sizes = [16, 15, 128], strides = [1, 1, 1]} : vector<16x16x128xf32> to vector<16x15x128xf32>
    %c0_70 = arith.constant 0 : index
    %c1_71 = arith.constant 1 : index
    %c0_72 = arith.constant 0 : index
    %59 = vector.load %arg10[%c0_70, %c1_71, %c0_72] : memref<18x16x384xf32, #tpu.memory_space<vmem>>, vector<16x15x128xf32>
    tpu.vector_store %arg10[%c0_70, %c1_71, %c0_72], %58 {strides = array<i32>} : memref<18x16x384xf32, #tpu.memory_space<vmem>>, vector<16x15x128xf32>,
    %c0_73 = arith.constant 0 : index
    %c0_74 = arith.constant 0 : index
    %c128_75 = arith.constant 128 : index
    %60 = vector.load %arg10[%c0_73, %c0_74, %c128_75] : memref<18x16x384xf32, #tpu.memory_space<vmem>>, vector<16x16x128xf32>
    tpu.vector_store %arg10[%c0_73, %c0_74, %c128_75], %57 {strides = array<i32>} : memref<18x16x384xf32, #tpu.memory_space<vmem>>, vector<16x16x128xf32>,
    %61 = vector.extract_strided_slice %57 {offsets = [0, 1, 0], sizes = [16, 15, 128], strides = [1, 1, 1]} : vector<16x16x128xf32> to vector<16x15x128xf32>
    %c0_76 = arith.constant 0 : index
    %c0_77 = arith.constant 0 : index
    %c256_78 = arith.constant 256 : index
    %62 = vector.load %arg10[%c0_76, %c0_77, %c256_78] : memref<18x16x384xf32, #tpu.memory_space<vmem>>, vector<16x15x128xf32>
    tpu.vector_store %arg10[%c0_76, %c0_77, %c256_78], %61 {strides = array<i32>} : memref<18x16x384xf32, #tpu.memory_space<vmem>>, vector<16x15x128xf32>,
    %c16_79 = arith.constant 16 : index
    %c0_80 = arith.constant 0 : index
    %c0_81 = arith.constant 0 : index
    %63 = vector.load %arg9[%c16_79, %c0_80, %c0_81] : memref<20x16x384xf32, #tpu.memory_space<vmem>>, vector<2x16x384xf32>
    %64 = vector.shape_cast %63 : vector<2x16x384xf32> to vector<32x384xf32>
    %c0_82 = arith.constant 0 : index
    %c0_83 = arith.constant 0 : index
    %c0_84 = arith.constant 0 : index
    %65 = vector.load %arg4[%c0_82, %c0_83, %c0_84] : memref<3x384x128xf32, #tpu.memory_space<vmem>>, vector<1x384x128xf32>
    %66 = vector.shape_cast %65 : vector<1x384x128xf32> to vector<384x128xf32>
    %cst_85 = arith.constant dense<0.000000e+00> : vector<32x128xf32>
    %67 = tpu.matmul %64, %66, %cst_85 {dimension_numbers = #tpu.dot_dimension_numbers<[1], [0], [0], [1], [0, 0, 1, 1], [], []>} : vector<32x384xf32>, vector<384x128xf32>, vector<32x128xf32> -> vector<32x128xf32>
    %c17 = arith.constant 17 : index
    %c0_86 = arith.constant 0 : index
    %c0_87 = arith.constant 0 : index
    %68 = vector.load %arg9[%c17, %c0_86, %c0_87] : memref<20x16x384xf32, #tpu.memory_space<vmem>>, vector<2x16x384xf32>
    %69 = vector.shape_cast %68 : vector<2x16x384xf32> to vector<32x384xf32>
    %c1_88 = arith.constant 1 : index
    %c0_89 = arith.constant 0 : index
    %c0_90 = arith.constant 0 : index
    %70 = vector.load %arg4[%c1_88, %c0_89, %c0_90] : memref<3x384x128xf32, #tpu.memory_space<vmem>>, vector<1x384x128xf32>
    %71 = vector.shape_cast %70 : vector<1x384x128xf32> to vector<384x128xf32>
    %cst_91 = arith.constant dense<0.000000e+00> : vector<32x128xf32>
    %72 = tpu.matmul %69, %71, %cst_91 {dimension_numbers = #tpu.dot_dimension_numbers<[1], [0], [0], [1], [0, 0, 1, 1], [], []>} : vector<32x384xf32>, vector<384x128xf32>, vector<32x128xf32> -> vector<32x128xf32>
    %73 = arith.addf %67, %72 : vector<32x128xf32>
    %c18 = arith.constant 18 : index
    %c0_92 = arith.constant 0 : index
    %c0_93 = arith.constant 0 : index
    %74 = vector.load %arg9[%c18, %c0_92, %c0_93] : memref<20x16x384xf32, #tpu.memory_space<vmem>>, vector<2x16x384xf32>
    %75 = vector.shape_cast %74 : vector<2x16x384xf32> to vector<32x384xf32>
    %c2_94 = arith.constant 2 : index
    %c0_95 = arith.constant 0 : index
    %c0_96 = arith.constant 0 : index
    %76 = vector.load %arg4[%c2_94, %c0_95, %c0_96] : memref<3x384x128xf32, #tpu.memory_space<vmem>>, vector<1x384x128xf32>
    %77 = vector.shape_cast %76 : vector<1x384x128xf32> to vector<384x128xf32>
    %cst_97 = arith.constant dense<0.000000e+00> : vector<32x128xf32>
    %78 = tpu.matmul %75, %77, %cst_97 {dimension_numbers = #tpu.dot_dimension_numbers<[1], [0], [0], [1], [0, 0, 1, 1], [], []>} : vector<32x384xf32>, vector<384x128xf32>, vector<32x128xf32> -> vector<32x128xf32>
    %79 = arith.addf %73, %78 : vector<32x128xf32>
    %80 = vector.broadcast %21 : vector<1x128xf32> to vector<32x128xf32>
    %81 = arith.addf %79, %80 : vector<32x128xf32>
    %cst_98 = arith.constant 0.000000e+00 : f32
    %82 = vector.broadcast %cst_98 : f32 to vector<32x128xf32>
    %83 = arith.maximumf %81, %82 : vector<32x128xf32>
    %84 = vector.shape_cast %83 : vector<32x128xf32> to vector<2x16x128xf32>
    %c1_i32_99 = arith.constant 1 : i32
    %85 = arith.subi %23, %c1_i32_99 : i32
    %c16_i32_100 = arith.constant 16 : i32
    %86 = arith.addi %85, %c16_i32_100 : i32
    %87 = tpu.iota {dimensions = array<i32: 0>} : vector<2x16x128xi32>
    %88 = vector.broadcast %86 : i32 to vector<2x16x128xi32>
    %89 = arith.addi %88, %87 : vector<2x16x128xi32>
    %c0_i32_101 = arith.constant 0 : i32
    %90 = vector.broadcast %c0_i32_101 : i32 to vector<2x16x128xi32>
    %91 = arith.cmpi sge, %89, %90 : vector<2x16x128xi32>
    %c16_i32_102 = arith.constant 16 : i32
    %92 = vector.broadcast %c16_i32_102 : i32 to vector<2x16x128xi32>
    %93 = arith.cmpi slt, %89, %92 : vector<2x16x128xi32>
    %94 = arith.andi %91, %93 : vector<2x16x128xi1>
    %cst_103 = arith.constant 0.000000e+00 : f32
    %95 = vector.broadcast %cst_103 : f32 to vector<2x16x128xf32>
    %96 = arith.select %94, %84, %95 : vector<2x16x128xi1>, vector<2x16x128xf32>
    %97 = vector.extract_strided_slice %96 {offsets = [0, 0, 0], sizes = [2, 15, 128], strides = [1, 1, 1]} : vector<2x16x128xf32> to vector<2x15x128xf32>
    %c16_104 = arith.constant 16 : index
    %c1_105 = arith.constant 1 : index
    %c0_106 = arith.constant 0 : index
    %98 = vector.load %arg10[%c16_104, %c1_105, %c0_106] : memref<18x16x384xf32, #tpu.memory_space<vmem>>, vector<2x15x128xf32>
    tpu.vector_store %arg10[%c16_104, %c1_105, %c0_106], %97 {strides = array<i32>} : memref<18x16x384xf32, #tpu.memory_space<vmem>>, vector<2x15x128xf32>,
    %c16_107 = arith.constant 16 : index
    %c0_108 = arith.constant 0 : index
    %c128_109 = arith.constant 128 : index
    %99 = vector.load %arg10[%c16_107, %c0_108, %c128_109] : memref<18x16x384xf32, #tpu.memory_space<vmem>>, vector<2x16x128xf32>
    tpu.vector_store %arg10[%c16_107, %c0_108, %c128_109], %96 {strides = array<i32>} : memref<18x16x384xf32, #tpu.memory_space<vmem>>, vector<2x16x128xf32>,
    %100 = vector.extract_strided_slice %96 {offsets = [0, 1, 0], sizes = [2, 15, 128], strides = [1, 1, 1]} : vector<2x16x128xf32> to vector<2x15x128xf32>
    %c16_110 = arith.constant 16 : index
    %c0_111 = arith.constant 0 : index
    %c256_112 = arith.constant 256 : index
    %101 = vector.load %arg10[%c16_110, %c0_111, %c256_112] : memref<18x16x384xf32, #tpu.memory_space<vmem>>, vector<2x15x128xf32>
    tpu.vector_store %arg10[%c16_110, %c0_111, %c256_112], %100 {strides = array<i32>} : memref<18x16x384xf32, #tpu.memory_space<vmem>>, vector<2x15x128xf32>,
    %c0_113 = arith.constant 0 : index
    %c0_114 = arith.constant 0 : index
    %c0_115 = arith.constant 0 : index
    %102 = vector.load %arg10[%c0_113, %c0_114, %c0_115] : memref<18x16x384xf32, #tpu.memory_space<vmem>>, vector<16x16x384xf32>
    %103 = vector.shape_cast %102 : vector<16x16x384xf32> to vector<256x384xf32>
    %c0_116 = arith.constant 0 : index
    %c0_117 = arith.constant 0 : index
    %c0_118 = arith.constant 0 : index
    %104 = vector.load %arg6[%c0_116, %c0_117, %c0_118] : memref<3x384x128xf32, #tpu.memory_space<vmem>>, vector<1x384x128xf32>
    %105 = vector.shape_cast %104 : vector<1x384x128xf32> to vector<384x128xf32>
    %cst_119 = arith.constant dense<0.000000e+00> : vector<256x128xf32>
    %106 = tpu.matmul %103, %105, %cst_119 {dimension_numbers = #tpu.dot_dimension_numbers<[1], [0], [0], [1], [0, 0, 1, 1], [], []>} : vector<256x384xf32>, vector<384x128xf32>, vector<256x128xf32> -> vector<256x128xf32>
    %c1_120 = arith.constant 1 : index
    %c0_121 = arith.constant 0 : index
    %c0_122 = arith.constant 0 : index
    %107 = vector.load %arg10[%c1_120, %c0_121, %c0_122] : memref<18x16x384xf32, #tpu.memory_space<vmem>>, vector<16x16x384xf32>
    %108 = vector.shape_cast %107 : vector<16x16x384xf32> to vector<256x384xf32>
    %c1_123 = arith.constant 1 : index
    %c0_124 = arith.constant 0 : index
    %c0_125 = arith.constant 0 : index
    %109 = vector.load %arg6[%c1_123, %c0_124, %c0_125] : memref<3x384x128xf32, #tpu.memory_space<vmem>>, vector<1x384x128xf32>
    %110 = vector.shape_cast %109 : vector<1x384x128xf32> to vector<384x128xf32>
    %cst_126 = arith.constant dense<0.000000e+00> : vector<256x128xf32>
    %111 = tpu.matmul %108, %110, %cst_126 {dimension_numbers = #tpu.dot_dimension_numbers<[1], [0], [0], [1], [0, 0, 1, 1], [], []>} : vector<256x384xf32>, vector<384x128xf32>, vector<256x128xf32> -> vector<256x128xf32>
    %112 = arith.addf %106, %111 : vector<256x128xf32>
    %c2_127 = arith.constant 2 : index
    %c0_128 = arith.constant 0 : index
    %c0_129 = arith.constant 0 : index
    %113 = vector.load %arg10[%c2_127, %c0_128, %c0_129] : memref<18x16x384xf32, #tpu.memory_space<vmem>>, vector<16x16x384xf32>
    %114 = vector.shape_cast %113 : vector<16x16x384xf32> to vector<256x384xf32>
    %c2_130 = arith.constant 2 : index
    %c0_131 = arith.constant 0 : index
    %c0_132 = arith.constant 0 : index
    %115 = vector.load %arg6[%c2_130, %c0_131, %c0_132] : memref<3x384x128xf32, #tpu.memory_space<vmem>>, vector<1x384x128xf32>
    %116 = vector.shape_cast %115 : vector<1x384x128xf32> to vector<384x128xf32>
    %cst_133 = arith.constant dense<0.000000e+00> : vector<256x128xf32>
    %117 = tpu.matmul %114, %116, %cst_133 {dimension_numbers = #tpu.dot_dimension_numbers<[1], [0], [0], [1], [0, 0, 1, 1], [], []>} : vector<256x384xf32>, vector<384x128xf32>, vector<256x128xf32> -> vector<256x128xf32>
    %118 = arith.addf %112, %117 : vector<256x128xf32>
    %c2_134 = arith.constant 2 : index
    %c0_135 = arith.constant 0 : index
    %c128_136 = arith.constant 128 : index
    %119 = vector.load %arg9[%c2_134, %c0_135, %c128_136] : memref<20x16x384xf32, #tpu.memory_space<vmem>>, vector<16x16x128xf32>
    %120 = vector.shape_cast %119 : vector<16x16x128xf32> to vector<256x128xf32>
    %121 = vector.broadcast %22 : vector<1x128xf32> to vector<256x128xf32>
    %122 = arith.addf %118, %121 : vector<256x128xf32>
    %123 = arith.addf %122, %120 : vector<256x128xf32>
    %cst_137 = arith.constant 0.000000e+00 : f32
    %124 = vector.broadcast %cst_137 : f32 to vector<256x128xf32>
    %125 = arith.maximumf %123, %124 : vector<256x128xf32>
    %126 = vector.shape_cast %125 : vector<256x128xf32> to vector<16x16x128xf32>
    %c0_138 = arith.constant 0 : index
    %c0_139 = arith.constant 0 : index
    %c0_140 = arith.constant 0 : index
    %c0_141 = arith.constant 0 : index
    %127 = vector.load %arg8[%c0_138, %c0_139, %c0_140, %c0_141] : memref<1x16x16x128xf32, #tpu.memory_space<vmem>>, vector<1x16x16x128xf32>
    %128 = vector.shape_cast %127 : vector<1x16x16x128xf32> to vector<16x16x128xf32>
    %129 = vector.shape_cast %126 : vector<16x16x128xf32> to vector<1x16x16x128xf32>
    tpu.vector_store %arg8[%c0_138, %c0_139, %c0_140, %c0_141], %129 {strides = array<i32>} : memref<1x16x16x128xf32, #tpu.memory_space<vmem>>, vector<1x16x16x128xf32>,
    return
  }
  func.func @transform_0(%arg0: i32, %arg1: i32) -> (i32, i32, i32, i32) {
    %c0_i32 = arith.constant 0 : i32
    %c0_i32_0 = arith.constant 0 : i32
    %c0_i32_1 = arith.constant 0 : i32
    return %arg0, %arg1, %c0_i32, %c0_i32_0 : i32, i32, i32, i32
  }
  func.func @transform_1(%arg0: i32, %arg1: i32) -> (i32, i32, i32, i32) {
    %c1_i32 = arith.constant 1 : i32
    %0 = arith.addi %arg1, %c1_i32 : i32
    %c4_i32 = arith.constant 4 : i32
    %1 = arith.muli %0, %c4_i32 : i32
    %c0_i32 = arith.constant 0 : i32
    %c0_i32_0 = arith.constant 0 : i32
    %c0_i32_1 = arith.constant 0 : i32
    return %arg0, %1, %c0_i32, %c0_i32_0 : i32, i32, i32, i32
  }
  func.func @transform_2(%arg0: i32, %arg1: i32) -> (i32, i32, i32) {
    %c0_i32 = arith.constant 0 : i32
    %c0_i32_0 = arith.constant 0 : i32
    %c0_i32_1 = arith.constant 0 : i32
    %c0_i32_2 = arith.constant 0 : i32
    return %c0_i32, %c0_i32_0, %c0_i32_1 : i32, i32, i32
  }
  func.func @transform_3(%arg0: i32, %arg1: i32) -> (i32, i32) {
    %c0_i32 = arith.constant 0 : i32
    %c0_i32_0 = arith.constant 0 : i32
    %c0_i32_1 = arith.constant 0 : i32
    return %c0_i32, %c0_i32_0 : i32, i32
  }
  func.func @transform_4(%arg0: i32, %arg1: i32) -> (i32, i32, i32) {
    %c0_i32 = arith.constant 0 : i32
    %c0_i32_0 = arith.constant 0 : i32
    %c0_i32_1 = arith.constant 0 : i32
    %c0_i32_2 = arith.constant 0 : i32
    return %c0_i32, %c0_i32_0, %c0_i32_1 : i32, i32, i32
  }
  func.func @transform_5(%arg0: i32, %arg1: i32) -> (i32, i32) {
    %c0_i32 = arith.constant 0 : i32
    %c0_i32_0 = arith.constant 0 : i32
    %c0_i32_1 = arith.constant 0 : i32
    return %c0_i32, %c0_i32_0 : i32, i32
  }
  func.func @transform_6(%arg0: i32, %arg1: i32) -> (i32, i32, i32, i32) {
    %c0_i32 = arith.constant 0 : i32
    %c0_i32_0 = arith.constant 0 : i32
    %c0_i32_1 = arith.constant 0 : i32
    return %arg0, %arg1, %c0_i32, %c0_i32_0 : i32, i32, i32, i32
  }
}

</mosaic_0001>

<bundles_post_ra>
// kernel: tpu_custom_call.1
= control target key start
LH: loop header
LB: loop body
LE: loop exit
PB: predicated region body
PF: predicated region fallthrough
CT: control target
= control target key end

     0   :  { %11 = vsyncpa [#allocation5], 0  ;;  %s11839_s0 = inlined_call_operand.vmem [shape: f32[2,32,18,128], index: 0, kind: input, shape index: {}]   ;;  %s11840_s1 = inlined_call_operand.vmem [shape: f32[2,32,18,128], index: 1, kind: input, shape index: {}]   ;;  %s11841_s2 = inlined_call_operand.vmem [shape: f32[3,384,128], index: 2, kind: input, shape index: {}]   ;;  %s11842_s3 = inlined_call_operand.vmem [shape: f32[1,128], index: 3, kind: input, shape index: {}]   ;;  %s11843_s4 = inlined_call_operand.vmem [shape: f32[3,384,128], index: 4, kind: input, shape index: {}]   ;;  %s11844_s5 = inlined_call_operand.vmem [shape: f32[1,128], index: 5, kind: input, shape index: {}]   ;;  %s11845_s6 = inlined_call_operand.hbm [shape: f32[2,16,16,128], index: 6, kind: output, shape index: {}]  }
   0x1   :  { %13 = vsyncpa [#allocation5 + $0x1], 0  ;;  %s8083_s21 = smov 0   ;;  %s8085_s22 = smov 0  }
   0x2   :  { %s8087_s23 = smov 0   ;;  %s8089_s24 = smov 0  }
   0x3   :  { %s8091_s25 = smov 0   ;;  %s8093_s26 = smov 0  }
   0x4 LB: > { %s5750_s27 = sadd.s32 4294967295, %s8041_s26   ;;  %s5751_s28 = sadd.s32 4294967294, %s8041_s26   ;;  %s8041_s26 = sphi %s8093_s26, %s19_s26   ;;  %s8037_s25 = sphi %s8091_s25, %s12043_s25   ;;  %s8033_s24 = sphi %s8089_s24, %s12042_s24   ;;  %s8029_s23 = sphi %s8087_s23, %s12041_s23   ;;  %s8025_s22 = sphi %s8085_s22, %s12040_s22   ;;  %s8021_s21 = sphi %s8083_s21, %s12039_s21  }
   0x5   : > { %s31_s29 = sadd.s32 1, %s8037_s25  ;;  %s184_s30 = sadd.s32 1, %s8029_s23 }
   0x6   : > { %p33_p0 = scmp.ge.s32.totalorder %s31_s29, 2  ;;  %p194_p1 = scmp.ne.s32.totalorder %s8029_s23, %s8025_s22 }
   0x7   : > { %p195_p2 = scmp.eq.s32.totalorder %s5750_s27, 1  ;;  %p200_p3 = scmp.ne.s32.totalorder %s8025_s22, %s8021_s21 }
   0x8   : > { %s12045_s29 = smov (%p33_p0, %s31_s29), 0  ;;  %p201_p5 = scmp.eq.s32.totalorder %s5751_s28, 1 }
   0x9   : > { %p8123_p4 = por %p195_p2, %p194_p1  ;;  %s179_s8 = ssub.s32 %s8037_s25, %s12045_s29 }
   0xa   : > { %p5754_p6 = scmp.ge.s32.totalorder %s8041_s26, 1  ;;  %p182_p7 = scmp.eq.s32.totalorder %s179_s8, 0 }
   0xb   : > { %p8130_p8 = por %p201_p5, %p200_p3  ;;  %p263_p9 = scmp.lt.s32.totalorder %s8041_s26, 3 }
   0xc   : > { %s8136_s10 = scalar_select %p182_p7, %s8029_s23, %s184_s30  }
   0xd   : > { %p264_p10 = pnand %p5754_p6, %p263_p9 }
   0xf   : > { %267 = sbr.rel (%p264_p10) target bundleno = 1174 (0x496), region = 44 }
  0x16   : > { %v5758_v0 = vld [vmem:[%s11841_s2 + $0x180] sm:$0xff]  ;;  %v5759_v1 = vld [vmem:[%s11841_s2 + $0x188] sm:$0xff]  ;;  %p311_p11 = scmp.lt.s32.totalorder %s8033_s24, 1  ;;  %v11872_v3 = vmov 0.0|0.0   ;;  %v5760_v6 = vld [vmem:[%s11841_s2 + $0x190] sm:$0xff]  ;;  %vm2634_vm0 = vcmask 1040384  }
  0x17   : > { %v5790_v2 = vld [vmem:[%s11841_s2 + $0x280] sm:$0xff]  ;;  %7130 = vmatprep.subr.bf16.mxu0 %v11872_v3  ;;  %v7131_v4 = vpack.c.bf16 %v5759_v1, %v5758_v0  ;;  %v5791_v5 = vld [vmem:[%s11841_s2 + $0x288] sm:$0xff]  ;;  %v5761_v7 = vld [vmem:[%s11841_s2 + $0x198] sm:$0xff]  ;;  %vm2779_vm1 = vcmask 1046528   ;;  %s307_s20 = sand.u32 1, %s8025_s22  }
  0x18   : > { %v7178_v8 = vpack.c.bf16 %v5791_v5, %v5790_v2  ;;  %v5792_v9 = vld [vmem:[%s11841_s2 + $0x290] sm:$0xff]  ;;  %v5793_v10 = vld [vmem:[%s11841_s2 + $0x298] sm:$0xff]  ;;  %s8165_s13 = scalar_select %p311_p11, %s8033_s24, 1  ;;  %v7134_v11 = vpack.c.bf16 %v5761_v7, %v5760_v6  ;;  %v5794_v13 = vld [vmem:[%s11841_s2 + $0x2a0] sm:$0xff] }
  0x19   : > { %7132 = vmatpush1.bf16.msra.mxu0 %v7131_v4  ;;  %v7182_v12 = vpack.c.bf16 %v5793_v10, %v5792_v9  ;;  %v5795_v14 = vld [vmem:[%s11841_s2 + $0x2a8] sm:$0xff]  ;;  %v5762_v15 = vld [vmem:[%s11841_s2 + $0x1a0] sm:$0xff]  ;;  %v5796_v19 = vld [vmem:[%s11841_s2 + $0x2b0] sm:$0xff]  ;;  %s5755_s8 = sshll.u32 %s307_s20, 8  ;;  %s11793_s19 = scalar_lea.sflag [#allocation5], %s307_s20 }
  0x1a   : > { %7179 = vmatprep.subr.bf16.mxu1 %v7178_v8  ;;  %7133 = vmatprep.subr.bf16.mxu0 %v11872_v3  ;;  %v5763_v16 = vld [vmem:[%s11841_s2 + $0x1a8] sm:$0xff]  ;;  %s7828_s28 = smul.u32 768, %s8165_s13  ;;  %v7186_v17 = vpack.c.bf16 %v5795_v14, %v5794_v13  ;;  %v5797_v20 = vld [vmem:[%s11841_s2 + $0x2b8] sm:$0xff]  ;;  %v5764_v21 = vld [vmem:[%s11841_s2 + $0x1b0] sm:$0xff]  ;;  %s11628_s12 = scalar_lea.vmem [#allocation4], %s5755_s8 }
  0x1b   : > { %7181 = vmatpush3.bf16.msra.mxu1 %v7178_v8  ;;  %v7137_v18 = vpack.c.bf16 %v5763_v16, %v5762_v15  ;;  %v5765_v22 = vld [vmem:[%s11841_s2 + $0x1b8] sm:$0xff]  ;;  %v7190_v23 = vpack.c.bf16 %v5797_v20, %v5796_v19  ;;  %v5798_v26 = vld [vmem:[%s11841_s2 + $0x2c0] sm:$0xff]  ;;  %v5799_v27 = vld [vmem:[%s11841_s2 + $0x2c8] sm:$0xff] }
  0x1c   : > { %7183 = vmatprep.subr.bf16.mxu1 %v7182_v12  ;;  %s8192_s16 = scalar_lea.vmem %s11839_s0, %s7828_s28  ;;  %v7140_v25 = vpack.c.bf16 %v5765_v22, %v5764_v21  ;;  %v5766_v28 = vld [vmem:[%s11841_s2 + $0x1c0] sm:$0xff]  ;;  %v5767_v29 = vld [vmem:[%s11841_s2 + $0x1c8] sm:$0xff]  ;;  %v7194_v30 = vpack.c.bf16 %v5799_v27, %v5798_v26  ;;  %v5800_v32 = vld [vmem:[%s11841_s2 + $0x2d0] sm:$0xff]  ;;  %s6054_s14 = sadd.s32 384, %s7828_s28 }
  0x1d   : > { %7135 = vmatpush1.bf16.msra.mxu0 %v7134_v11  ;;  %v500_v24 = vld [vmem:[%s8192_s16 + $0x1a] sm:$0xff]  ;;  %v7143_v31 = vpack.c.bf16 %v5767_v29, %v5766_v28  ;;  %v5768_v34 = vld [vmem:[%s11841_s2 + $0x1d0] sm:$0xff]  ;;  %v5803_v39 = vld [vmem:[%s11841_s2 + $0x2e8] sm:$0xff]  ;;  %s8642_s11 = scalar_lea.vmem %s11840_s1, %s6054_s14  ;;  %s5647_s14 = sshll.u32 %s11628_s12, 4  ;;  %s11788_s14 = int_to_ptr.vmem [resolvable:$true] %s5647_s14 }
  0x1e   : > { %7136 = vmatprep.subr.bf16.mxu0 %v11872_v3  ;;  %6568 = vmatprep.mubr.f32.mxu1 %v500_v24  ;;  %v5801_v33 = vld [vmem:[%s11841_s2 + $0x2d8] sm:$0xff]  ;;  %v5802_v38 = vld [vmem:[%s11841_s2 + $0x2e0] sm:$0xff]  ;;  %v5771_v41 = vld [vmem:[%s11841_s2 + $0x1e8] sm:$0xff] }
  0x1f   : > { %7185 = vmatpush3.bf16.msra.mxu1 %v7182_v12  ;;  %v5769_v35 = vld [vmem:[%s11841_s2 + $0x1d8] sm:$0xff]  ;;  %v7198_v36 = vpack.c.bf16 %v5801_v33, %v5800_v32  ;;  %v5770_v40 = vld [vmem:[%s11841_s2 + $0x1e0] sm:$0xff]  ;;  %v7202_v42 = vpack.c.bf16 %v5803_v39, %v5802_v38  ;;  %v5804_v44 = vld [vmem:[%s11841_s2 + $0x2f0] sm:$0xff] }
  0x20   : > { %7187 = vmatprep.subr.bf16.mxu1 %v7186_v17  ;;  %v7146_v37 = vpack.c.bf16 %v5769_v35, %v5768_v34  ;;  %v7149_v43 = vpack.c.bf16 %v5771_v41, %v5770_v40  ;;  %v5805_v45 = vld [vmem:[%s11841_s2 + $0x2f8] sm:$0xff]  ;;  %v5772_v46 = vld [vmem:[%s11841_s2 + $0x1f0] sm:$0xff]  ;;  %v5774_v51 = vld [vmem:[%s11841_s2 + $0x200] sm:$0xff] }
  0x21   : > { %7138 = vmatpush1.bf16.msra.mxu0 %v7137_v18  ;;  %v5773_v47 = vld [vmem:[%s11841_s2 + $0x1f8] sm:$0xff]  ;;  %v7206_v48 = vpack.c.bf16 %v5805_v45, %v5804_v44  ;;  %v5775_v52 = vld [vmem:[%s11841_s2 + $0x208] sm:$0xff]  ;;  %v713_v53 = vld [vmem:[%s11841_s2] sm:$0xff] }
  0x22   : > { %7139 = vmatprep.subr.bf16.mxu0 %v11872_v3  ;;  %v8255_v49 = vld [vmem:[%s8192_s16 + $0x19] sm:$0xff]  ;;  %v7152_v50 = vpack.c.bf16 %v5773_v47, %v5772_v46  ;;  %v714_v54 = vld [vmem:[%s11841_s2 + $0x8] sm:$0xff]  ;;  %v7155_v55 = vpack.c.bf16 %v5775_v52, %v5774_v51  ;;  %v5776_v56 = vld [vmem:[%s11841_s2 + $0x210] sm:$0xff] }
  0x23   : > { %7189 = vmatpush3.bf16.msra.mxu1 %v7186_v17  ;;  %971 = vmatprep.mubr.f32.mxu0 %v8255_v49  ;;  %v5777_v57 = vld [vmem:[%s11841_s2 + $0x218] sm:$0xff]  ;;  %v8279_v58 = vld [vmem:[%s8192_s16 + $0x22] sm:$0xff]  ;;  %v7211_v59 = vpack.c.bf16 %v714_v54, %v713_v53  ;;  %v715_v61 = vld [vmem:[%s11841_s2 + $0x10] sm:$0xff] }
  0x24   : > { %7191 = vmatprep.subr.bf16.mxu1 %v7190_v23  ;;  %v8283_v60 = vld [vmem:[%s8192_s16 + $0x32] sm:$0xff]  ;;  %v7158_v63 = vpack.c.bf16 %v5777_v57, %v5776_v56  ;;  %v5778_v0 = vld [vmem:[%s11841_s2 + $0x220] sm:$0xff]  ;;  %v5779_v1 = vld [vmem:[%s11841_s2 + $0x228] sm:$0xff] }
  0x25   : > { %7141 = vmatpush1.bf16.msra.mxu0 %v7140_v25  ;;  %v716_v62 = vld [vmem:[%s11841_s2 + $0x18] sm:$0xff]  ;;  %v8305_v5 = vld [vmem:[%s8192_s16 + $0x4a] sm:$0xff]  ;;  %v717_v6 = vld [vmem:[%s11841_s2 + $0x20] sm:$0xff]  ;;  %v7161_v8 = vpack.c.bf16 %v5779_v1, %v5778_v0 }
  0x26   : > { %7142 = vmatprep.subr.bf16.mxu0 %v11872_v3  ;;  %v8301_v2 = vld [vmem:[%s8192_s16 + $0x3a] sm:$0xff]  ;;  %v7214_v4 = vpack.c.bf16 %v716_v62, %v715_v61  ;;  %v718_v7 = vld [vmem:[%s11841_s2 + $0x28] sm:$0xff]  ;;  %v5780_v9 = vld [vmem:[%s11841_s2 + $0x230] sm:$0xff] }
  0x27   : > { %7193 = vmatpush3.bf16.msra.mxu1 %v7190_v23  ;;  %v5781_v10 = vld [vmem:[%s11841_s2 + $0x238] sm:$0xff]  ;;  %v7217_v12 = vpack.c.bf16 %v718_v7, %v717_v6  ;;  %v8327_v13 = vld [vmem:[%s8192_s16 + $0x62] sm:$0xff]  ;;  %v719_v14 = vld [vmem:[%s11841_s2 + $0x30] sm:$0xff] }
  0x28   : > { %7195 = vmatprep.subr.bf16.mxu1 %v7194_v30  ;;  %v8323_v11 = vld [vmem:[%s8192_s16 + $0x52] sm:$0xff]  ;;  %v7164_v16 = vpack.c.bf16 %v5781_v10, %v5780_v9  ;;  %v5782_v17 = vld [vmem:[%s11841_s2 + $0x240] sm:$0xff]  ;;  %v5783_v18 = vld [vmem:[%s11841_s2 + $0x248] sm:$0xff] }
  0x29   : > { %7144 = vmatpush1.bf16.msra.mxu0 %v7143_v31  ;;  %v720_v15 = vld [vmem:[%s11841_s2 + $0x38] sm:$0xff]  ;;  %v8345_v19 = vld [vmem:[%s8192_s16 + $0x6a] sm:$0xff]  ;;  %v721_v22 = vld [vmem:[%s11841_s2 + $0x40] sm:$0xff]  ;;  %v7167_v24 = vpack.c.bf16 %v5783_v18, %v5782_v17 }
  0x2a   : > { %7145 = vmatprep.subr.bf16.mxu0 %v11872_v3  ;;  %v7220_v20 = vpack.c.bf16 %v720_v15, %v719_v14  ;;  %v8349_v21 = vld [vmem:[%s8192_s16 + $0x7a] sm:$0xff]  ;;  %v722_v23 = vld [vmem:[%s11841_s2 + $0x48] sm:$0xff]  ;;  %v5784_v25 = vld [vmem:[%s11841_s2 + $0x250] sm:$0xff] }
  0x2b   : > { %7197 = vmatpush3.bf16.msra.mxu1 %v7194_v30  ;;  %v5785_v26 = vld [vmem:[%s11841_s2 + $0x258] sm:$0xff]  ;;  %v8367_v27 = vld [vmem:[%s8192_s16 + $0x82] sm:$0xff]  ;;  %v7223_v28 = vpack.c.bf16 %v722_v23, %v721_v22  ;;  %v723_v30 = vld [vmem:[%s11841_s2 + $0x50] sm:$0xff] }
  0x2c   : > { %7199 = vmatprep.subr.bf16.mxu1 %v7198_v36  ;;  %v8371_v29 = vld [vmem:[%s8192_s16 + $0x92] sm:$0xff]  ;;  %v7170_v32 = vpack.c.bf16 %v5785_v26, %v5784_v25  ;;  %v5786_v33 = vld [vmem:[%s11841_s2 + $0x260] sm:$0xff]  ;;  %v5787_v34 = vld [vmem:[%s11841_s2 + $0x268] sm:$0xff] }
  0x2d   : > { %7147 = vmatpush1.bf16.msra.mxu0 %v7146_v37  ;;  %v724_v31 = vld [vmem:[%s11841_s2 + $0x58] sm:$0xff]  ;;  %v8393_v37 = vld [vmem:[%s8192_s16 + $0xaa] sm:$0xff]  ;;  %v725_v38 = vld [vmem:[%s11841_s2 + $0x60] sm:$0xff]  ;;  %v7173_v40 = vpack.c.bf16 %v5787_v34, %v5786_v33 }
  0x2e   : > { %7148 = vmatprep.subr.bf16.mxu0 %v11872_v3  ;;  %v8389_v35 = vld [vmem:[%s8192_s16 + $0x9a] sm:$0xff]  ;;  %v726_v39 = vld [vmem:[%s11841_s2 + $0x68] sm:$0xff]  ;;  %v5788_v41 = vld [vmem:[%s11841_s2 + $0x270] sm:$0xff] }
  0x2f   : > { %7201 = vmatpush3.bf16.msra.mxu1 %v7198_v36  ;;  %v7226_v36 = vpack.c.bf16 %v724_v31, %v723_v30  ;;  %v7229_v44 = vpack.c.bf16 %v726_v39, %v725_v38  ;;  %v745_v45 = vld [vmem:[%s11841_s2 + $0x100] sm:$0xff]  ;;  %v746_v46 = vld [vmem:[%s11841_s2 + $0x108] sm:$0xff]  ;;  %v748_v56 = vld [vmem:[%s11841_s2 + $0x118] sm:$0xff] }
  0x30   : > { %7203 = vmatprep.subr.bf16.mxu1 %v7202_v42  ;;  %v8421_v47 = vld [vmem:[%s8192_s16 + $0xc2] sm:$0xff]  ;;  %v7258_v52 = vpack.c.bf16 %v746_v46, %v745_v45  ;;  %v8433_v53 = vld [vmem:[%s8192_s16 + $0xca] sm:$0xff]  ;;  %v8443_v57 = vld [vmem:[%s8192_s16 + $0xda] sm:$0xff] }
  0x31   : > { %7150 = vmatpush1.bf16.msra.mxu0 %v7149_v43  ;;  %v8411_v43 = vld [vmem:[%s8192_s16 + $0xb2] sm:$0xff]  ;;  %v730_v61 = vld [vmem:[%s11841_s2 + $0x88] sm:$0xff]  ;;  %v749_v6 = vld [vmem:[%s11841_s2 + $0x120] sm:$0xff] }
  0x32   : > { %7151 = vmatprep.subr.bf16.mxu0 %v11872_v3  ;;  %v8452_v62 = vld [vmem:[%s8192_s16 + $0x18] sm:$0xff]  ;;  %v8460_v1 = vld [vmem:[%s8192_s16 + $0xe2] sm:$0xff]  ;;  %v731_v9 = vld [vmem:[%s11841_s2 + $0x90] sm:$0xff] }
  0x33   : > { %7205 = vmatpush3.bf16.msra.mxu1 %v7202_v42  ;;  %v5789_v42 = vld [vmem:[%s11841_s2 + $0x278] sm:$0xff]  ;;  %v750_v7 = vld [vmem:[%s11841_s2 + $0x128] sm:$0xff]  ;;  %v751_v18 = vld [vmem:[%s11841_s2 + $0x130] sm:$0xff] }
  0x34   : > { %7207 = vmatprep.subr.bf16.mxu1 %v7206_v48  ;;  %v7176_v51 = vpack.c.bf16 %v5789_v42, %v5788_v41  ;;  %v732_v10 = vld [vmem:[%s11841_s2 + $0x98] sm:$0xff]  ;;  %v7266_v15 = vpack.c.bf16 %v750_v7, %v749_v6  ;;  %v8500_v22 = vld [vmem:[%s8192_s16 + $0x10a] sm:$0xff]  ;;  %v733_v23 = vld [vmem:[%s11841_s2 + $0xa0] sm:$0xff] }
  0x35   : > { %7153 = vmatpush1.bf16.msra.mxu0 %v7152_v50  ;;  %v728_v50 = vld [vmem:[%s11841_s2 + $0x78] sm:$0xff]  ;;  %v7238_v17 = vpack.c.bf16 %v732_v10, %v731_v9  ;;  %v8510_v25 = vld [vmem:[%s8192_s16 + $0x30] sm:$0xff]  ;;  %v754_v33 = vld [vmem:[%s11841_s2 + $0x148] sm:$0xff] }
  0x36   : > { %7154 = vmatprep.subr.bf16.mxu0 %v11872_v3  ;;  %v8485_v14 = vld [vmem:[%s8192_s16 + $0x31] sm:$0xff]  ;;  %v8514_v26 = vld [vmem:[%s8192_s16 + $0x39] sm:$0xff]  ;;  %v8529_v34 = vld [vmem:[%s8192_s16 + $0x122] sm:$0xff] }
  0x37   : > { %7209 = vmatpush3.bf16.msra.mxu1 %v7206_v48  ;;  %v727_v48 = vld [vmem:[%s11841_s2 + $0x70] sm:$0xff]  ;;  %v736_v38 = vld [vmem:[%s11841_s2 + $0xb8] sm:$0xff]  ;;  %v8607_v10 = vld [vmem:[%s8192_s16 + $0x61] sm:$0xff] }
  0x38   : > { %7210 = vmatprep.subr.bf16.mxu1 %v11872_v3  ;;  %v7232_v54 = vpack.c.bf16 %v728_v50, %v727_v48  ;;  %v8518_v30 = vld [vmem:[%s8192_s16 + $0x112] sm:$0xff]  ;;  %v8549_v42 = vld [vmem:[%s8192_s16 + $0x12a] sm:$0xff]  ;;  %v8560_v48 = vld [vmem:[%s8192_s16 + $0x13a] sm:$0xff] }
  0x39   : > { %7156 = vmatpush1.bf16.msra.mxu0 %v7155_v55  ;;  %v747_v55 = vld [vmem:[%s11841_s2 + $0x110] sm:$0xff]  ;;  %v8539_v39 = vld [vmem:[%s8192_s16 + $0x38] sm:$0xff]  ;;  %11903 = vst [vmem:[#allocation8_spill] sm:$0xff] %v8560_v48  ;;  %v737_v50 = vld [vmem:[%s11841_s2 + $0xc0] sm:$0xff] }
  0x3a   : > { %6569 = vmatmul.mubr.f32.vlgmr.msra.gmra.mrb[0].mxu1 %v8279_v58  ;;  %7157 = vmatprep.subr.bf16.mxu0 %v11872_v3  ;;  %v7262_v0 = vpack.c.bf16 %v748_v56, %v747_v55  ;;  %v755_v45 = vld [vmem:[%s11841_s2 + $0x150] sm:$0xff]  ;;  %v756_v46 = vld [vmem:[%s11841_s2 + $0x158] sm:$0xff]  ;;  %v8581_v56 = vld [vmem:[%s8192_s16 + $0x142] sm:$0xff] }
  0x3b   : > { %7212 = vmatpush1.bf16.msra.mxu1 %v7211_v59  ;;  %6571 = vmatprep.mubr.f32.mxu1 %v8283_v60  ;;  %v729_v59 = vld [vmem:[%s11841_s2 + $0x80] sm:$0xff]  ;;  %v8577_v55 = vpack.c.bf16 %v756_v46, %v755_v45  ;;  %11905 = vst [vmem:[#allocation10_spill] sm:$0xff] %v8581_v56  ;;  %v739_v6 = vld [vmem:[%s11841_s2 + $0xd0] sm:$0xff]  ;;  %v740_v7 = vld [vmem:[%s11841_s2 + $0xd8] sm:$0xff] }
  0x3c   : > { %7213 = vmatprep.subr.bf16.mxu1 %v11872_v3  ;;  %v8602_v9 = vld [vmem:[%s8192_s16 + $0x50] sm:$0xff]  ;;  %v562_v45 = vld [vmem:[%s8642_s11 + $0x2] sm:$0xff] }
  0x3d   : > { %7159 = vmatpush1.bf16.msra.mxu0 %v7158_v63  ;;  %v8456_v63 = vld [vmem:[%s8192_s16 + $0x21] sm:$0xff]  ;;  %11904 = vst [vmem:[#allocation9_spill] sm:$0xff] %v8577_v55  ;;  %v743_v46 = vld [vmem:[%s11841_s2 + $0xf0] sm:$0xff] }
  0x3e   : > { %6572 = vmatmul.mubr.f32.gmra.mrb[2].mxu1 %v8301_v2  ;;  %7160 = vmatprep.subr.bf16.mxu0 %v11872_v3 }
  0x3f   : > { %7215 = vmatpush1.bf16.msra.mxu1 %v7214_v4  ;;  %6574 = vmatprep.mubr.f32.mxu1 %v8305_v5  ;;  %v7235_v4 = vpack.c.bf16 %v730_v61, %v729_v59  ;;  %v757_v61 = vld [vmem:[%s11841_s2 + $0x160] sm:$0xff] }
  0x40   : > { %7216 = vmatprep.subr.bf16.mxu1 %v11872_v3 }
  0x41   : > { %7162 = vmatpush1.bf16.msra.mxu0 %v7161_v8  ;;  %v8471_v8 = vld [vmem:[%s8192_s16 + $0xf2] sm:$0xff] }
  0x42   : > { %6575 = vmatmul.mubr.f32.gmra.mrb[4].mxu1 %v8323_v11  ;;  %7163 = vmatprep.subr.bf16.mxu0 %v11872_v3 }
  0x43   : > { %7218 = vmatpush1.bf16.msra.mxu1 %v7217_v12  ;;  %6577 = vmatprep.mubr.f32.mxu1 %v8327_v13  ;;  %v8481_v12 = vld [vmem:[%s8192_s16 + $0x20] sm:$0xff] }
  0x44   : > { %7219 = vmatprep.subr.bf16.mxu1 %v11872_v3 }
  0x45   : > { %7165 = vmatpush1.bf16.msra.mxu0 %v7164_v16  ;;  %v8489_v16 = vld [vmem:[%s8192_s16 + $0xfa] sm:$0xff] }
  0x46   : > { %6578 = vmatmul.mubr.f32.gmra.mrb[6].mxu1 %v8345_v19  ;;  %7166 = vmatprep.subr.bf16.mxu0 %v11872_v3 }
  0x47   : > { %7221 = vmatpush1.bf16.msra.mxu1 %v7220_v20  ;;  %6580 = vmatprep.mubr.f32.mxu1 %v8349_v21  ;;  %v752_v20 = vld [vmem:[%s11841_s2 + $0x138] sm:$0xff] }
  0x48   : > { %7222 = vmatprep.subr.bf16.mxu1 %v11872_v3 }
  0x49   : > { %7168 = vmatpush1.bf16.msra.mxu0 %v7167_v24  ;;  %v734_v24 = vld [vmem:[%s11841_s2 + $0xa8] sm:$0xff] }
  0x4a   : > { %6581 = vmatmul.mubr.f32.gmra.mrb[8].mxu1 %v8367_v27  ;;  %7169 = vmatprep.subr.bf16.mxu0 %v11872_v3  ;;  %v7241_v31 = vpack.c.bf16 %v734_v24, %v733_v23  ;;  %v760_v23 = vld [vmem:[%s11841_s2 + $0x178] sm:$0xff]  ;;  %v8627_v24 = vld [vmem:[%s8192_s16 + $0x16a] sm:$0xff] }
  0x4b   : > { %7224 = vmatpush1.bf16.msra.mxu1 %v7223_v28  ;;  %6583 = vmatprep.mubr.f32.mxu1 %v8371_v29  ;;  %v7270_v28 = vpack.c.bf16 %v752_v20, %v751_v18  ;;  %v7250_v18 = vpack.c.bf16 %v740_v7, %v739_v6  ;;  %v759_v20 = vld [vmem:[%s11841_s2 + $0x170] sm:$0xff]  ;;  %11909 = vst [vmem:[#allocation14_spill] sm:$0xff] %v8627_v24  ;;  %v418_v6 = vld [vmem:[%s8192_s16 + $0x1] sm:$0xff] }
  0x4c   : > { %7225 = vmatprep.subr.bf16.mxu1 %v11872_v3  ;;  %v5806_v7 = vld [vmem:[%s11841_s2 + $0x300] sm:$0xff] }
  0x4d   : > { %7171 = vmatpush1.bf16.msra.mxu0 %v7170_v32  ;;  %v753_v32 = vld [vmem:[%s11841_s2 + $0x140] sm:$0xff] }
  0x4e   : > { %6584 = vmatmul.mubr.f32.gmra.mrb[10].mxu1 %v8389_v35  ;;  %7172 = vmatprep.subr.bf16.mxu0 %v11872_v3  ;;  %v8545_v41 = vpack.c.bf16 %v754_v33, %v753_v32  ;;  %v8637_v32 = vld [vmem:[%s8192_s16 + $0x60] sm:$0xff]  ;;  %v8647_v33 = vld [vmem:[%s8192_s16 + $0x69] sm:$0xff] }
  0x4f   : > { %7227 = vmatpush1.bf16.msra.mxu1 %v7226_v36  ;;  %6586 = vmatprep.mubr.f32.mxu1 %v8393_v37  ;;  %v735_v36 = vld [vmem:[%s11841_s2 + $0xb0] sm:$0xff]  ;;  %11910 = vst [vmem:[#allocation15_spill] sm:$0xff] %v8637_v32  ;;  %11911 = vst [vmem:[#allocation16_spill] sm:$0xff] %v8647_v33 }
  0x50   : > { %7228 = vmatprep.subr.bf16.mxu1 %v11872_v3  ;;  %11902 = vst [vmem:[#allocation7_spill] sm:$0xff] %v8545_v41 }
  0x51   : > { %7174 = vmatpush1.bf16.msra.mxu0 %v7173_v40  ;;  %v8543_v40 = vld [vmem:[%s8192_s16 + $0x49] sm:$0xff] }
  0x52   : > { %6587 = vmatmul.mubr.f32.gmra.mrb[12].mxu1 %v8411_v43  ;;  %7175 = vmatprep.subr.bf16.mxu0 %v11872_v3 }
  0x53   : > { %7230 = vmatpush1.bf16.msra.mxu1 %v7229_v44  ;;  %6589 = vmatprep.mubr.f32.mxu1 %v8421_v47  ;;  %v7244_v44 = vpack.c.bf16 %v736_v38, %v735_v36  ;;  %v8650_v36 = vpack.c.bf16 %v760_v23, %v759_v20  ;;  %v8654_v38 = vld [vmem:[%s8192_s16 + $0x172] sm:$0xff]  ;;  %v5838_v23 = vld [vmem:[%s11841_s2 + $0x400] sm:$0xff] }
  0x54   : > { %7231 = vmatprep.subr.bf16.mxu1 %v11872_v3  ;;  %11913 = vst [vmem:[#allocation18_spill] sm:$0xff] %v8654_v38  ;;  %v8687_v20 = vld [vmem:[%s8192_s16 + $0x78] sm:$0xff] }
  0x55   : > { %7177 = vmatpush1.bf16.msra.mxu0 %v7176_v51  ;;  %v738_v51 = vld [vmem:[%s11841_s2 + $0xc8] sm:$0xff]  ;;  %11912 = vst [vmem:[#allocation17_spill] sm:$0xff] %v8650_v36  ;;  %11916 = vst [vmem:[#allocation21_spill] sm:$0xff] %v8687_v20 }
  0x56   : > { %6590 = vmatmul.mubr.f32.gmra.mrb[14].mxu1 %v8433_v53  ;;  %7259 = vmatprep.subr.bf16.mxu0 %v7258_v52  ;;  %v7247_v59 = vpack.c.bf16 %v738_v51, %v737_v50  ;;  %v744_v50 = vld [vmem:[%s11841_s2 + $0xf8] sm:$0xff]  ;;  %v8667_v51 = vld [vmem:[%s8192_s16 + $0x68] sm:$0xff] }
  0x57   : > { %7233 = vmatpush1.bf16.msra.mxu1 %v7232_v54  ;;  %6592 = vmatprep.mubr.f32.mxu1 %v8443_v57  ;;  %v8574_v54 = vld [vmem:[%s8192_s16 + $0x51] sm:$0xff]  ;;  %11914 = vst [vmem:[#allocation19_spill] sm:$0xff] %v8667_v51 }
  0x58   : > { %972 = vmatmul.mubr.f32.vlgmr.msra.gmra.mrb[0].mxu0 %v8452_v62  ;;  %7234 = vmatprep.subr.bf16.mxu1 %v11872_v3 }
  0x59   : > { %976 = vmatprep.mubr.f32.mxu0 %v8456_v63  ;;  %7261 = vmatpush3.bf16.msra.mxu0 %v7258_v52  ;;  %v8570_v52 = vld [vmem:[%s8192_s16 + $0x48] sm:$0xff] }
  0x5a   : > { %6593 = vmatmul.mubr.f32.gmra.mrb[16].mxu1 %v8460_v1  ;;  %7263 = vmatprep.subr.bf16.mxu0 %v7262_v0 }
  0x5b   : > { %7236 = vmatpush1.bf16.msra.mxu1 %v7235_v4  ;;  %6595 = vmatprep.mubr.f32.mxu1 %v8471_v8  ;;  %v8592_v4 = vld [vmem:[%s8192_s16 + $0x152] sm:$0xff] }
  0x5c   : > { %977 = vmatmul.mubr.f32.gmra.mrb[2].mxu0 %v8481_v12  ;;  %7237 = vmatprep.subr.bf16.mxu1 %v11872_v3  ;;  %11906 = vst [vmem:[#allocation11_spill] sm:$0xff] %v8592_v4 }
  0x5d   : > { %981 = vmatprep.mubr.f32.mxu0 %v8485_v14  ;;  %7265 = vmatpush3.bf16.msra.mxu0 %v7262_v0  ;;  %v758_v0 = vld [vmem:[%s11841_s2 + $0x168] sm:$0xff] }
  0x5e   : > { %6596 = vmatmul.mubr.f32.gmra.mrb[18].mxu1 %v8489_v16  ;;  %7267 = vmatprep.subr.bf16.mxu0 %v7266_v15 }
  0x5f   : > { %7239 = vmatpush1.bf16.msra.mxu1 %v7238_v17  ;;  %6598 = vmatprep.mubr.f32.mxu1 %v8500_v22  ;;  %v8616_v17 = vld [vmem:[%s8192_s16 + $0x15a] sm:$0xff] }
  0x60   : > { %982 = vmatmul.mubr.f32.gmra.mrb[4].mxu0 %v8510_v25  ;;  %7240 = vmatprep.subr.bf16.mxu1 %v11872_v3  ;;  %11908 = vst [vmem:[#allocation13_spill] sm:$0xff] %v8616_v17 }
  0x61   : > { %986 = vmatprep.mubr.f32.mxu0 %v8514_v26  ;;  %7269 = vmatpush3.bf16.msra.mxu0 %v7266_v15  ;;  %v8612_v15 = vpack.c.bf16 %v758_v0, %v757_v61  ;;  %v563_v61 = vld [vmem:[%s8642_s11 + $0xa] sm:$0xff]  ;;  %v7256_v0 = vpack.c.bf16 %v744_v50, %v743_v46 }
  0x62   : > { %6599 = vmatmul.mubr.f32.gmra.mrb[20].mxu1 %v8518_v30  ;;  %7271 = vmatprep.subr.bf16.mxu0 %v7270_v28  ;;  %v419_v50 = vld [vmem:[%s8192_s16 + $0x9] sm:$0xff] }
  0x63   : > { %7242 = vmatpush1.bf16.msra.mxu1 %v7241_v31  ;;  %6601 = vmatprep.mubr.f32.mxu1 %v8529_v34  ;;  %11907 = vst [vmem:[#allocation12_spill] sm:$0xff] %v8612_v15  ;;  %v742_v31 = vld [vmem:[%s11841_s2 + $0xe8] sm:$0xff] }
  0x64   : > { %987 = vmatmul.mubr.f32.gmra.mrb[6].mxu0 %v8539_v39  ;;  %7243 = vmatprep.subr.bf16.mxu1 %v11872_v3 }
  0x65   : > { %991 = vmatprep.mubr.f32.mxu0 %v8543_v40  ;;  %7273 = vmatpush3.bf16.msra.mxu0 %v7270_v28  ;;  %v741_v28 = vld [vmem:[%s11841_s2 + $0xe0] sm:$0xff] }
  0x66   : > { %6602 = vmatmul.mubr.f32.gmra.mrb[22].mxu1 %v8549_v42  ;;  %7275 = vmatprep.subr.bf16.mxu0 %v8545_v41 }
  0x67   : > { %7245 = vmatpush1.bf16.msra.mxu1 %v7244_v44  ;;  %6604 = vmatprep.mubr.f32.mxu1 %v8560_v48  ;;  %v7253_v44 = vpack.c.bf16 %v742_v31, %v741_v28  ;;  %v5839_v28 = vld [vmem:[%s11841_s2 + $0x408] sm:$0xff]  ;;  %v8865_v48 = vld [vmem:[%s8192_s16 + $0xf0] sm:$0xff] }
  0x68   : > { %992 = vmatmul.mubr.f32.gmra.mrb[8].mxu0 %v8570_v52  ;;  %7246 = vmatprep.subr.bf16.mxu1 %v11872_v3  ;;  %v8697_v31 = vld [vmem:[%s8192_s16 + $0x81] sm:$0xff]  ;;  %11931 = vst [vmem:[#allocation36_spill] sm:$0xff] %v8865_v48 }
  0x69   : > { %996 = vmatprep.mubr.f32.mxu0 %v8574_v54  ;;  %7277 = vmatpush3.bf16.msra.mxu0 %v8545_v41  ;;  %11917 = vst [vmem:[#allocation22_spill] sm:$0xff] %v8697_v31  ;;  %v5821_v41 = vld [vmem:[%s11841_s2 + $0x378] sm:$0xff] }
  0x6a   : > { %6605 = vmatmul.mubr.f32.gmra.mrb[24].mxu1 %v8581_v56  ;;  %7279 = vmatprep.subr.bf16.mxu0 %v8577_v55  ;;  %v8848_v56 = vld [vmem:[%s8192_s16 + $0xe0] sm:$0xff] }
  0x6b   : > { %7248 = vmatpush1.bf16.msra.mxu1 %v7247_v59  ;;  %6607 = vmatprep.mubr.f32.mxu1 %v8592_v4  ;;  %v8672_v59 = vld [vmem:[%s8192_s16 + $0x79] sm:$0xff]  ;;  %11929 = vst [vmem:[#allocation34_spill] sm:$0xff] %v8848_v56 }
  0x6c   : > { %997 = vmatmul.mubr.f32.gmra.mrb[10].mxu0 %v8602_v9  ;;  %7249 = vmatprep.subr.bf16.mxu1 %v11872_v3  ;;  %11915 = vst [vmem:[#allocation20_spill] sm:$0xff] %v8672_v59  ;;  %v5825_v4 = vld [vmem:[%s11841_s2 + $0x398] sm:$0xff] }
  0x6d   : > { %1001 = vmatprep.mubr.f32.mxu0 %v8607_v10  ;;  %7281 = vmatpush3.bf16.msra.mxu0 %v8577_v55  ;;  %v8797_v55 = vld [vmem:[%s8192_s16 + $0xc0] sm:$0xff] }
  0x6e   : > { %6608 = vmatmul.mubr.f32.gmra.mrb[26].mxu1 %v8616_v17  ;;  %7283 = vmatprep.subr.bf16.mxu0 %v8612_v15  ;;  %v8831_v17 = vld [vmem:[%s8192_s16 + $0xd8] sm:$0xff] }
  0x6f   : > { %7251 = vmatpush1.bf16.msra.mxu1 %v7250_v18  ;;  %6610 = vmatprep.mubr.f32.mxu1 %v8627_v24  ;;  %v5807_v18 = vld [vmem:[%s11841_s2 + $0x308] sm:$0xff]  ;;  %11927 = vst [vmem:[#allocation32_spill] sm:$0xff] %v8831_v17 }
  0x70   : > { %1002 = vmatmul.mubr.f32.gmra.mrb[12].mxu0 %v8637_v32  ;;  %7252 = vmatprep.subr.bf16.mxu1 %v11872_v3  ;;  %v7291_v46 = vpack.c.bf16 %v5807_v18, %v5806_v7  ;;  %v338_v7 = vld [vmem:[%s8192_s16 + $0x8] sm:$0xff] }
  0x71   : > { %1006 = vmatprep.mubr.f32.mxu0 %v8647_v33  ;;  %7285 = vmatpush3.bf16.msra.mxu0 %v8612_v15  ;;  %v5819_v15 = vld [vmem:[%s11841_s2 + $0x368] sm:$0xff] }
  0x72   : > { %6611 = vmatmul.mubr.f32.gmra.mrb[28].mxu1 %v8654_v38  ;;  %7287 = vmatprep.subr.bf16.mxu0 %v8650_v36  ;;  %v8814_v38 = vld [vmem:[%s8192_s16 + $0xc8] sm:$0xff] }
  0x73   : > { %7254 = vmatpush1.bf16.msra.mxu1 %v7253_v44  ;;  %6613 = vmatprep.mubr.f32.mxu1 %v562_v45  ;;  %v8699_v44 = vpack.c.bf16 %v5839_v28, %v5838_v23  ;;  %v337_v45 = vld [vmem:[%s8192_s16] sm:$0xff]  ;;  %v5811_v28 = vld [vmem:[%s11841_s2 + $0x328] sm:$0xff]  ;;  %11925 = vst [vmem:[#allocation30_spill] sm:$0xff] %v8814_v38 }
  0x74   : > { %1007 = vmatmul.mubr.f32.gmra.mrb[14].mxu0 %v8667_v51  ;;  %7255 = vmatprep.subr.bf16.mxu1 %v11872_v3  ;;  %v5810_v23 = vld [vmem:[%s11841_s2 + $0x320] sm:$0xff]  ;;  %v5823_v24 = vld [vmem:[%s11841_s2 + $0x388] sm:$0xff] }
  0x75   : > { %1011 = vmatprep.mubr.f32.mxu0 %v8672_v59  ;;  %7289 = vmatpush3.bf16.msra.mxu0 %v8650_v36  ;;  %v5808_v36 = vld [vmem:[%s11841_s2 + $0x310] sm:$0xff] }
  0x76   : > { %6614 = vmatmul.mubr.f32.gmra.mrb[30].mxu1 %v563_v61  ;;  %v5809_v61 = vld [vmem:[%s11841_s2 + $0x318] sm:$0xff]  ;;  %7339 = vmatprep.subr.bf16.mxu0 %v8699_v44 }
  0x77   : > { %7257 = vmatpush1.bf16.msra.mxu1 %v7256_v0  ;;  %1421 = vmatprep.mubr.f32.mxu1 %v418_v6  ;;  %v8713_v0 = vld [vmem:[%s8192_s16 + $0x80] sm:$0xff]  ;;  %v8717_v6 = vld [vmem:[%s8192_s16 + $0x91] sm:$0xff]  ;;  %v7294_v18 = vpack.c.bf16 %v5809_v61, %v5808_v36 }
  0x78   : > { %1012 = vmatmul.mubr.f32.gmra.mrb[16].mxu0 %v8687_v20  ;;  %7290 = vmatprep.subr.bf16.mxu1 %v11872_v3  ;;  %11918 = vst [vmem:[#allocation23_spill] sm:$0xff] %v8713_v0  ;;  %11919 = vst [vmem:[#allocation24_spill] sm:$0xff] %v8717_v6  ;;  %v8733_v36 = vld [vmem:[%s8192_s16 + $0x99] sm:$0xff] }
  0x79   : > { %1016 = vmatprep.mubr.f32.mxu0 %v8697_v31  ;;  %11921 = vst [vmem:[#allocation26_spill] sm:$0xff] %v8733_v36  ;;  %v5813_v61 = vld [vmem:[%s11841_s2 + $0x338] sm:$0xff] }
  0x7a   : > { %1422 = vmatmul.mubr.f32.vlgmr.msra.gmra.mrb[32].mxu1 %v337_v45  ;;  %v8730_v45 = vld [vmem:[%s8192_s16 + $0x90] sm:$0xff] }
  0x7b   : > { %7292 = vmatpush1.bf16.msra.mxu1 %v7291_v46  ;;  %1426 = vmatprep.mubr.f32.mxu1 %v419_v50  ;;  %11920 = vst [vmem:[#allocation25_spill] sm:$0xff] %v8730_v45  ;;  %v7297_v46 = vpack.c.bf16 %v5811_v28, %v5810_v23  ;;  %v5812_v50 = vld [vmem:[%s11841_s2 + $0x330] sm:$0xff]  ;;  %v5814_v23 = vld [vmem:[%s11841_s2 + $0x340] sm:$0xff]  ;;  %v8763_v28 = vld [vmem:[%s8192_s16 + $0xa8] sm:$0xff] }
  0x7c   : > { %1017 = vmatmul.mubr.f32.gmra.mrb[18].mxu0 %v8713_v0  ;;  %7293 = vmatprep.subr.bf16.mxu1 %v11872_v3  ;;  %11923 = vst [vmem:[#allocation28_spill] sm:$0xff] %v8763_v28 }
  0x7d   : > { %1021 = vmatprep.mubr.f32.mxu0 %v8717_v6 }
  0x7e   : > { %1427 = vmatmul.mubr.f32.gmra.mrb[34].mxu1 %v338_v7  ;;  %v8746_v7 = vld [vmem:[%s8192_s16 + $0x98] sm:$0xff] }
  0x7f   : > { %1431 = vmatprep.mubr.f32.mxu1 %v8255_v49  ;;  %7295 = vmatpush1.bf16.msra.mxu1 %v7294_v18  ;;  %11922 = vst [vmem:[#allocation27_spill] sm:$0xff] %v8746_v7  ;;  %v8750_v49 = vld [vmem:[%s8192_s16 + $0xa9] sm:$0xff]  ;;  %v7300_v18 = vpack.c.bf16 %v5813_v61, %v5812_v50 }
  0x80   : > { %1022 = vmatmul.mubr.f32.gmra.mrb[20].mxu0 %v8730_v45  ;;  %7296 = vmatprep.subr.bf16.mxu1 %v11872_v3  ;;  %v5816_v50 = vld [vmem:[%s11841_s2 + $0x350] sm:$0xff] }
  0x81   : > { %1026 = vmatprep.mubr.f32.mxu0 %v8733_v36  ;;  %v8780_v61 = vld [vmem:[%s8192_s16 + $0xb0] sm:$0xff] }
  0x82   : > { %1432 = vmatmul.mubr.f32.gmra.mrb[36].mxu1 %v8452_v62  ;;  %v5815_v62 = vld [vmem:[%s11841_s2 + $0x348] sm:$0xff] }
  0x83   : > { %1436 = vmatprep.mubr.f32.mxu1 %v8456_v63  ;;  %7298 = vmatpush1.bf16.msra.mxu1 %v7297_v46  ;;  %v8767_v63 = vld [vmem:[%s8192_s16 + $0xb1] sm:$0xff]  ;;  %v7303_v46 = vpack.c.bf16 %v5815_v62, %v5814_v23  ;;  %v5818_v62 = vld [vmem:[%s11841_s2 + $0x360] sm:$0xff] }
  0x84   : > { %1027 = vmatmul.mubr.f32.gmra.mrb[22].mxu0 %v8746_v7  ;;  %7299 = vmatprep.subr.bf16.mxu1 %v11872_v3 }
  0x85   : > { %1031 = vmatprep.mubr.f32.mxu0 %v8750_v49 }
  0x86   : > { %1437 = vmatmul.mubr.f32.gmra.mrb[38].mxu1 %v8481_v12  ;;  %v5817_v12 = vld [vmem:[%s11841_s2 + $0x358] sm:$0xff] }
  0x87   : > { %1441 = vmatprep.mubr.f32.mxu1 %v8485_v14  ;;  %7301 = vmatpush1.bf16.msra.mxu1 %v7300_v18  ;;  %v8784_v18 = vld [vmem:[%s8192_s16 + $0xc1] sm:$0xff]  ;;  %v7306_v23 = vpack.c.bf16 %v5817_v12, %v5816_v50  ;;  %v7309_v50 = vpack.c.bf16 %v5819_v15, %v5818_v62  ;;  %v5820_v12 = vld [vmem:[%s11841_s2 + $0x370] sm:$0xff]  ;;  %v8818_v15 = vld [vmem:[%s8192_s16 + $0xd9] sm:$0xff] }
  0x88   : > { %1032 = vmatmul.mubr.f32.gmra.mrb[24].mxu0 %v8763_v28  ;;  %7302 = vmatprep.subr.bf16.mxu1 %v11872_v3  ;;  %11926 = vst [vmem:[#allocation31_spill] sm:$0xff] %v8818_v15  ;;  %v5822_v62 = vld [vmem:[%s11841_s2 + $0x380] sm:$0xff] }
  0x89   : > { %1036 = vmatprep.mubr.f32.mxu0 %v8767_v63 }
  0x8a   : > { %1442 = vmatmul.mubr.f32.gmra.mrb[40].mxu1 %v8510_v25 }
  0x8b   : > { %1446 = vmatprep.mubr.f32.mxu1 %v8514_v26  ;;  %7304 = vmatpush1.bf16.msra.mxu1 %v7303_v46  ;;  %v8801_v46 = vld [vmem:[%s8192_s16 + $0xc9] sm:$0xff] }
  0x8c   : > { %1037 = vmatmul.mubr.f32.gmra.mrb[26].mxu0 %v8780_v61  ;;  %7305 = vmatprep.subr.bf16.mxu1 %v11872_v3  ;;  %11924 = vst [vmem:[#allocation29_spill] sm:$0xff] %v8801_v46 }
  0x8d   : > { %1041 = vmatprep.mubr.f32.mxu0 %v8784_v18 }
  0x8e   : > { %1447 = vmatmul.mubr.f32.gmra.mrb[42].mxu1 %v8539_v39 }
  0x8f   : > { %1451 = vmatprep.mubr.f32.mxu1 %v8543_v40  ;;  %7307 = vmatpush1.bf16.msra.mxu1 %v7306_v23  ;;  %v7312_v23 = vpack.c.bf16 %v5821_v41, %v5820_v12  ;;  %v8835_v41 = vld [vmem:[%s8192_s16 + $0xe1] sm:$0xff]  ;;  %v5824_v12 = vld [vmem:[%s11841_s2 + $0x390] sm:$0xff] }
  0x90   : > { %1042 = vmatmul.mubr.f32.gmra.mrb[28].mxu0 %v8797_v55  ;;  %7308 = vmatprep.subr.bf16.mxu1 %v11872_v3  ;;  %11928 = vst [vmem:[#allocation33_spill] sm:$0xff] %v8835_v41 }
  0x91   : > { %1046 = vmatprep.mubr.f32.mxu0 %v8801_v46 }
  0x92   : > { %1452 = vmatmul.mubr.f32.gmra.mrb[44].mxu1 %v8570_v52 }
  0x93   : > { %1456 = vmatprep.mubr.f32.mxu1 %v8574_v54  ;;  %7310 = vmatpush1.bf16.msra.mxu1 %v7309_v50  ;;  %v7315_v50 = vpack.c.bf16 %v5823_v24, %v5822_v62  ;;  %v8852_v24 = vld [vmem:[%s8192_s16 + $0xf1] sm:$0xff]  ;;  %v5826_v62 = vld [vmem:[%s11841_s2 + $0x3a0] sm:$0xff] }
  0x94   : > { %1047 = vmatmul.mubr.f32.gmra.mrb[30].mxu0 %v8814_v38  ;;  %7311 = vmatprep.subr.bf16.mxu1 %v11872_v3  ;;  %11930 = vst [vmem:[#allocation35_spill] sm:$0xff] %v8852_v24 }
  0x95   : > { %1051 = vmatprep.mubr.f32.mxu0 %v8818_v15 }
  0x96   : > { %1457 = vmatmul.mubr.f32.gmra.mrb[46].mxu1 %v8602_v9 }
  0x97   : > { %1461 = vmatprep.mubr.f32.mxu1 %v8607_v10  ;;  %7313 = vmatpush1.bf16.msra.mxu1 %v7312_v23  ;;  %v7318_v23 = vpack.c.bf16 %v5825_v4, %v5824_v12  ;;  %v8869_v4 = vld [vmem:[%s8192_s16 + $0xf9] sm:$0xff]  ;;  %v5828_v12 = vld [vmem:[%s11841_s2 + $0x3b0] sm:$0xff] }
  0x98   : > { %1052 = vmatmul.mubr.f32.gmra.mrb[32].mxu0 %v8831_v17  ;;  %7314 = vmatprep.subr.bf16.mxu1 %v11872_v3  ;;  %11932 = vst [vmem:[#allocation37_spill] sm:$0xff] %v8869_v4 }
  0x99   : > { %1056 = vmatprep.mubr.f32.mxu0 %v8835_v41 }
  0x9a   : > { %1462 = vmatmul.mubr.f32.gmra.mrb[48].mxu1 %v8637_v32  ;;  %v5827_v32 = vld [vmem:[%s11841_s2 + $0x3a8] sm:$0xff] }
  0x9b   : > { %1466 = vmatprep.mubr.f32.mxu1 %v8647_v33  ;;  %7316 = vmatpush1.bf16.msra.mxu1 %v7315_v50  ;;  %v7321_v50 = vpack.c.bf16 %v5827_v32, %v5826_v62  ;;  %v8882_v33 = vld [vmem:[%s8192_s16 + $0xf8] sm:$0xff]  ;;  %v8886_v32 = vld [vmem:[%s8192_s16 + $0x109] sm:$0xff]  ;;  %v5830_v62 = vld [vmem:[%s11841_s2 + $0x3c0] sm:$0xff] }
  0x9c   : > { %1057 = vmatmul.mubr.f32.gmra.mrb[34].mxu0 %v8848_v56  ;;  %7317 = vmatprep.subr.bf16.mxu1 %v11872_v3  ;;  %11933 = vst [vmem:[#allocation38_spill] sm:$0xff] %v8882_v33  ;;  %11934 = vst [vmem:[#allocation39_spill] sm:$0xff] %v8886_v32 }
  0x9d   : > { %1061 = vmatprep.mubr.f32.mxu0 %v8852_v24 }
  0x9e   : > { %1467 = vmatmul.mubr.f32.gmra.mrb[50].mxu1 %v8667_v51  ;;  %v5829_v51 = vld [vmem:[%s11841_s2 + $0x3b8] sm:$0xff] }
  0x9f   : > { %1471 = vmatprep.mubr.f32.mxu1 %v8672_v59  ;;  %7319 = vmatpush1.bf16.msra.mxu1 %v7318_v23  ;;  %v7324_v23 = vpack.c.bf16 %v5829_v51, %v5828_v12  ;;  %v8899_v59 = vld [vmem:[%s8192_s16 + $0x108] sm:$0xff]  ;;  %v8903_v51 = vld [vmem:[%s8192_s16 + $0x111] sm:$0xff] }
  0xa0   : > { %1062 = vmatmul.mubr.f32.gmra.mrb[36].mxu0 %v8865_v48  ;;  %7320 = vmatprep.subr.bf16.mxu1 %v11872_v3  ;;  %11935 = vst [vmem:[#allocation40_spill] sm:$0xff] %v8899_v59  ;;  %11936 = vst [vmem:[#allocation41_spill] sm:$0xff] %v8903_v51  ;;  %v5832_v12 = vld [vmem:[%s11841_s2 + $0x3d0] sm:$0xff] }
  0xa1   : > { %1066 = vmatprep.mubr.f32.mxu0 %v8869_v4 }
  0xa2   : > { %1472 = vmatmul.mubr.f32.gmra.mrb[52].mxu1 %v8687_v20  ;;  %v5831_v20 = vld [vmem:[%s11841_s2 + $0x3c8] sm:$0xff] }
  0xa3   : > { %1476 = vmatprep.mubr.f32.mxu1 %v8697_v31  ;;  %7322 = vmatpush1.bf16.msra.mxu1 %v7321_v50  ;;  %v7327_v50 = vpack.c.bf16 %v5831_v20, %v5830_v62  ;;  %v8916_v31 = vld [vmem:[%s8192_s16 + $0x110] sm:$0xff]  ;;  %v8920_v20 = vld [vmem:[%s8192_s16 + $0x121] sm:$0xff] }
  0xa4   : > { %1067 = vmatmul.mubr.f32.gmra.mrb[38].mxu0 %v8882_v33  ;;  %7323 = vmatprep.subr.bf16.mxu1 %v11872_v3  ;;  %v5834_v62 = vld [vmem:[%s11841_s2 + $0x3e0] sm:$0xff] }
  0xa5   : > { %1071 = vmatprep.mubr.f32.mxu0 %v8886_v32 }
  0xa6   : > { %1477 = vmatmul.mubr.f32.gmra.mrb[54].mxu1 %v8713_v0  ;;  %v5833_v0 = vld [vmem:[%s11841_s2 + $0x3d8] sm:$0xff] }
  0xa7   : > { %1481 = vmatprep.mubr.f32.mxu1 %v8717_v6  ;;  %7325 = vmatpush1.bf16.msra.mxu1 %v7324_v23  ;;  %v7330_v23 = vpack.c.bf16 %v5833_v0, %v5832_v12  ;;  %v8933_v6 = vld [vmem:[%s8192_s16 + $0x120] sm:$0xff]  ;;  %v8937_v0 = vld [vmem:[%s8192_s16 + $0x129] sm:$0xff] }
  0xa8   : > { %1072 = vmatmul.mubr.f32.gmra.mrb[40].mxu0 %v8899_v59  ;;  %7326 = vmatprep.subr.bf16.mxu1 %v11872_v3  ;;  %v5836_v12 = vld [vmem:[%s11841_s2 + $0x3f0] sm:$0xff] }
  0xa9   : > { %1076 = vmatprep.mubr.f32.mxu0 %v8903_v51 }
  0xaa   : > { %1482 = vmatmul.mubr.f32.gmra.mrb[56].mxu1 %v8730_v45  ;;  %v5835_v45 = vld [vmem:[%s11841_s2 + $0x3e8] sm:$0xff] }
  0xab   : > { %1486 = vmatprep.mubr.f32.mxu1 %v8733_v36  ;;  %7328 = vmatpush1.bf16.msra.mxu1 %v7327_v50  ;;  %v7333_v50 = vpack.c.bf16 %v5835_v45, %v5834_v62  ;;  %v8950_v36 = vld [vmem:[%s8192_s16 + $0x128] sm:$0xff]  ;;  %v8954_v45 = vld [vmem:[%s8192_s16 + $0x139] sm:$0xff] }
  0xac   : > { %1077 = vmatmul.mubr.f32.gmra.mrb[42].mxu0 %v8916_v31  ;;  %7329 = vmatprep.subr.bf16.mxu1 %v11872_v3  ;;  %v8961_v62 = vld [vmem:[%s8192_s16 + $0x138] sm:$0xff] }
  0xad   : > { %1081 = vmatprep.mubr.f32.mxu0 %v8920_v20 }
  0xae   : > { %1487 = vmatmul.mubr.f32.gmra.mrb[58].mxu1 %v8746_v7  ;;  %v5837_v7 = vld [vmem:[%s11841_s2 + $0x3f8] sm:$0xff] }
  0xaf   : > { %1491 = vmatprep.mubr.f32.mxu1 %v8750_v49  ;;  %7331 = vmatpush1.bf16.msra.mxu1 %v7330_v23  ;;  %v7336_v23 = vpack.c.bf16 %v5837_v7, %v5836_v12  ;;  %v8972_v7 = vld [vmem:[%s8192_s16 + $0x140] sm:$0xff]  ;;  %v8982_v12 = vld [vmem:[%s8192_s16 + $0x150] sm:$0xff] }
  0xb0   : > { %1082 = vmatmul.mubr.f32.gmra.mrb[44].mxu0 %v8933_v6  ;;  %7332 = vmatprep.subr.bf16.mxu1 %v11872_v3 }
  0xb1   : > { %1086 = vmatprep.mubr.f32.mxu0 %v8937_v0 }
  0xb2   : > { %1492 = vmatmul.mubr.f32.gmra.mrb[60].mxu1 %v8763_v28  ;;  %v8965_v28 = vld [vmem:[%s8192_s16 + $0x141] sm:$0xff] }
  0xb3   : > { %1496 = vmatprep.mubr.f32.mxu1 %v8767_v63  ;;  %7334 = vmatpush1.bf16.msra.mxu1 %v7333_v50  ;;  %v8976_v50 = vld [vmem:[%s8192_s16 + $0x151] sm:$0xff] }
  0xb4   : > { %1087 = vmatmul.mubr.f32.gmra.mrb[46].mxu0 %v8950_v36  ;;  %7335 = vmatprep.subr.bf16.mxu1 %v11872_v3  ;;  %v8992_v3 = vld [vmem:[%s8192_s16 + $0x158] sm:$0xff] }
  0xb5   : > { %1091 = vmatprep.mubr.f32.mxu0 %v8954_v45 }
  0xb6   : > { %1497 = vmatmul.mubr.f32.gmra.mrb[62].mxu1 %v8780_v61 }
  0xb7   : > { %1501 = vmatprep.mubr.f32.mxu1 %v8784_v18  ;;  %7337 = vmatpush1.bf16.msra.mxu1 %v7336_v23  ;;  %v8986_v23 = vld [vmem:[%s8192_s16 + $0x159] sm:$0xff] }
  0xb8   : > { %1092 = vmatmul.mubr.f32.gmra.mrb[48].mxu0 %v8961_v62  ;;  %7802 = vmatprep.subr.bf16.mxu1 %v8699_v44 }
  0xb9   : > { %1096 = vmatprep.mubr.f32.mxu0 %v8965_v28 }
  0xba   : > { %1502 = vmatmul.mubr.f32.gmra.mrb[64].mxu1 %v8797_v55 }
  0xbb   : > { %1506 = vmatprep.mubr.f32.mxu1 %v8801_v46  ;;  %v8996_v46 = vld [vmem:[%s8192_s16 + $0x169] sm:$0xff] }
  0xbc   : > { %1097 = vmatmul.mubr.f32.gmra.mrb[50].mxu0 %v8972_v7 }
  0xbd   : > { %1101 = vmatprep.mubr.f32.mxu0 %v8976_v50 }
  0xbe   : > { %1507 = vmatmul.mubr.f32.gmra.mrb[66].mxu1 %v8814_v38  ;;  %v9006_v38 = vld [vmem:[%s8192_s16 + $0x171] sm:$0xff] }
  0xbf   : > { %1511 = vmatprep.mubr.f32.mxu1 %v8818_v15  ;;  %v9002_v15 = vld [vmem:[%s8192_s16 + $0x168] sm:$0xff] }
  0xc0   : > { %1102 = vmatmul.mubr.f32.gmra.mrb[52].mxu0 %v8982_v12 }
  0xc1   : > { %1106 = vmatprep.mubr.f32.mxu0 %v8986_v23 }
  0xc2   : > { %1512 = vmatmul.mubr.f32.gmra.mrb[68].mxu1 %v8831_v17  ;;  %v9016_v17 = vld [vmem:[%s8642_s11 + $0x1] sm:$0xff] }
  0xc3   : > { %1516 = vmatprep.mubr.f32.mxu1 %v8835_v41  ;;  %v9012_v41 = vld [vmem:[%s8192_s16 + $0x170] sm:$0xff]  ;;  %11937 = vst [vmem:[#allocation42_spill] sm:$0xff] %v9016_v17 }
  0xc4   : > { %1107 = vmatmul.mubr.f32.gmra.mrb[54].mxu0 %v8992_v3 }
  0xc5   : > { %1111 = vmatprep.mubr.f32.mxu0 %v8996_v46 }
  0xc6   : > { %1517 = vmatmul.mubr.f32.gmra.mrb[70].mxu1 %v8848_v56  ;;  %v9022_v56 = vld [vmem:[%s8642_s11] sm:$0xff] }
  0xc7   : > { %1521 = vmatprep.mubr.f32.mxu1 %v8852_v24  ;;  %11938 = vst [vmem:[#allocation43_spill] sm:$0xff] %v9022_v56  ;;  %v9026_v24 = vld [vmem:[%s8642_s11 + $0x9] sm:$0xff] }
  0xc8   : > { %1112 = vmatmul.mubr.f32.gmra.mrb[56].mxu0 %v9002_v15  ;;  %11939 = vst [vmem:[#allocation44_spill] sm:$0xff] %v9026_v24 }
  0xc9   : > { %1116 = vmatprep.mubr.f32.mxu0 %v9006_v38 }
  0xca   : > { %1522 = vmatmul.mubr.f32.gmra.mrb[72].mxu1 %v8865_v48  ;;  %v9032_v48 = vld [vmem:[%s8642_s11 + $0x8] sm:$0xff] }
  0xcb   : > { %1526 = vmatprep.mubr.f32.mxu1 %v8869_v4  ;;  %v498_v4 = vld [vmem:[%s8192_s16 + $0x2] sm:$0xff] }
  0xcc   : > { %1117 = vmatmul.mubr.f32.gmra.mrb[58].mxu0 %v9012_v41 }
  0xcd   : > { %1121 = vmatprep.mubr.f32.mxu0 %v9016_v17  ;;  %v5840_v17 = vld [vmem:[%s11841_s2 + $0x410] sm:$0xff] }
  0xce   : > { %1527 = vmatmul.mubr.f32.gmra.mrb[74].mxu1 %v8882_v33  ;;  %v7890_v33 = vld [vmem:[%s8192_s16 + $0x1a] sm:$0xff] }
  0xcf   : > { %1531 = vmatprep.mubr.f32.mxu1 %v8886_v32  ;;  %v5841_v32 = vld [vmem:[%s11841_s2 + $0x418] sm:$0xff] }
  0xd0   : > { %1122 = vmatmul.mubr.f32.gmra.mrb[60].mxu0 %v9022_v56  ;;  %v9046_v56 = vpack.c.bf16 %v5841_v32, %v5840_v17  ;;  %v5848_v32 = vld [vmem:[%s11841_s2 + $0x450] sm:$0xff] }
  0xd1   : > { %1126 = vmatprep.mubr.f32.mxu0 %v9026_v24  ;;  %v499_v24 = vld [vmem:[%s8192_s16 + $0xa] sm:$0xff] }
  0xd2   : > { %1532 = vmatmul.mubr.f32.gmra.mrb[76].mxu1 %v8899_v59  ;;  %v5843_v59 = vld [vmem:[%s11841_s2 + $0x428] sm:$0xff] }
  0xd3   : > { %1536 = vmatprep.mubr.f32.mxu1 %v8903_v51  ;;  %v5842_v51 = vld [vmem:[%s11841_s2 + $0x420] sm:$0xff] }
  0xd4   : > { %1127 = vmatmul.mubr.f32.gmra.mrb[62].mxu0 %v9032_v48  ;;  %v9059_v17 = vpack.c.bf16 %v5843_v59, %v5842_v51  ;;  %v5846_v59 = vld [vmem:[%s11841_s2 + $0x440] sm:$0xff] }
  0xd5   : > { %6648 = vmatprep.mubr.f32.mxu0 %v498_v4  ;;  %v5844_v4 = vld [vmem:[%s11841_s2 + $0x430] sm:$0xff]  ;;  %v5850_v51 = vld [vmem:[%s11841_s2 + $0x460] sm:$0xff] }
  0xd6   : > { %1537 = vmatmul.mubr.f32.gmra.mrb[78].mxu1 %v8916_v31 }
  0xd7   : > { %1541 = vmatprep.mubr.f32.mxu1 %v8920_v20 }
  0xd8   : > { %6649 = vmatmul.mubr.f32.vlgmr.msra.gmra.mrb[64].mxu0 %v499_v24  ;;  %v5845_v24 = vld [vmem:[%s11841_s2 + $0x438] sm:$0xff] }
  0xd9   : > { %6651 = vmatprep.mubr.f32.mxu0 %v7890_v33  ;;  %7341 = vmatpush3.bf16.msra.mxu0 %v8699_v44  ;;  %v9073_v33 = vpack.c.bf16 %v5845_v24, %v5844_v4  ;;  %v5852_v4 = vld [vmem:[%s11841_s2 + $0x470] sm:$0xff]  ;;  %v5871_v24 = vld [vmem:[%s11841_s2 + $0x200] sm:$0xff] }
  0xda   : > { %1542 = vmatmul.mubr.f32.gmra.mrb[80].mxu1 %v8933_v6  ;;  %7343 = vmatprep.subr.bf16.mxu0 %v9046_v56 }
  0xdb   : > { %1546 = vmatprep.mubr.f32.mxu1 %v8937_v0 }
  0xdc   : > { %6652 = vmatmul.mubr.f32.gmra.mrb[66].mxu0 %v8279_v58  ;;  %v5847_v58 = vld [vmem:[%s11841_s2 + $0x448] sm:$0xff] }
  0xdd   : > { %6654 = vmatprep.mubr.f32.mxu0 %v8283_v60  ;;  %7345 = vmatpush3.bf16.msra.mxu0 %v9046_v56  ;;  %v9087_v60 = vpack.c.bf16 %v5847_v58, %v5846_v59 }
  0xde   : > { %1547 = vmatmul.mubr.f32.gmra.mrb[82].mxu1 %v8950_v36  ;;  %7347 = vmatprep.subr.bf16.mxu0 %v9059_v17 }
  0xdf   : > { %1551 = vmatprep.mubr.f32.mxu1 %v8954_v45  ;;  %11940 = vst [vmem:[#allocation45_spill] sm:$0xff] %v9087_v60 }
  0xe0   : > { %6655 = vmatmul.mubr.f32.gmra.mrb[68].mxu0 %v8301_v2  ;;  %v5849_v2 = vld [vmem:[%s11841_s2 + $0x458] sm:$0xff] }
  0xe1   : > { %6657 = vmatprep.mubr.f32.mxu0 %v8305_v5  ;;  %7349 = vmatpush3.bf16.msra.mxu0 %v9059_v17  ;;  %v9101_v5 = vpack.c.bf16 %v5849_v2, %v5848_v32  ;;  %v7891_v32 = vld [vmem:[%s8192_s16 + $0x32] sm:$0xff] }
  0xe2   : > { %1552 = vmatmul.mubr.f32.gmra.mrb[84].mxu1 %v8961_v62  ;;  %7351 = vmatprep.subr.bf16.mxu0 %v9073_v33 }
  0xe3   : > { %1556 = vmatprep.mubr.f32.mxu1 %v8965_v28  ;;  %11941 = vst [vmem:[#allocation46_spill] sm:$0xff] %v9101_v5 }
  0xe4   : > { %6658 = vmatmul.mubr.f32.gmra.mrb[70].mxu0 %v8323_v11  ;;  %v5851_v11 = vld [vmem:[%s11841_s2 + $0x468] sm:$0xff] }
  0xe5   : > { %6660 = vmatprep.mubr.f32.mxu0 %v8327_v13  ;;  %7353 = vmatpush3.bf16.msra.mxu0 %v9073_v33  ;;  %v9115_v13 = vpack.c.bf16 %v5851_v11, %v5850_v51  ;;  %v11956_v11 = vld [vmem:[#allocation23_spill] sm:$0xff] }
  0xe6   : > { %1557 = vmatmul.mubr.f32.gmra.mrb[86].mxu1 %v8972_v7  ;;  %7355 = vmatprep.subr.bf16.mxu0 %v9087_v60 }
  0xe7   : > { %1561 = vmatprep.mubr.f32.mxu1 %v8976_v50  ;;  %11942 = vst [vmem:[#allocation47_spill] sm:$0xff] %v9115_v13 }
  0xe8   : > { %6661 = vmatmul.mubr.f32.gmra.mrb[72].mxu0 %v8345_v19  ;;  %v5853_v19 = vld [vmem:[%s11841_s2 + $0x478] sm:$0xff] }
  0xe9   : > { %6663 = vmatprep.mubr.f32.mxu0 %v8349_v21  ;;  %7357 = vmatpush3.bf16.msra.mxu0 %v9087_v60  ;;  %v9129_v21 = vpack.c.bf16 %v5853_v19, %v5852_v4  ;;  %v5857_v19 = vld [vmem:[%s11841_s2 + $0x190] sm:$0xff] }
  0xea   : > { %1562 = vmatmul.mubr.f32.gmra.mrb[88].mxu1 %v8982_v12  ;;  %7359 = vmatprep.subr.bf16.mxu0 %v9101_v5 }
  0xeb   : > { %1566 = vmatprep.mubr.f32.mxu1 %v8986_v23  ;;  %11943 = vst [vmem:[#allocation48_spill] sm:$0xff] %v9129_v21 }
  0xec   : > { %6664 = vmatmul.mubr.f32.gmra.mrb[74].mxu0 %v8367_v27  ;;  %v5872_v27 = vld [vmem:[%s11841_s2 + $0x208] sm:$0xff] }
  0xed   : > { %6666 = vmatprep.mubr.f32.mxu0 %v8371_v29  ;;  %7361 = vmatpush3.bf16.msra.mxu0 %v9101_v5  ;;  %v7370_v29 = vpack.c.bf16 %v5872_v27, %v5871_v24  ;;  %v5858_v24 = vld [vmem:[%s11841_s2 + $0x198] sm:$0xff]  ;;  %v11957_v27 = vld [vmem:[#allocation24_spill] sm:$0xff] }
  0xee   : > { %1567 = vmatmul.mubr.f32.gmra.mrb[90].mxu1 %v8992_v3  ;;  %7363 = vmatprep.subr.bf16.mxu0 %v9115_v13 }
  0xef   : > { %1571 = vmatprep.mubr.f32.mxu1 %v8996_v46 }
  0xf0   : > { %6667 = vmatmul.mubr.f32.gmra.mrb[76].mxu0 %v8389_v35  ;;  %v11944_v35 = vld [vmem:[#allocation8_spill] sm:$0xff] }
  0xf1   : > { %6669 = vmatprep.mubr.f32.mxu0 %v8393_v37  ;;  %7365 = vmatpush3.bf16.msra.mxu0 %v9115_v13  ;;  %v11945_v37 = vld [vmem:[#allocation15_spill] sm:$0xff] }
  0xf2   : > { %1572 = vmatmul.mubr.f32.gmra.mrb[92].mxu1 %v9002_v15  ;;  %7367 = vmatprep.subr.bf16.mxu0 %v9129_v21 }
  0xf3   : > { %1576 = vmatprep.mubr.f32.mxu1 %v9006_v38 }
  0xf4   : > { %6670 = vmatmul.mubr.f32.gmra.mrb[78].mxu0 %v8411_v43  ;;  %v11946_v43 = vld [vmem:[#allocation16_spill] sm:$0xff] }
  0xf5   : > { %6672 = vmatprep.mubr.f32.mxu0 %v8421_v47  ;;  %7369 = vmatpush3.bf16.msra.mxu0 %v9129_v21  ;;  %v11947_v47 = vld [vmem:[#allocation10_spill] sm:$0xff] }
  0xf6   : > { %1577 = vmatmul.mubr.f32.gmra.mrb[94].mxu1 %v9012_v41  ;;  %7371 = vmatprep.subr.bf16.mxu0 %v7370_v29  ;;  %v5875_v29 = vld [vmem:[%s11841_s2 + $0x220] sm:$0xff] }
  0xf7   : > { %2017 = vmatprep.mubr.f32.mxu1 %v8485_v14  ;;  %v11950_v14 = vld [vmem:[#allocation20_spill] sm:$0xff] }
  0xf8   : > { %6673 = vmatmul.mubr.f32.gmra.mrb[80].mxu0 %v8433_v53 }
  0xf9   : > { %6675 = vmatprep.mubr.f32.mxu0 %v8443_v57  ;;  %v11948_v57 = vld [vmem:[#allocation11_spill] sm:$0xff] }
  0xfa   : > { %2018 = vmatmul.mubr.f32.vlgmr.msra.gmra.mrb[96].mxu1 %v8510_v25  ;;  %v11952_v25 = vld [vmem:[#allocation14_spill] sm:$0xff] }
  0xfb   : > { %7810 = vmatpush3.bf16.msra.mxu1 %v8699_v44  ;;  %2022 = vmatprep.mubr.f32.mxu1 %v8514_v26  ;;  %v2920_v26 = vld [vmem:[%s11841_s2 + $0x80] sm:$0xff] }
  0xfc   : > { %6676 = vmatmul.mubr.f32.gmra.mrb[82].mxu0 %v8460_v1  ;;  %7803 = vmatprep.subr.bf16.mxu1 %v9046_v56 }
  0xfd   : > { %6678 = vmatprep.mubr.f32.mxu0 %v8471_v8  ;;  %v11949_v8 = vld [vmem:[#allocation19_spill] sm:$0xff] }
  0xfe   : > { %2023 = vmatmul.mubr.f32.gmra.mrb[98].mxu1 %v8539_v39  ;;  %v11953_v39 = vld [vmem:[#allocation21_spill] sm:$0xff] }
  0xff   : > { %2027 = vmatprep.mubr.f32.mxu1 %v8543_v40  ;;  %7811 = vmatpush3.bf16.msra.mxu1 %v9046_v56  ;;  %v5855_v40 = vld [vmem:[%s11841_s2 + $0x180] sm:$0xff] }
 0x100   : > { %6679 = vmatmul.mubr.f32.gmra.mrb[84].mxu0 %v8489_v16  ;;  %7804 = vmatprep.subr.bf16.mxu1 %v9059_v17  ;;  %v11951_v16 = vld [vmem:[#allocation13_spill] sm:$0xff] }
 0x101   : > { %6681 = vmatprep.mubr.f32.mxu0 %v8500_v22 }
 0x102   : > { %2028 = vmatmul.mubr.f32.gmra.mrb[100].mxu1 %v8570_v52  ;;  %v11954_v52 = vld [vmem:[#allocation22_spill] sm:$0xff] }
 0x103   : > { %2032 = vmatprep.mubr.f32.mxu1 %v8574_v54  ;;  %7812 = vmatpush3.bf16.msra.mxu1 %v9059_v17  ;;  %v5873_v54 = vld [vmem:[%s11841_s2 + $0x210] sm:$0xff] }
 0x104   : > { %6682 = vmatmul.mubr.f32.gmra.mrb[86].mxu0 %v8518_v30  ;;  %7805 = vmatprep.subr.bf16.mxu1 %v9073_v33  ;;  %v2921_v30 = vld [vmem:[%s11841_s2 + $0x88] sm:$0xff] }
 0x105   : > { %6684 = vmatprep.mubr.f32.mxu0 %v8529_v34  ;;  %v7434_v59 = vpack.c.bf16 %v2921_v30, %v2920_v26  ;;  %v5877_v26 = vld [vmem:[%s11841_s2 + $0x230] sm:$0xff]  ;;  %v5878_v30 = vld [vmem:[%s11841_s2 + $0x238] sm:$0xff] }
 0x106   : > { %2033 = vmatmul.mubr.f32.gmra.mrb[102].mxu1 %v8602_v9  ;;  %v5874_v9 = vld [vmem:[%s11841_s2 + $0x218] sm:$0xff] }
 0x107   : > { %2037 = vmatprep.mubr.f32.mxu1 %v8607_v10  ;;  %7813 = vmatpush3.bf16.msra.mxu1 %v9073_v33  ;;  %v11955_v10 = vld [vmem:[#allocation18_spill] sm:$0xff]  ;;  %v7374_v4 = vpack.c.bf16 %v5874_v9, %v5873_v54  ;;  %v11960_v9 = vld [vmem:[#allocation27_spill] sm:$0xff] }
 0x108   : > { %6685 = vmatmul.mubr.f32.gmra.mrb[88].mxu0 %v8549_v42  ;;  %7806 = vmatprep.subr.bf16.mxu1 %v9087_v60  ;;  %v5856_v42 = vld [vmem:[%s11841_s2 + $0x188] sm:$0xff] }
 0x109   : > { %6687 = vmatprep.mubr.f32.mxu0 %v11944_v35  ;;  %v7372_v2 = vpack.c.bf16 %v5856_v42, %v5855_v40  ;;  %v5876_v35 = vld [vmem:[%s11841_s2 + $0x228] sm:$0xff] }
 0x10a   : > { %2038 = vmatmul.mubr.f32.gmra.mrb[104].mxu1 %v11945_v37  ;;  %v7892_v37 = vld [vmem:[%s8192_s16 + $0x3a] sm:$0xff]  ;;  %v7895_v42 = vld [vmem:[%s8192_s16 + $0x62] sm:$0xff] }
 0x10b   : > { %2042 = vmatprep.mubr.f32.mxu1 %v11946_v43  ;;  %7814 = vmatpush3.bf16.msra.mxu1 %v9087_v60  ;;  %v11978_v60 = vld [vmem:[#allocation41_spill] sm:$0xff] }
 0x10c   : > { %6688 = vmatmul.mubr.f32.gmra.mrb[90].mxu0 %v11947_v47  ;;  %7807 = vmatprep.subr.bf16.mxu1 %v9101_v5  ;;  %v7893_v47 = vld [vmem:[%s8192_s16 + $0x4a] sm:$0xff] }
 0x10d   : > { %v6570_v53 = vpop.f32.mrb[0].mxu1  ;;  %6690 = vmatprep.mubr.f32.mxu0 %v11948_v57 }
 0x10e   : > { %v1198_v1 = vpop.f32.mrb[1].mxu1  ;;  %2043 = vmatmul.mubr.f32.gmra.mrb[106].mxu1 %v11949_v8  ;;  %v7376_v53 = vpack.c.bf16 %v5858_v24, %v5857_v19  ;;  %v7378_v8 = vpack.c.bf16 %v5876_v35, %v5875_v29  ;;  %v7897_v24 = vld [vmem:[%s8192_s16 + $0x7a] sm:$0xff] }
 0x10f   : > { %2047 = vmatprep.mubr.f32.mxu1 %v11950_v14  ;;  %7815 = vmatpush3.bf16.msra.mxu1 %v9101_v5  ;;  %v11958_v1 = vld [vmem:[#allocation25_spill] sm:$0xff]  ;;  %v5859_v14 = vld [vmem:[%s11841_s2 + $0x1a0] sm:$0xff] }
 0x110   : > { %6691 = vmatmul.mubr.f32.gmra.mrb[92].mxu0 %v11951_v16  ;;  %7808 = vmatprep.subr.bf16.mxu1 %v9115_v13  ;;  %v5860_v16 = vld [vmem:[%s11841_s2 + $0x1a8] sm:$0xff]  ;;  %v9446_v5 = vld [vmem:[%s8642_s11 + $0x1a] sm:$0xff] }
 0x111   : > { %v9186_v22 = vpop.f32.mrb[2].mxu1  ;;  %6693 = vmatprep.mubr.f32.mxu0 %v11952_v25  ;;  %v11959_v25 = vld [vmem:[#allocation26_spill] sm:$0xff] }
 0x112   : > { %v9195_v34 = vpop.f32.mrb[3].mxu1  ;;  %2048 = vmatmul.mubr.f32.gmra.mrb[108].mxu1 %v11953_v39  ;;  %v7894_v39 = vld [vmem:[%s8192_s16 + $0x52] sm:$0xff] }
 0x113   : > { %2052 = vmatprep.mubr.f32.mxu1 %v11954_v52  ;;  %7816 = vmatpush3.bf16.msra.mxu1 %v9115_v13  ;;  %v7380_v52 = vpack.c.bf16 %v5860_v16, %v5859_v14  ;;  %v7899_v16 = vld [vmem:[%s8192_s16 + $0x92] sm:$0xff] }
 0x114   : > { %6694 = vmatmul.mubr.f32.gmra.mrb[94].mxu0 %v11955_v10  ;;  %7809 = vmatprep.subr.bf16.mxu1 %v9129_v21  ;;  %v7382_v10 = vpack.c.bf16 %v5878_v30, %v5877_v26  ;;  %v5865_v30 = vld [vmem:[%s11841_s2 + $0x1d0] sm:$0xff]  ;;  %v487_v13 = vld [vmem:[%s8642_s11 + $0x39] sm:$0xff] }
 0x115   : > { %v9214_v58 = vpop.f32.mrb[4].mxu1  ;;  %6728 = vmatprep.mubr.f32.mxu0 %v7891_v32  ;;  %v5862_v32 = vld [vmem:[%s11841_s2 + $0x1b8] sm:$0xff] }
 0x116   : > { %v9217_v51 = vpop.f32.mrb[5].mxu1  ;;  %2053 = vmatmul.mubr.f32.gmra.mrb[110].mxu1 %v11956_v11  ;;  %v5880_v11 = vld [vmem:[%s11841_s2 + $0x248] sm:$0xff] }
 0x117   : > { %2057 = vmatprep.mubr.f32.mxu1 %v11957_v27  ;;  %7817 = vmatpush3.bf16.msra.mxu1 %v9129_v21 }
 0x118   : > { %6729 = vmatmul.mubr.f32.vlgmr.msra.gmra.mrb[96].mxu0 %v7892_v37  ;;  %7435 = vmatprep.subr.bf16.mxu1 %v7434_v59  ;;  %v5861_v59 = vld [vmem:[%s11841_s2 + $0x1b0] sm:$0xff]  ;;  %v5863_v37 = vld [vmem:[%s11841_s2 + $0x1c0] sm:$0xff] }
 0x119   : > { %v9235_v43 = vpop.f32.mrb[6].mxu1  ;;  %7373 = vmatpush3.bf16.msra.mxu0 %v7372_v2  ;;  %6731 = vmatprep.mubr.f32.mxu0 %v7893_v47  ;;  %v5879_v2 = vld [vmem:[%s11841_s2 + $0x240] sm:$0xff]  ;;  %v7384_v27 = vpack.c.bf16 %v5862_v32, %v5861_v59  ;;  %v5864_v47 = vld [vmem:[%s11841_s2 + $0x1c8] sm:$0xff] }
 0x11a   : > { %v9238_v57 = vpop.f32.mrb[7].mxu1  ;;  %2058 = vmatmul.mubr.f32.gmra.mrb[112].mxu1 %v11958_v1  ;;  %7375 = vmatprep.subr.bf16.mxu0 %v7374_v4  ;;  %v7896_v4 = vld [vmem:[%s8192_s16 + $0x6a] sm:$0xff]  ;;  %v7386_v35 = vpack.c.bf16 %v5880_v11, %v5879_v2  ;;  %v5882_v1 = vld [vmem:[%s11841_s2 + $0x258] sm:$0xff]  ;;  %v5867_v2 = vld [vmem:[%s11841_s2 + $0x1e0] sm:$0xff] }
 0x11b   : > { %2062 = vmatprep.mubr.f32.mxu1 %v11959_v25  ;;  %v7388_v25 = vpack.c.bf16 %v5864_v47, %v5863_v37  ;;  %v5868_v11 = vld [vmem:[%s11841_s2 + $0x1e8] sm:$0xff] }
 0x11c   : > { %6732 = vmatmul.mubr.f32.gmra.mrb[98].mxu0 %v7894_v39  ;;  %v5866_v39 = vld [vmem:[%s11841_s2 + $0x1d8] sm:$0xff]  ;;  %v7903_v47 = vld [vmem:[%s8192_s16 + $0xc2] sm:$0xff] }
 0x11d   : > { %v9255_v40 = vpop.f32.mrb[8].mxu1  ;;  %7377 = vmatpush3.bf16.msra.mxu0 %v7376_v53  ;;  %6734 = vmatprep.mubr.f32.mxu0 %v7895_v42  ;;  %v5881_v53 = vld [vmem:[%s11841_s2 + $0x250] sm:$0xff]  ;;  %v5883_v42 = vld [vmem:[%s11841_s2 + $0x260] sm:$0xff]  ;;  %v7392_v59 = vpack.c.bf16 %v5866_v39, %v5865_v30 }
 0x11e   : > { %v9258_v54 = vpop.f32.mrb[9].mxu1  ;;  %2063 = vmatmul.mubr.f32.gmra.mrb[114].mxu1 %v11960_v9  ;;  %7379 = vmatprep.subr.bf16.mxu0 %v7378_v8  ;;  %v7898_v8 = vld [vmem:[%s8192_s16 + $0x82] sm:$0xff] }
 0x11f   : > { %2067 = vmatprep.mubr.f32.mxu1 %v8750_v49  ;;  %v11961_v49 = vld [vmem:[#allocation28_spill] sm:$0xff]  ;;  %v11964_v30 = vld [vmem:[#allocation31_spill] sm:$0xff] }
 0x120   : > { %6735 = vmatmul.mubr.f32.gmra.mrb[100].mxu0 %v7896_v4  ;;  %v11962_v4 = vld [vmem:[#allocation29_spill] sm:$0xff] }
 0x121   : > { %v9275_v19 = vpop.f32.mrb[10].mxu1  ;;  %7381 = vmatpush3.bf16.msra.mxu0 %v7380_v52  ;;  %6737 = vmatprep.mubr.f32.mxu0 %v7897_v24  ;;  %v7900_v52 = vld [vmem:[%s8192_s16 + $0x9a] sm:$0xff] }
 0x122   : > { %v9278_v29 = vpop.f32.mrb[11].mxu1  ;;  %2068 = vmatmul.mubr.f32.gmra.mrb[116].mxu1 %v11961_v49  ;;  %7383 = vmatprep.subr.bf16.mxu0 %v7382_v10  ;;  %v7901_v10 = vld [vmem:[%s8192_s16 + $0xaa] sm:$0xff]  ;;  %v7902_v49 = vld [vmem:[%s8192_s16 + $0xb2] sm:$0xff] }
 0x123   : > { %2072 = vmatprep.mubr.f32.mxu1 %v8767_v63  ;;  %v7390_v63 = vpack.c.bf16 %v5882_v1, %v5881_v53  ;;  %v7396_v53 = vpack.c.bf16 %v5868_v11, %v5867_v2 }
 0x124   : > { %6738 = vmatmul.mubr.f32.gmra.mrb[102].mxu0 %v7898_v8  ;;  %v11963_v8 = vld [vmem:[#allocation30_spill] sm:$0xff] }
 0x125   : > { %v9295_v14 = vpop.f32.mrb[12].mxu1  ;;  %7385 = vmatpush3.bf16.msra.mxu0 %v7384_v27  ;;  %6740 = vmatprep.mubr.f32.mxu0 %v7899_v16  ;;  %v5885_v27 = vld [vmem:[%s11841_s2 + $0x270] sm:$0xff] }
 0x126   : > { %v9298_v26 = vpop.f32.mrb[13].mxu1  ;;  %2073 = vmatmul.mubr.f32.gmra.mrb[118].mxu1 %v8780_v61  ;;  %7387 = vmatprep.subr.bf16.mxu0 %v7386_v35  ;;  %v5884_v61 = vld [vmem:[%s11841_s2 + $0x268] sm:$0xff] }
 0x127   : > { %2077 = vmatprep.mubr.f32.mxu1 %v8784_v18  ;;  %v7394_v18 = vpack.c.bf16 %v5884_v61, %v5883_v42  ;;  %v5887_v42 = vld [vmem:[%s11841_s2 + $0x280] sm:$0xff]  ;;  %v5888_v61 = vld [vmem:[%s11841_s2 + $0x288] sm:$0xff] }
 0x128   : > { %6741 = vmatmul.mubr.f32.gmra.mrb[104].mxu0 %v7900_v52  ;;  %v7904_v52 = vld [vmem:[%s8192_s16 + $0xca] sm:$0xff] }
 0x129   : > { %v9315_v9 = vpop.f32.mrb[14].mxu1  ;;  %7389 = vmatpush3.bf16.msra.mxu0 %v7388_v25  ;;  %6743 = vmatprep.mubr.f32.mxu0 %v7901_v10  ;;  %v5869_v25 = vld [vmem:[%s11841_s2 + $0x1f0] sm:$0xff] }
 0x12a   : > { %v9318_v32 = vpop.f32.mrb[15].mxu1  ;;  %2078 = vmatmul.mubr.f32.gmra.mrb[120].mxu1 %v8797_v55  ;;  %7391 = vmatprep.subr.bf16.mxu0 %v7390_v63  ;;  %v5886_v55 = vld [vmem:[%s11841_s2 + $0x278] sm:$0xff] }
 0x12b   : > { %2082 = vmatprep.mubr.f32.mxu1 %v11962_v4  ;;  %v973_v24 = vpop.f32.mrb[0].mxu0  ;;  %v7398_v16 = vpack.c.bf16 %v5886_v55, %v5885_v27  ;;  %v5870_v63 = vld [vmem:[%s11841_s2 + $0x1f8] sm:$0xff]  ;;  %v11965_v4 = vld [vmem:[#allocation32_spill] sm:$0xff]  ;;  %v7402_v27 = vpack.c.bf16 %v5888_v61, %v5887_v42 }
 0x12c   : > { %6744 = vmatmul.mubr.f32.gmra.mrb[106].mxu0 %v7902_v49  ;;  %v975_v35 = vpop.f32.mrb[1].mxu0  ;;  %v7400_v2 = vpack.c.bf16 %v5870_v63, %v5869_v25  ;;  %v9362_v24 = vld [vmem:[%s8642_s11 + $0x19] sm:$0xff]  ;;  %v11966_v49 = vld [vmem:[#allocation33_spill] sm:$0xff]  ;;  %v9385_v61 = vld [vmem:[%s8642_s11 + $0x21] sm:$0xff] }
 0x12d   : > { %v9335_v37 = vpop.f32.mrb[16].mxu1  ;;  %7393 = vmatpush3.bf16.msra.mxu0 %v7392_v59  ;;  %6746 = vmatprep.mubr.f32.mxu0 %v7903_v47  ;;  %v5889_v35 = vld [vmem:[%s11841_s2 + $0x290] sm:$0xff]  ;;  %v5890_v47 = vld [vmem:[%s11841_s2 + $0x298] sm:$0xff] }
 0x12e   : > { %v9338_v1 = vpop.f32.mrb[17].mxu1  ;;  %2083 = vmatmul.mubr.f32.gmra.mrb[122].mxu1 %v11963_v8  ;;  %7395 = vmatprep.subr.bf16.mxu0 %v7394_v18  ;;  %v7905_v18 = vld [vmem:[%s8192_s16 + $0xda] sm:$0xff]  ;;  %v7906_v8 = vld [vmem:[%s8192_s16 + $0xe2] sm:$0xff]  ;;  %v7406_v42 = vpack.c.bf16 %v5890_v47, %v5889_v35 }
 0x12f   : > { %2087 = vmatprep.mubr.f32.mxu1 %v11964_v30  ;;  %v978_v39 = vpop.f32.mrb[2].mxu0  ;;  %v9379_v63 = vld [vmem:[%s8642_s11 + $0x18] sm:$0xff]  ;;  %v11970_v47 = vld [vmem:[#allocation36_spill] sm:$0xff] }
 0x130   : > { %6747 = vmatmul.mubr.f32.gmra.mrb[108].mxu0 %v7904_v52  ;;  %v980_v10 = vpop.f32.mrb[3].mxu0  ;;  %v11967_v39 = vld [vmem:[#allocation34_spill] sm:$0xff]  ;;  %v11968_v52 = vld [vmem:[#allocation35_spill] sm:$0xff] }
 0x131   : > { %v9355_v59 = vpop.f32.mrb[18].mxu1  ;;  %7397 = vmatpush3.bf16.msra.mxu0 %v7396_v53  ;;  %6749 = vmatprep.mubr.f32.mxu0 %v7905_v18  ;;  %v5891_v10 = vld [vmem:[%s11841_s2 + $0x2a0] sm:$0xff]  ;;  %v5892_v18 = vld [vmem:[%s11841_s2 + $0x2a8] sm:$0xff] }
 0x132   : > { %v9358_v11 = vpop.f32.mrb[19].mxu1  ;;  %2088 = vmatmul.mubr.f32.gmra.mrb[124].mxu1 %v11965_v4  ;;  %7399 = vmatprep.subr.bf16.mxu0 %v7398_v16 }
 0x133   : > { %v983_v55 = vpop.f32.mrb[4].mxu0  ;;  %2092 = vmatprep.mubr.f32.mxu1 %v11966_v49  ;;  %v9402_v49 = vld [vmem:[%s8642_s11 + $0x20] sm:$0xff] }
 0x134   : > { %v9372_v53 = vadd.f32 %v9195_v34, %v983_v55  ;;  %6750 = vmatmul.mubr.f32.gmra.mrb[110].mxu0 %v7906_v8  ;;  %v985_v16 = vpop.f32.mrb[5].mxu0  ;;  %v7410_v8 = vpack.c.bf16 %v5892_v18, %v5891_v10  ;;  %v405_v18 = vld [vmem:[%s8642_s11 + $0x30] sm:$0xff] }
 0x135   : > { %v9375_v25 = vpop.f32.mrb[20].mxu1  ;;  %7401 = vmatpush3.bf16.msra.mxu0 %v7400_v2  ;;  %3077 = vmatprep.mubr.f32.mxu0 %v9362_v24  ;;  %v9408_v16 = vld [vmem:[%s8642_s11 + $0x31] sm:$0xff] }
 0x136   : > { %v9381_v30 = vpop.f32.mrb[21].mxu1  ;;  %2093 = vmatmul.mubr.f32.gmra.mrb[126].mxu1 %v11967_v39  ;;  %7403 = vmatprep.subr.bf16.mxu0 %v7402_v27  ;;  %11971 = vst [vmem:[#allocation15_spill] sm:$0xff] %v9408_v16  ;;  %v11972_v39 = vld [vmem:[#allocation37_spill] sm:$0xff] }
 0x137   : > { %v988_v34 = vpop.f32.mrb[6].mxu0  ;;  %2097 = vmatprep.mubr.f32.mxu1 %v11968_v52 }
 0x138   : > { %v9395_v2 = vadd.f32 %v9186_v22, %v988_v34  ;;  %3078 = vmatmul.mubr.f32.vlgmr.msra.gmra.mrb[112].mxu0 %v9379_v63  ;;  %v990_v4 = vpop.f32.mrb[7].mxu0  ;;  %v5894_v34 = vld [vmem:[%s11841_s2 + $0x2b8] sm:$0xff] }
 0x139   : > { %v9398_v55 = vpop.f32.mrb[22].mxu1  ;;  %7405 = vmatpush3.bf16.msra.mxu0 %v7402_v27  ;;  %3082 = vmatprep.mubr.f32.mxu0 %v9385_v61  ;;  %v5893_v27 = vld [vmem:[%s11841_s2 + $0x2b0] sm:$0xff] }
 0x13a   : > { %11969 = vst [vmem:[#allocation8_spill] sm:$0xff] %v9398_v55  ;;  %v9404_v35 = vpop.f32.mrb[23].mxu1  ;;  %2098 = vmatmul.mubr.f32.gmra.mrb[128].mxu1 %v11970_v47  ;;  %7407 = vmatprep.subr.bf16.mxu0 %v7406_v42  ;;  %v7414_v21 = vpack.c.bf16 %v5894_v34, %v5893_v27  ;;  %v406_v27 = vld [vmem:[%s8642_s11 + $0x38] sm:$0xff] }
 0x13b   : > { %v993_v22 = vpop.f32.mrb[8].mxu0  ;;  %2102 = vmatprep.mubr.f32.mxu1 %v11972_v39  ;;  %v11975_v39 = vld [vmem:[#allocation38_spill] sm:$0xff] }
 0x13c   : > { %v9418_v52 = vadd.f32 %v9217_v51, %v993_v22  ;;  %v995_v4 = vpop.f32.mrb[9].mxu0  ;;  %3083 = vmatmul.mubr.f32.gmra.mrb[114].mxu0 %v9402_v49  ;;  %v11976_v22 = vld [vmem:[#allocation39_spill] sm:$0xff] }
 0x13d   : > { %v9421_v10 = vpop.f32.mrb[24].mxu1  ;;  %7409 = vmatpush3.bf16.msra.mxu0 %v7406_v42  ;;  %3087 = vmatprep.mubr.f32.mxu0 %v9408_v16  ;;  %v5895_v4 = vld [vmem:[%s11841_s2 + $0x2c0] sm:$0xff]  ;;  %v5896_v42 = vld [vmem:[%s11841_s2 + $0x2c8] sm:$0xff] }
 0x13e   : > { %11973 = vst [vmem:[#allocation16_spill] sm:$0xff] %v9421_v10  ;;  %v9425_v47 = vpop.f32.mrb[25].mxu1  ;;  %2103 = vmatmul.mubr.f32.gmra.mrb[130].mxu1 %v11975_v39  ;;  %7411 = vmatprep.subr.bf16.mxu0 %v7410_v8 }
 0x13f   : > { %11974 = vst [vmem:[#allocation10_spill] sm:$0xff] %v9425_v47  ;;  %v998_v51 = vpop.f32.mrb[10].mxu0  ;;  %2107 = vmatprep.mubr.f32.mxu1 %v11976_v22  ;;  %v11977_v22 = vld [vmem:[#allocation40_spill] sm:$0xff]  ;;  %v7418_v47 = vpack.c.bf16 %v5896_v42, %v5895_v4 }
 0x140   : > { %v9437_v16 = vadd.f32 %v9214_v58, %v998_v51  ;;  %v1000_v10 = vpop.f32.mrb[11].mxu0  ;;  %3088 = vmatmul.mubr.f32.gmra.mrb[116].mxu0 %v405_v18  ;;  %v5897_v58 = vld [vmem:[%s11841_s2 + $0x2d0] sm:$0xff] }
 0x141   : > { %v9439_v39 = vpop.f32.mrb[26].mxu1  ;;  %7413 = vmatpush3.bf16.msra.mxu0 %v7410_v8  ;;  %3092 = vmatprep.mubr.f32.mxu0 %v487_v13  ;;  %v5898_v13 = vld [vmem:[%s11841_s2 + $0x2d8] sm:$0xff] }
 0x142   : > { %v9442_v34 = vpop.f32.mrb[27].mxu1  ;;  %2108 = vmatmul.mubr.f32.gmra.mrb[132].mxu1 %v11977_v22  ;;  %7415 = vmatprep.subr.bf16.mxu0 %v7414_v21 }
 0x143   : > { %v1003_v55 = vpop.f32.mrb[12].mxu0  ;;  %2112 = vmatprep.mubr.f32.mxu1 %v11978_v60  ;;  %v7422_v60 = vpack.c.bf16 %v5898_v13, %v5897_v58  ;;  %v5901_v58 = vld [vmem:[%s11841_s2 + $0x2f0] sm:$0xff] }
 0x144   : > { %v9456_v8 = vadd.f32 %v9238_v57, %v1003_v55  ;;  %v1005_v10 = vpop.f32.mrb[13].mxu0  ;;  %3093 = vmatmul.mubr.f32.gmra.mrb[118].mxu0 %v406_v27  ;;  %v5899_v57 = vld [vmem:[%s11841_s2 + $0x2e0] sm:$0xff]  ;;  %v5900_v55 = vld [vmem:[%s11841_s2 + $0x2e8] sm:$0xff] }
 0x145   : > { %v9458_v18 = vpop.f32.mrb[28].mxu1  ;;  %7417 = vmatpush3.bf16.msra.mxu0 %v7414_v21  ;;  %6808 = vmatprep.mubr.f32.mxu0 %v9446_v5 }
 0x146   : > { %v9461_v51 = vpop.f32.mrb[29].mxu1  ;;  %2113 = vmatmul.mubr.f32.gmra.mrb[134].mxu1 %v8916_v31  ;;  %7419 = vmatprep.subr.bf16.mxu0 %v7418_v47 }
 0x147   : > { %v1008_v4 = vpop.f32.mrb[14].mxu0  ;;  %2117 = vmatprep.mubr.f32.mxu1 %v8920_v20  ;;  %v7426_v20 = vpack.c.bf16 %v5900_v55, %v5899_v57  ;;  %v2936_v57 = vld [vmem:[%s11841_s2 + $0x100] sm:$0xff] }
 0x148   : > { %v9472_v21 = vadd.f32 %v9235_v43, %v1008_v4  ;;  %v1010_v42 = vpop.f32.mrb[15].mxu0  ;;  %v5902_v43 = vld [vmem:[%s11841_s2 + $0x2f8] sm:$0xff] }
 0x149   : > { %v9474_v27 = vpop.f32.mrb[30].mxu1  ;;  %7421 = vmatpush3.bf16.msra.mxu0 %v7418_v47  ;;  %v7430_v4 = vpack.c.bf16 %v5902_v43, %v5901_v58  ;;  %v2938_v58 = vld [vmem:[%s11841_s2 + $0x110] sm:$0xff] }
 0x14a   : > { %v9476_v31 = vpop.f32.mrb[31].mxu1  ;;  %2118 = vmatmul.mubr.f32.gmra.mrb[136].mxu1 %v8933_v6  ;;  %7423 = vmatprep.subr.bf16.mxu0 %v7422_v60 }
 0x14b   : > { %v1013_v22 = vpop.f32.mrb[16].mxu0  ;;  %2122 = vmatprep.mubr.f32.mxu1 %v8937_v0 }
 0x14c   : > { %v9487_v13 = vadd.f32 %v9258_v54, %v1013_v22  ;;  %v1015_v47 = vpop.f32.mrb[17].mxu0  ;;  %v2937_v54 = vld [vmem:[%s11841_s2 + $0x108] sm:$0xff] }
 0x14d   : > { %v1423_v10 = vpop.f32.mrb[32].mxu1  ;;  %7425 = vmatpush3.bf16.msra.mxu0 %v7422_v60 }
 0x14e   : > { %v1425_v6 = vpop.f32.mrb[33].mxu1  ;;  %2123 = vmatmul.mubr.f32.gmra.mrb[138].mxu1 %v8950_v36  ;;  %7427 = vmatprep.subr.bf16.mxu0 %v7426_v20 }
 0x14f   : > { %v1018_v0 = vpop.f32.mrb[18].mxu0  ;;  %2127 = vmatprep.mubr.f32.mxu1 %v8954_v45  ;;  %v7466_v45 = vpack.c.bf16 %v2937_v54, %v2936_v57  ;;  %v9516_v6 = vld [vmem:[%s8642_s11 + $0x32] sm:$0xff] }
 0x150   : > { %v9498_v55 = vadd.f32 %v9255_v40, %v1018_v0  ;;  %v1020_v60 = vpop.f32.mrb[19].mxu0  ;;  %v2939_v40 = vld [vmem:[%s11841_s2 + $0x118] sm:$0xff] }
 0x151   : > { %v1428_v42 = vpop.f32.mrb[34].mxu1  ;;  %7429 = vmatpush3.bf16.msra.mxu0 %v7426_v20 }
 0x152   : > { %v1430_v36 = vpop.f32.mrb[35].mxu1  ;;  %2128 = vmatmul.mubr.f32.gmra.mrb[140].mxu1 %v8961_v62  ;;  %7431 = vmatprep.subr.bf16.mxu0 %v7430_v4  ;;  %v9512_v62 = vld [vmem:[%s8642_s11 + $0x22] sm:$0xff] }
 0x153   : > { %v1023_v22 = vpop.f32.mrb[20].mxu0  ;;  %2132 = vmatprep.mubr.f32.mxu1 %v8965_v28  ;;  %v7470_v28 = vpack.c.bf16 %v2939_v40, %v2938_v58 }
 0x154   : > { %v9509_v43 = vadd.f32 %v9278_v29, %v1023_v22  ;;  %v1025_v20 = vpop.f32.mrb[21].mxu0  ;;  %v2940_v29 = vld [vmem:[%s11841_s2 + $0x120] sm:$0xff]  ;;  %v2943_v22 = vld [vmem:[%s11841_s2 + $0x138] sm:$0xff] }
 0x155   : > { %v1433_v47 = vpop.f32.mrb[36].mxu1  ;;  %7433 = vmatpush3.bf16.msra.mxu0 %v7430_v4  ;;  %v2941_v4 = vld [vmem:[%s11841_s2 + $0x128] sm:$0xff] }
 0x156   : > { %v1435_v10 = vpop.f32.mrb[37].mxu1  ;;  %2133 = vmatmul.mubr.f32.gmra.mrb[142].mxu1 %v8972_v7  ;;  %7467 = vmatprep.subr.bf16.mxu0 %v7466_v45  ;;  %v9519_v0 = vadd.f32 %v1433_v47, %v9372_v53  ;;  %v7474_v42 = vpack.c.bf16 %v2941_v4, %v2940_v29 }
 0x157   : > { %v1028_v57 = vpop.f32.mrb[22].mxu0  ;;  %2137 = vmatprep.mubr.f32.mxu1 %v8976_v50  ;;  %v9534_v50 = vld [vmem:[%s8642_s11 + $0x3a] sm:$0xff] }
 0x158   : > { %v9529_v7 = vadd.f32 %v9275_v19, %v1028_v57  ;;  %6809 = vmatmul.mubr.f32.vlgmr.msra.gmra.mrb[120].mxu0 %v9512_v62  ;;  %v1030_v54 = vpop.f32.mrb[23].mxu0 }
 0x159   : > { %v1438_v60 = vpop.f32.mrb[38].mxu1  ;;  %7469 = vmatpush3.bf16.msra.mxu0 %v7466_v45  ;;  %6811 = vmatprep.mubr.f32.mxu0 %v9516_v6  ;;  %v2942_v45 = vld [vmem:[%s11841_s2 + $0x130] sm:$0xff] }
 0x15a   : > { %v1440_v53 = vpop.f32.mrb[39].mxu1  ;;  %2138 = vmatmul.mubr.f32.gmra.mrb[144].mxu1 %v8982_v12  ;;  %7471 = vmatprep.subr.bf16.mxu0 %v7470_v28  ;;  %v9538_v36 = vadd.f32 %v1438_v60, %v9395_v2  ;;  %v9552_v2 = vld [vmem:[%s8642_s11 + $0x2] sm:$0xff]  ;;  %v7478_v20 = vpack.c.bf16 %v2943_v22, %v2942_v45  ;;  %v11982_v22 = vld [vmem:[#allocation9_spill] sm:$0xff] }
 0x15b   : > { %v1033_v19 = vpop.f32.mrb[24].mxu0  ;;  %2142 = vmatprep.mubr.f32.mxu1 %v8986_v23  ;;  %v11979_v60 = vld [vmem:[#allocation7_spill] sm:$0xff] }
 0x15c   : > { %v9548_v58 = vadd.f32 %v9298_v26, %v1033_v19  ;;  %v1035_v12 = vpop.f32.mrb[25].mxu0  ;;  %6812 = vmatmul.mubr.f32.gmra.mrb[122].mxu0 %v9534_v50  ;;  %v11981_v45 = vld [vmem:[#allocation43_spill] sm:$0xff] }
 0x15d   : > { %v1443_v40 = vpop.f32.mrb[40].mxu1  ;;  %7473 = vmatpush3.bf16.msra.mxu0 %v7470_v28  ;;  %6846 = vmatprep.mubr.f32.mxu0 %v9552_v2  ;;  %v11983_v12 = vld [vmem:[#allocation44_spill] sm:$0xff] }
 0x15e   : > { %v1445_v23 = vpop.f32.mrb[41].mxu1  ;;  %2143 = vmatmul.mubr.f32.gmra.mrb[146].mxu1 %v8992_v3  ;;  %7475 = vmatprep.subr.bf16.mxu0 %v7474_v42  ;;  %v9557_v47 = vadd.f32 %v1443_v40, %v9418_v52 }
 0x15f   : > { %v1038_v10 = vpop.f32.mrb[26].mxu0  ;;  %2147 = vmatprep.mubr.f32.mxu1 %v8996_v46 }
 0x160   : > { %v9561_v26 = vadd.f32 %v9295_v14, %v1038_v10  ;;  %v1040_v57 = vpop.f32.mrb[27].mxu0  ;;  %v11984_v10 = vld [vmem:[#allocation12_spill] sm:$0xff] }
 0x161   : > { %v1448_v28 = vpop.f32.mrb[42].mxu1  ;;  %7477 = vmatpush3.bf16.msra.mxu0 %v7474_v42 }
 0x162   : > { %v1450_v29 = vpop.f32.mrb[43].mxu1  ;;  %2148 = vmatmul.mubr.f32.gmra.mrb[148].mxu1 %v9002_v15  ;;  %7479 = vmatprep.subr.bf16.mxu0 %v7478_v20  ;;  %v9565_v3 = vadd.f32 %v1448_v28, %v9437_v16  ;;  %v11980_v16 = vld [vmem:[#allocation42_spill] sm:$0xff] }
 0x163   : > { %v1043_v4 = vpop.f32.mrb[28].mxu0  ;;  %2152 = vmatprep.mubr.f32.mxu1 %v9006_v38 }
 0x164   : > { %v9569_v52 = vadd.f32 %v9318_v32, %v1043_v4  ;;  %v1045_v46 = vpop.f32.mrb[29].mxu0 }
 0x165   : > { %v1453_v54 = vpop.f32.mrb[44].mxu1  ;;  %7481 = vmatpush3.bf16.msra.mxu0 %v7478_v20  ;;  %v11985_v46 = vld [vmem:[#allocation17_spill] sm:$0xff] }
 0x166   : > { %v1455_v14 = vpop.f32.mrb[45].mxu1  ;;  %2153 = vmatmul.mubr.f32.gmra.mrb[150].mxu1 %v9012_v41  ;;  %7483 = vmatprep.subr.bf16.mxu0 %v11979_v60  ;;  %v9574_v15 = vadd.f32 %v1453_v54, %v9456_v8 }
 0x167   : > { %v1048_v53 = vpop.f32.mrb[30].mxu0  ;;  %2157 = vmatprep.mubr.f32.mxu1 %v11980_v16  ;;  %v2904_v14 = vld [vmem:[%s11841_s2] sm:$0xff] }
 0x168   : > { %v9578_v42 = vadd.f32 %v9315_v9, %v1048_v53  ;;  %v1050_v38 = vpop.f32.mrb[31].mxu0 }
 0x169   : > { %v1458_v32 = vpop.f32.mrb[46].mxu1  ;;  %7485 = vmatpush3.bf16.msra.mxu0 %v11979_v60  ;;  %v2905_v60 = vld [vmem:[%s11841_s2 + $0x8] sm:$0xff] }
 0x16a   : > { %v1460_v19 = vpop.f32.mrb[47].mxu1  ;;  %2158 = vmatmul.mubr.f32.gmra.mrb[152].mxu1 %v11981_v45  ;;  %7487 = vmatprep.subr.bf16.mxu0 %v11982_v22  ;;  %v9584_v41 = vadd.f32 %v1458_v32, %v9472_v21  ;;  %v7436_v45 = vpack.c.bf16 %v2905_v60, %v2904_v14  ;;  %v9679_v60 = vld [vmem:[%s11841_s2 + $0x28] sm:$0xff] }
 0x16b   : > { %v1053_v8 = vpop.f32.mrb[32].mxu0  ;;  %2162 = vmatprep.mubr.f32.mxu1 %v11983_v12  ;;  %v7908_v19 = vld [vmem:[%s8192_s16 + $0xf2] sm:$0xff] }
 0x16c   : > { %v9588_v40 = vadd.f32 %v9338_v1, %v1053_v8  ;;  %v1055_v9 = vpop.f32.mrb[33].mxu0  ;;  %v9633_v8 = vld [vmem:[%s8642_s11 + $0xa] sm:$0xff] }
 0x16d   : > { %v1463_v23 = vpop.f32.mrb[48].mxu1  ;;  %7489 = vmatpush3.bf16.msra.mxu0 %v11982_v22 }
 0x16e   : > { %v1465_v20 = vpop.f32.mrb[49].mxu1  ;;  %2163 = vmatmul.mubr.f32.gmra.mrb[154].mxu1 %v9032_v48  ;;  %7491 = vmatprep.subr.bf16.mxu0 %v11984_v10  ;;  %v9594_v57 = vadd.f32 %v1463_v23, %v9487_v13  ;;  %v9644_v23 = vld [vmem:[%s11841_s2 + $0x18] sm:$0xff] }
 0x16f   : > { %v1058_v21 = vpop.f32.mrb[34].mxu0  ;;  %2167 = vmatprep.mubr.f32.mxu1 %v9362_v24 }
 0x170   : > { %v9598_v28 = vadd.f32 %v9335_v37, %v1058_v21  ;;  %v1060_v1 = vpop.f32.mrb[35].mxu0 }
 0x171   : > { %v1468_v29 = vpop.f32.mrb[50].mxu1  ;;  %7493 = vmatpush3.bf16.msra.mxu0 %v11984_v10  ;;  %v9655_v10 = vld [vmem:[%s11841_s2 + $0xa8] sm:$0xff]  ;;  %v7910_v1 = vld [vmem:[%s8192_s16 + $0xfa] sm:$0xff] }
 0x172   : > { %v1470_v4 = vpop.f32.mrb[51].mxu1  ;;  %2168 = vmatmul.mubr.f32.gmra.mrb[156].mxu1 %v9379_v63  ;;  %7495 = vmatprep.subr.bf16.mxu0 %v11985_v46  ;;  %v9604_v48 = vadd.f32 %v1468_v29, %v9498_v55  ;;  %v2922_v55 = vld [vmem:[%s11841_s2 + $0x90] sm:$0xff] }
 0x173   : > { %v1063_v13 = vpop.f32.mrb[36].mxu0  ;;  %2172 = vmatprep.mubr.f32.mxu1 %v9385_v61  ;;  %v7911_v4 = vld [vmem:[%s8192_s16 + $0x10a] sm:$0xff] }
 0x174   : > { %v9608_v54 = vadd.f32 %v9358_v11, %v1063_v13  ;;  %v1065_v37 = vpop.f32.mrb[37].mxu0  ;;  %v2923_v11 = vld [vmem:[%s11841_s2 + $0x98] sm:$0xff] }
 0x175   : > { %v1473_v53 = vpop.f32.mrb[52].mxu1  ;;  %7497 = vmatpush3.bf16.msra.mxu0 %v11985_v46  ;;  %v7438_v9 = vpack.c.bf16 %v2923_v11, %v2922_v55  ;;  %v2926_v55 = vld [vmem:[%s11841_s2 + $0xb0] sm:$0xff]  ;;  %v2927_v11 = vld [vmem:[%s11841_s2 + $0xb8] sm:$0xff] }
 0x176   : > { %v1475_v16 = vpop.f32.mrb[53].mxu1  ;;  %2173 = vmatmul.mubr.f32.gmra.mrb[158].mxu1 %v9402_v49  ;;  %7531 = vmatprep.subr.bf16.mxu0 %v8699_v44  ;;  %v9626_v38 = vadd.f32 %v1473_v53, %v9509_v43  ;;  %v9639_v43 = vld [vmem:[%s11841_s2 + $0x10] sm:$0xff]  ;;  %v8044_v53 = vmov 0.0  }
 0x177   : > { %v1068_v32 = vpop.f32.mrb[38].mxu0  ;;  %6752 = vmatprep.mubr.f32.mxu1 %v7908_v19  ;;  %v7440_v46 = vpack.c.bf16 %v9644_v23, %v9639_v43  ;;  %579 = vst [vmem:[#allocation3 + $0x30] sm:$0x1] %v8044_v53  ;;  %578 = vst [vmem:[#allocation3] sm:$0x1] %v8044_v53  ;;  %v7446_v43 = vpack.c.bf16 %v2927_v11, %v2926_v55  ;;  %v2911_v23 = vld [vmem:[%s11841_s2 + $0x38] sm:$0xff] }
 0x178   : > { %v9630_v22 = vadd.f32 %v9355_v59, %v1068_v32  ;;  %6847 = vmatmul.mubr.f32.vlgmr.msra.gmra.mrb[120].mxu0 %v9633_v8  ;;  %v1070_v12 = vpop.f32.mrb[39].mxu0  ;;  %v9650_v59 = vld [vmem:[%s11841_s2 + $0xa0] sm:$0xff]  ;;  %580 = vst [vmem:[#allocation3 + $0x60] sm:$0x1] %v8044_v53  ;;  %581 = vst [vmem:[#allocation3 + $0x90] sm:$0x1] %v8044_v53 }
 0x179   : > { %v1478_v20 = vpop.f32.mrb[54].mxu1  ;;  %7533 = vmatpush3.bf16.msra.mxu0 %v8699_v44  ;;  %6849 = vmatprep.mubr.f32.mxu0 %v9446_v5  ;;  %v7442_v14 = vpack.c.bf16 %v9655_v10, %v9650_v59  ;;  %582 = vst [vmem:[#allocation3 + $0xc0] sm:$0x1] %v8044_v53  ;;  %583 = vst [vmem:[#allocation3 + $0xf0] sm:$0x1] %v8044_v53  ;;  %v7912_v32 = vld [vmem:[%s8192_s16 + $0x112] sm:$0xff] }
 0x17a   : > { %v1480_v21 = vpop.f32.mrb[55].mxu1  ;;  %6753 = vmatmul.mubr.f32.vlgmr.msra.gmra.mrb[160].mxu1 %v7910_v1  ;;  %7535 = vmatprep.subr.bf16.mxu0 %v9046_v56  ;;  %v9661_v29 = vadd.f32 %v1478_v20, %v9529_v7  ;;  %v9674_v7 = vld [vmem:[%s11841_s2 + $0x20] sm:$0xff]  ;;  %584 = vst [vmem:[#allocation3 + $0x120] sm:$0x1] %v8044_v53  ;;  %585 = vst [vmem:[#allocation3 + $0x150] sm:$0x1] %v8044_v53 }
 0x17b   : > { %7437 = vmatpush3.bf16.msra.mxu1 %v7436_v45  ;;  %v1073_v44 = vpop.f32.mrb[40].mxu0  ;;  %6755 = vmatprep.mubr.f32.mxu1 %v7911_v4  ;;  %586 = vst [vmem:[#allocation3 + $0x180] sm:$0x1] %v8044_v53  ;;  %587 = vst [vmem:[#allocation3 + $0x1b0] sm:$0x1] %v8044_v53  ;;  %v7913_v45 = vld [vmem:[%s8192_s16 + $0x122] sm:$0xff]  ;;  %v7444_v12 = vpack.c.bf16 %v9679_v60, %v9674_v7 }
 0x17c   : > { %v9667_v13 = vadd.f32 %v9381_v30, %v1073_v44  ;;  %7439 = vmatprep.subr.bf16.mxu1 %v7438_v9  ;;  %v1075_v37 = vpop.f32.mrb[41].mxu0  ;;  %6850 = vmatmul.mubr.f32.gmra.mrb[124].mxu0 %v9512_v62  ;;  %588 = vst [vmem:[#allocation3 + $0x1e0] sm:$0x1] %v8044_v53  ;;  %589 = vst [vmem:[#allocation3 + $0x210] sm:$0x1] %v8044_v53  ;;  %v2929_v59 = vld [vmem:[%s11841_s2 + $0xc8] sm:$0xff] }
 0x17d   : > { %590 = vst [vmem:[#allocation3 + $0x240] sm:$0x1] %v8044_v53  ;;  %591 = vst [vmem:[#allocation3 + $0x270] sm:$0x1] %v8044_v53  ;;  %v1483_v30 = vpop.f32.mrb[56].mxu1  ;;  %7537 = vmatpush3.bf16.msra.mxu0 %v9046_v56  ;;  %6884 = vmatprep.mubr.f32.mxu0 %v9516_v6  ;;  %v7914_v21 = vld [vmem:[%s8192_s16 + $0x12a] sm:$0xff] }
 0x17e   : > { %592 = vst [vmem:[#allocation3 + $0x2a0] sm:$0x1] %v8044_v53  ;;  %593 = vst [vmem:[#allocation3 + $0x2d0] sm:$0x1] %v8044_v53  ;;  %v1485_v16 = vpop.f32.mrb[57].mxu1  ;;  %6756 = vmatmul.mubr.f32.gmra.mrb[162].mxu1 %v7912_v32  ;;  %7539 = vmatprep.subr.bf16.mxu0 %v9059_v17  ;;  %v9693_v19 = vadd.f32 %v1483_v30, %v9548_v58  ;;  %v2910_v58 = vld [vmem:[%s11841_s2 + $0x30] sm:$0xff] }
 0x17f   : > { %594 = vst [vmem:[#allocation3 + $0x300] sm:$0x1] %v8044_v53  ;;  %595 = vst [vmem:[#allocation3 + $0x330] sm:$0x1] %v8044_v53  ;;  %7441 = vmatpush3.bf16.msra.mxu1 %v7440_v46  ;;  %v1078_v56 = vpop.f32.mrb[42].mxu0  ;;  %6758 = vmatprep.mubr.f32.mxu1 %v7913_v45  ;;  %v7448_v4 = vpack.c.bf16 %v2911_v23, %v2910_v58  ;;  %v2912_v7 = vld [vmem:[%s11841_s2 + $0x40] sm:$0xff] }
 0x180   : > { %596 = vst [vmem:[#allocation3 + $0x2f] sm:$0x1] %v8044_v53  ;;  %597 = vst [vmem:[#allocation3 + $0x5f] sm:$0x1] %v8044_v53  ;;  %v9699_v9 = vadd.f32 %v9375_v25, %v1078_v56  ;;  %7443 = vmatprep.subr.bf16.mxu1 %v7442_v14  ;;  %v1080_v6 = vpop.f32.mrb[43].mxu0  ;;  %v2928_v25 = vld [vmem:[%s11841_s2 + $0xc0] sm:$0xff] }
 0x181   : > { %598 = vst [vmem:[#allocation3 + $0x8f] sm:$0x1] %v8044_v53  ;;  %599 = vst [vmem:[#allocation3 + $0xbf] sm:$0x1] %v8044_v53  ;;  %v1488_v20 = vpop.f32.mrb[58].mxu1  ;;  %7541 = vmatpush3.bf16.msra.mxu0 %v9059_v17  ;;  %v7915_v17 = vld [vmem:[%s8192_s16 + $0x13a] sm:$0xff]  ;;  %v7450_v14 = vpack.c.bf16 %v2929_v59, %v2928_v25 }
 0x182   : > { %600 = vst [vmem:[#allocation3 + $0xef] sm:$0x1] %v8044_v53  ;;  %601 = vst [vmem:[#allocation3 + $0x11f] sm:$0x1] %v8044_v53  ;;  %v1490_v10 = vpop.f32.mrb[59].mxu1  ;;  %6759 = vmatmul.mubr.f32.gmra.mrb[164].mxu1 %v7914_v21  ;;  %7543 = vmatprep.subr.bf16.mxu0 %v9073_v33  ;;  %v9717_v1 = vadd.f32 %v1488_v20, %v9561_v26  ;;  %v2913_v26 = vld [vmem:[%s11841_s2 + $0x48] sm:$0xff] }
 0x183   : > { %602 = vst [vmem:[#allocation3 + $0x14f] sm:$0x1] %v8044_v53  ;;  %603 = vst [vmem:[#allocation3 + $0x17f] sm:$0x1] %v8044_v53  ;;  %7445 = vmatpush3.bf16.msra.mxu1 %v7444_v12  ;;  %v1083_v44 = vpop.f32.mrb[44].mxu0  ;;  %6761 = vmatprep.mubr.f32.mxu1 %v7915_v17  ;;  %v7916_v55 = vld [vmem:[%s8192_s16 + $0x142] sm:$0xff]  ;;  %v7452_v56 = vpack.c.bf16 %v2913_v26, %v2912_v7 }
 0x184   : > { %604 = vst [vmem:[#allocation3 + $0x1af] sm:$0x1] %v8044_v53  ;;  %605 = vst [vmem:[#allocation3 + $0x1df] sm:$0x1] %v8044_v53  ;;  %v9721_v46 = vadd.f32 %v9404_v35, %v1083_v44  ;;  %7447 = vmatprep.subr.bf16.mxu1 %v7446_v43  ;;  %v1085_v37 = vpop.f32.mrb[45].mxu0  ;;  %v2930_v35 = vld [vmem:[%s11841_s2 + $0xd0] sm:$0xff] }
 0x185   : > { %606 = vst [vmem:[#allocation3 + $0x20f] sm:$0x1] %v8044_v53  ;;  %607 = vst [vmem:[#allocation3 + $0x23f] sm:$0x1] %v8044_v53  ;;  %v1493_v60 = vpop.f32.mrb[60].mxu1  ;;  %7545 = vmatpush3.bf16.msra.mxu0 %v9073_v33  ;;  %v11986_v11 = vld [vmem:[#allocation45_spill] sm:$0xff] }
 0x186   : > { %608 = vst [vmem:[#allocation3 + $0x26f] sm:$0x1] %v8044_v53  ;;  %609 = vst [vmem:[#allocation3 + $0x29f] sm:$0x1] %v8044_v53  ;;  %v1495_v30 = vpop.f32.mrb[61].mxu1  ;;  %6762 = vmatmul.mubr.f32.gmra.mrb[166].mxu1 %v7916_v55  ;;  %7547 = vmatprep.subr.bf16.mxu0 %v11986_v11  ;;  %v9739_v16 = vadd.f32 %v1493_v60, %v9569_v52  ;;  %v7917_v33 = vld [vmem:[%s8192_s16 + $0x152] sm:$0xff] }
 0x187   : > { %610 = vst [vmem:[#allocation3 + $0x2cf] sm:$0x1] %v8044_v53  ;;  %611 = vst [vmem:[#allocation3 + $0x2ff] sm:$0x1] %v8044_v53  ;;  %7449 = vmatpush3.bf16.msra.mxu1 %v7448_v4  ;;  %v1088_v32 = vpop.f32.mrb[46].mxu0  ;;  %6764 = vmatprep.mubr.f32.mxu1 %v7917_v33  ;;  %v11987_v45 = vld [vmem:[#allocation8_spill] sm:$0xff] }
 0x188   : > { %612 = vst [vmem:[#allocation3 + $0x32f] sm:$0x1] %v8044_v53  ;;  %613 = vst [vmem:[#allocation3 + $0x35f] sm:$0x1] %v8044_v53  ;;  %v9743_v12 = vadd.f32 %v11987_v45, %v1088_v32  ;;  %7451 = vmatprep.subr.bf16.mxu1 %v7450_v14  ;;  %v1090_v6 = vpop.f32.mrb[47].mxu0  ;;  %v2914_v58 = vld [vmem:[%s11841_s2 + $0x50] sm:$0xff] }
 0x189   : > { %2747 = vst [vmem:[#allocation3 + $0x8] sm:$0xff] %v8044_v53  ;;  %v2931_v53 = vld [vmem:[%s11841_s2 + $0xd8] sm:$0xff]  ;;  %v1498_v23 = vpop.f32.mrb[62].mxu1  ;;  %7549 = vmatpush3.bf16.msra.mxu0 %v11986_v11  ;;  %v2932_v20 = vld [vmem:[%s11841_s2 + $0xe0] sm:$0xff]  ;;  %v2933_v25 = vld [vmem:[%s11841_s2 + $0xe8] sm:$0xff] }
 0x18a   : > { %v7454_v43 = vpack.c.bf16 %v2931_v53, %v2930_v35  ;;  %v2915_v52 = vld [vmem:[%s11841_s2 + $0x58] sm:$0xff]  ;;  %v1500_v59 = vpop.f32.mrb[63].mxu1  ;;  %v9761_v44 = vadd.f32 %v1498_v23, %v9578_v42  ;;  %v7919_v4 = vld [vmem:[%s8192_s16 + $0x16a] sm:$0xff]  ;;  %v7458_v60 = vpack.c.bf16 %v2933_v25, %v2932_v20  ;;  %v2916_v35 = vld [vmem:[%s11841_s2 + $0x60] sm:$0xff] }
 0x18b   : > { %v7918_v10 = vld [vmem:[%s8192_s16 + $0x15a] sm:$0xff]  ;;  %7453 = vmatpush3.bf16.msra.mxu1 %v7452_v56  ;;  %v1093_v17 = vpop.f32.mrb[48].mxu0  ;;  %v7456_v37 = vpack.c.bf16 %v2915_v52, %v2914_v58  ;;  %v2917_v42 = vld [vmem:[%s11841_s2 + $0x68] sm:$0xff]  ;;  %v2934_v30 = vld [vmem:[%s11841_s2 + $0xf0] sm:$0xff] }
 0x18c   : > { %6765 = vmatmul.mubr.f32.gmra.mrb[168].mxu1 %v7918_v10  ;;  %v11988_v21 = vld [vmem:[#allocation46_spill] sm:$0xff]  ;;  %7455 = vmatprep.subr.bf16.mxu1 %v7454_v43  ;;  %v1095_v26 = vpop.f32.mrb[49].mxu0  ;;  %v11990_v56 = vld [vmem:[#allocation47_spill] sm:$0xff]  ;;  %v7460_v6 = vpack.c.bf16 %v2917_v42, %v2916_v35  ;;  %v5984_v58 = vld [vmem:[%s11843_s4 + $0x288] sm:$0xff] }
 0x18d   : > { %7551 = vmatprep.subr.bf16.mxu0 %v11988_v21  ;;  %6767 = vmatprep.mubr.f32.mxu1 %v7919_v4  ;;  %v11989_v14 = vld [vmem:[#allocation10_spill] sm:$0xff]  ;;  %v1503_v53 = vpop.f32.mrb[64].mxu1  ;;  %v5983_v43 = vld [vmem:[%s11843_s4 + $0x280] sm:$0xff]  ;;  %v2918_v25 = vld [vmem:[%s11841_s2 + $0x70] sm:$0xff] }
 0x18e   : > { %v9765_v7 = vadd.f32 %v11989_v14, %v1093_v17  ;;  %7553 = vmatpush3.bf16.msra.mxu0 %v11988_v21  ;;  %v2935_v55 = vld [vmem:[%s11841_s2 + $0xf8] sm:$0xff]  ;;  %v9781_v11 = vadd.f32 %v1503_v53, %v9588_v40  ;;  %v1505_v32 = vpop.f32.mrb[65].mxu1  ;;  %v11991_v40 = vld [vmem:[#allocation16_spill] sm:$0xff]  ;;  %v5919_v10 = vld [vmem:[%s11841_s2 + $0x380] sm:$0xff]  ;;  %v7610_v14 = vpack.c.bf16 %v5984_v58, %v5983_v43 }
 0x18f   : > { %v7920_v33 = vld [vmem:[%s8192_s16 + $0x172] sm:$0xff]  ;;  %7555 = vmatprep.subr.bf16.mxu0 %v11990_v56  ;;  %7457 = vmatpush3.bf16.msra.mxu1 %v7456_v37  ;;  %v1098_v45 = vpop.f32.mrb[50].mxu0  ;;  %v7462_v20 = vpack.c.bf16 %v2935_v55, %v2934_v30  ;;  %v5920_v21 = vld [vmem:[%s11841_s2 + $0x388] sm:$0xff] }
 0x190   : > { %6768 = vmatmul.mubr.f32.gmra.mrb[170].mxu1 %v7920_v33  ;;  %v9793_v52 = vadd.f32 %v11991_v40, %v1098_v45  ;;  %7459 = vmatprep.subr.bf16.mxu1 %v7458_v60  ;;  %v1100_v23 = vpop.f32.mrb[51].mxu0  ;;  %v11992_v37 = vld [vmem:[#allocation48_spill] sm:$0xff]  ;;  %v5985_v35 = vld [vmem:[%s11843_s4 + $0x290] sm:$0xff]  ;;  %v7498_v53 = vpack.c.bf16 %v5920_v21, %v5919_v10  ;;  %v5922_v32 = vld [vmem:[%s11841_s2 + $0x398] sm:$0xff] }
 0x191   : > { %6770 = vmatprep.mubr.f32.mxu1 %v9552_v2  ;;  %v2919_v2 = vld [vmem:[%s11841_s2 + $0x78] sm:$0xff]  ;;  %v1508_v59 = vpop.f32.mrb[66].mxu1  ;;  %v5904_v30 = vld [vmem:[%s11841_s2 + $0x308] sm:$0xff]  ;;  %v5987_v23 = vld [vmem:[%s11843_s4 + $0x2a0] sm:$0xff] }
 0x192   : > { %7557 = vmatpush3.bf16.msra.mxu0 %v11990_v56  ;;  %v9809_v17 = vadd.f32 %v1508_v59, %v9598_v28  ;;  %v1510_v4 = vpop.f32.mrb[67].mxu1  ;;  %v7464_v60 = vpack.c.bf16 %v2919_v2, %v2918_v25  ;;  %v5986_v28 = vld [vmem:[%s11843_s4 + $0x298] sm:$0xff]  ;;  %v7921_v58 = vld [vmem:[%s8642_s11 + $0x1] sm:$0xff]  ;;  %v5905_v2 = vld [vmem:[%s11841_s2 + $0x310] sm:$0xff] }
 0x193   : > { %7559 = vmatprep.subr.bf16.mxu0 %v11992_v37  ;;  %7461 = vmatpush3.bf16.msra.mxu1 %v7460_v6  ;;  %v1103_v26 = vpop.f32.mrb[52].mxu0  ;;  %v7614_v45 = vpack.c.bf16 %v5986_v28, %v5985_v35  ;;  %v568_v6 = vld [vmem:[%s8642_s11 + $0x4a] sm:$0xff]  ;;  %v5906_v59 = vld [vmem:[%s11841_s2 + $0x318] sm:$0xff] }
 0x194   : > { %6771 = vmatmul.mubr.f32.gmra.mrb[172].mxu1 %v9633_v8  ;;  %v9821_v42 = vadd.f32 %v9442_v34, %v1103_v26  ;;  %7463 = vmatprep.subr.bf16.mxu1 %v7462_v20  ;;  %v1105_v8 = vpop.f32.mrb[53].mxu0  ;;  %v5921_v34 = vld [vmem:[%s11841_s2 + $0x390] sm:$0xff]  ;;  %v7922_v26 = vld [vmem:[%s8642_s11] sm:$0xff] }
 0x195   : > { %6773 = vmatprep.mubr.f32.mxu1 %v9446_v5  ;;  %v5903_v5 = vld [vmem:[%s11841_s2 + $0x300] sm:$0xff]  ;;  %v1513_v55 = vpop.f32.mrb[68].mxu1  ;;  %v7502_v25 = vpack.c.bf16 %v5922_v32, %v5921_v34  ;;  %v569_v21 = vld [vmem:[%s8642_s11 + $0x52] sm:$0xff]  ;;  %v7923_v28 = vld [vmem:[%s8642_s11 + $0x9] sm:$0xff]  ;;  %v7504_v8 = vpack.c.bf16 %v5906_v59, %v5905_v2 }
 0x196   : > { %7561 = vmatpush3.bf16.msra.mxu0 %v11992_v37  ;;  %v9837_v33 = vadd.f32 %v1513_v55, %v9608_v54  ;;  %v1515_v56 = vpop.f32.mrb[69].mxu1  ;;  %v7500_v40 = vpack.c.bf16 %v5904_v30, %v5903_v5  ;;  %v5988_v54 = vld [vmem:[%s11843_s4 + $0x2a8] sm:$0xff]  ;;  %v5907_v55 = vld [vmem:[%s11841_s2 + $0x320] sm:$0xff]  ;;  %v5909_v59 = vld [vmem:[%s11841_s2 + $0x330] sm:$0xff] }
 0x197   : > { %7611 = vmatprep.subr.bf16.mxu0 %v7610_v14  ;;  %7465 = vmatpush3.bf16.msra.mxu1 %v7464_v60  ;;  %v1108_v43 = vpop.f32.mrb[54].mxu0  ;;  %v7618_v60 = vpack.c.bf16 %v5988_v54, %v5987_v23  ;;  %v5908_v34 = vld [vmem:[%s11841_s2 + $0x328] sm:$0xff]  ;;  %v5925_v56 = vld [vmem:[%s11841_s2 + $0x3b0] sm:$0xff] }
 0x198   : > { %6774 = vmatmul.mubr.f32.gmra.mrb[174].mxu1 %v9512_v62  ;;  %v9849_v62 = vadd.f32 %v9439_v39, %v1108_v43  ;;  %7499 = vmatprep.subr.bf16.mxu1 %v7498_v53  ;;  %v1110_v20 = vpop.f32.mrb[55].mxu0  ;;  %v5923_v39 = vld [vmem:[%s11841_s2 + $0x3a0] sm:$0xff]  ;;  %v7508_v54 = vpack.c.bf16 %v5908_v34, %v5907_v55 }
 0x199   : > { %3247 = vmatprep.mubr.f32.mxu1 %v7921_v58  ;;  %6885 = vmatmul.mubr.f32.vlgmr.msra.gmra.mrb[120].mxu0 %v9534_v50  ;;  %v1518_v10 = vpop.f32.mrb[70].mxu1  ;;  %v5924_v50 = vld [vmem:[%s11841_s2 + $0x3a8] sm:$0xff]  ;;  %v5991_v20 = vld [vmem:[%s11843_s4 + $0x2c0] sm:$0xff] }
 0x19a   : > { %7613 = vmatpush3.bf16.msra.mxu0 %v7610_v14  ;;  %6887 = vmatprep.mubr.f32.mxu0 %v568_v6  ;;  %v9866_v4 = vadd.f32 %v1518_v10, %v9630_v22  ;;  %v1520_v37 = vpop.f32.mrb[71].mxu1  ;;  %v5989_v14 = vld [vmem:[%s11843_s4 + $0x2b0] sm:$0xff]  ;;  %v5990_v22 = vld [vmem:[%s11843_s4 + $0x2b8] sm:$0xff]  ;;  %v7506_v30 = vpack.c.bf16 %v5924_v50, %v5923_v39  ;;  %v7924_v58 = vld [vmem:[%s8642_s11 + $0x8] sm:$0xff] }
 0x19b   : > { %7615 = vmatprep.subr.bf16.mxu0 %v7614_v45  ;;  %v1113_v35 = vpop.f32.mrb[56].mxu0  ;;  %v5927_v39 = vld [vmem:[%s11841_s2 + $0x3c0] sm:$0xff] }
 0x19c   : > { %3248 = vmatmul.mubr.f32.vlgmr.msra.gmra.mrb[176].mxu1 %v7922_v26  ;;  %v9877_v53 = vadd.f32 %v9461_v51, %v1113_v35  ;;  %v1115_v5 = vpop.f32.mrb[57].mxu0  ;;  %v5926_v51 = vld [vmem:[%s11841_s2 + $0x3b8] sm:$0xff] }
 0x19d   : > { %7501 = vmatpush3.bf16.msra.mxu1 %v7500_v40  ;;  %3252 = vmatprep.mubr.f32.mxu1 %v7923_v28  ;;  %v1523_v32 = vpop.f32.mrb[72].mxu1  ;;  %v7622_v40 = vpack.c.bf16 %v5990_v22, %v5989_v14  ;;  %v7510_v2 = vpack.c.bf16 %v5926_v51, %v5925_v56  ;;  %v5993_v28 = vld [vmem:[%s11843_s4 + $0x2d0] sm:$0xff]  ;;  %v5911_v14 = vld [vmem:[%s11841_s2 + $0x340] sm:$0xff] }
 0x19e   : > { %7503 = vmatprep.subr.bf16.mxu1 %v7502_v25  ;;  %6888 = vmatmul.mubr.f32.gmra.mrb[126].mxu0 %v569_v21  ;;  %v9892_v6 = vadd.f32 %v1523_v32, %v9667_v13  ;;  %v1525_v43 = vpop.f32.mrb[73].mxu1  ;;  %v5929_v5 = vld [vmem:[%s11841_s2 + $0x3d0] sm:$0xff]  ;;  %v11993_v51 = vld [vmem:[#allocation15_spill] sm:$0xff] }
 0x19f   : > { %7617 = vmatpush3.bf16.msra.mxu0 %v7614_v45  ;;  %v1118_v23 = vpop.f32.mrb[58].mxu0  ;;  %v5992_v45 = vld [vmem:[%s11843_s4 + $0x2c8] sm:$0xff]  ;;  %v5995_v43 = vld [vmem:[%s11843_s4 + $0x2e0] sm:$0xff] }
 0x1a0   : > { %3253 = vmatmul.mubr.f32.gmra.mrb[178].mxu1 %v7924_v58  ;;  %7619 = vmatprep.subr.bf16.mxu0 %v7618_v60  ;;  %v9903_v13 = vadd.f32 %v9458_v18, %v1118_v23  ;;  %v1120_v25 = vpop.f32.mrb[59].mxu0  ;;  %v5928_v18 = vld [vmem:[%s11841_s2 + $0x3c8] sm:$0xff]  ;;  %v7626_v37 = vpack.c.bf16 %v5992_v45, %v5991_v20  ;;  %v5913_v23 = vld [vmem:[%s11841_s2 + $0x350] sm:$0xff]  ;;  %v5931_v45 = vld [vmem:[%s11841_s2 + $0x3e0] sm:$0xff] }
 0x1a1   : > { %7505 = vmatpush3.bf16.msra.mxu1 %v7504_v8  ;;  %3257 = vmatprep.mubr.f32.mxu1 %v9362_v24  ;;  %v5910_v24 = vld [vmem:[%s11841_s2 + $0x338] sm:$0xff]  ;;  %v1528_v10 = vpop.f32.mrb[74].mxu1  ;;  %v7514_v8 = vpack.c.bf16 %v5928_v18, %v5927_v39  ;;  %v5996_v58 = vld [vmem:[%s11843_s4 + $0x2e8] sm:$0xff]  ;;  %v5997_v39 = vld [vmem:[%s11843_s4 + $0x2f0] sm:$0xff] }
 0x1a2   : > { %7507 = vmatprep.subr.bf16.mxu1 %v7506_v30  ;;  %v9918_v50 = vadd.f32 %v1528_v10, %v9699_v9  ;;  %v1530_v21 = vpop.f32.mrb[75].mxu1  ;;  %v7512_v35 = vpack.c.bf16 %v5910_v24, %v5909_v59  ;;  %v7634_v59 = vpack.c.bf16 %v5996_v58, %v5995_v43  ;;  %v5998_v18 = vld [vmem:[%s11843_s4 + $0x2f8] sm:$0xff] }
 0x1a3   : > { %7621 = vmatpush3.bf16.msra.mxu0 %v7618_v60  ;;  %v1123_v26 = vpop.f32.mrb[60].mxu0  ;;  %v5994_v60 = vld [vmem:[%s11843_s4 + $0x2d8] sm:$0xff] }
 0x1a4   : > { %3258 = vmatmul.mubr.f32.gmra.mrb[180].mxu1 %v9379_v63  ;;  %7623 = vmatprep.subr.bf16.mxu0 %v7622_v40  ;;  %v9929_v9 = vadd.f32 %v9476_v31, %v1123_v26  ;;  %v1125_v63 = vpop.f32.mrb[61].mxu0  ;;  %v5930_v31 = vld [vmem:[%s11841_s2 + $0x3d8] sm:$0xff]  ;;  %v7630_v34 = vpack.c.bf16 %v5994_v60, %v5993_v28  ;;  %v5916_v26 = vld [vmem:[%s11841_s2 + $0x368] sm:$0xff]  ;;  %v5933_v28 = vld [vmem:[%s11841_s2 + $0x3f0] sm:$0xff] }
 0x1a5   : > { %7509 = vmatpush3.bf16.msra.mxu1 %v7508_v54  ;;  %3262 = vmatprep.mubr.f32.mxu1 %v9385_v61  ;;  %v5912_v61 = vld [vmem:[%s11841_s2 + $0x348] sm:$0xff]  ;;  %v1533_v22 = vpop.f32.mrb[76].mxu1  ;;  %v5914_v54 = vld [vmem:[%s11841_s2 + $0x358] sm:$0xff] }
 0x1a6   : > { %7511 = vmatprep.subr.bf16.mxu1 %v7510_v2  ;;  %v9944_v30 = vadd.f32 %v1533_v22, %v9721_v46  ;;  %v1535_v55 = vpop.f32.mrb[77].mxu1  ;;  %v7516_v56 = vpack.c.bf16 %v5912_v61, %v5911_v14  ;;  %v7520_v10 = vpack.c.bf16 %v5914_v54, %v5913_v23  ;;  %v5934_v60 = vld [vmem:[%s11841_s2 + $0x3f8] sm:$0xff]  ;;  %v7638_v14 = vpack.c.bf16 %v5998_v18, %v5997_v39  ;;  %v5951_v23 = vld [vmem:[%s11843_s4 + $0x180] sm:$0xff] }
 0x1a7   : > { %7625 = vmatpush3.bf16.msra.mxu0 %v7622_v40  ;;  %v1128_v32 = vpop.f32.mrb[62].mxu0  ;;  %v7518_v40 = vpack.c.bf16 %v5930_v31, %v5929_v5  ;;  %v7526_v55 = vpack.c.bf16 %v5934_v60, %v5933_v28  ;;  %v488_v60 = vld [vmem:[%s8642_s11 + $0x49] sm:$0xff] }
 0x1a8   : > { %3263 = vmatmul.mubr.f32.gmra.mrb[182].mxu1 %v9402_v49  ;;  %7627 = vmatprep.subr.bf16.mxu0 %v7626_v37  ;;  %v9955_v46 = vadd.f32 %v9474_v27, %v1128_v32  ;;  %v1130_v49 = vpop.f32.mrb[63].mxu0  ;;  %v5932_v27 = vld [vmem:[%s11841_s2 + $0x3e8] sm:$0xff]  ;;  %v5917_v32 = vld [vmem:[%s11841_s2 + $0x370] sm:$0xff] }
 0x1a9   : > { %7513 = vmatpush3.bf16.msra.mxu1 %v7512_v35  ;;  %3478 = vmatprep.mubr.f32.mxu1 %v11993_v51  ;;  %v1538_v20 = vpop.f32.mrb[78].mxu1 }
 0x1aa   : > { %7515 = vmatprep.subr.bf16.mxu1 %v7514_v8  ;;  %v9970_v25 = vadd.f32 %v1538_v20, %v9743_v12  ;;  %v1540_v2 = vpop.f32.mrb[79].mxu1  ;;  %v5915_v12 = vld [vmem:[%s11841_s2 + $0x360] sm:$0xff] }
 0x1ab   : > { %7629 = vmatpush3.bf16.msra.mxu0 %v7626_v37  ;;  %v6650_v24 = vpop.f32.mrb[64].mxu0  ;;  %v7522_v37 = vpack.c.bf16 %v5932_v27, %v5931_v45  ;;  %v7524_v22 = vpack.c.bf16 %v5916_v26, %v5915_v12  ;;  %v11994_v45 = vmov 0.0|0.0   ;;  %v7926_v12 = vld [vmem:[%s8642_s11 + $0x39] sm:$0xff] }
 0x1ac   : > { %7631 = vmatprep.subr.bf16.mxu0 %v7630_v34  ;;  %v1648_v21 = vpop.f32.mrb[65].mxu0 }
 0x1ad   : > { %7517 = vmatpush3.bf16.msra.mxu1 %v7516_v56  ;;  %v1543_v35 = vpop.f32.mrb[80].mxu1 }
 0x1ae   : > { %7519 = vmatprep.subr.bf16.mxu1 %v7518_v40  ;;  %v9991_v63 = vadd.f32 %v1543_v35, %v9765_v7  ;;  %v1545_v8 = vpop.f32.mrb[81].mxu1  ;;  %v5918_v7 = vld [vmem:[%s11841_s2 + $0x378] sm:$0xff] }
 0x1af   : > { %7633 = vmatpush3.bf16.msra.mxu0 %v7630_v34  ;;  %v6653_v61 = vpop.f32.mrb[66].mxu0  ;;  %v7528_v58 = vpack.c.bf16 %v5918_v7, %v5917_v32  ;;  %v407_v32 = vld [vmem:[%s8642_s11 + $0x48] sm:$0xff] }
 0x1b0   : > { %7635 = vmatprep.subr.bf16.mxu0 %v7634_v59  ;;  %v9994_v5 = vadd.f32 %v6653_v61, %v9538_v36  ;;  %v1658_v31 = vpop.f32.mrb[67].mxu0  ;;  %v7927_v61 = vld [vmem:[%s8642_s11 + $0x38] sm:$0xff] }
 0x1b1   : > { %7521 = vmatpush3.bf16.msra.mxu1 %v7520_v10  ;;  %v1548_v34 = vpop.f32.mrb[82].mxu1  ;;  %v10003_v56 = vadd.f32 %v1658_v31, %v9519_v0  ;;  %v5952_v0 = vld [vmem:[%s11843_s4 + $0x188] sm:$0xff] }
 0x1b2   : > { %7523 = vmatprep.subr.bf16.mxu1 %v7522_v37  ;;  %v10006_v51 = vadd.f32 %v1548_v34, %v9793_v52  ;;  %v1550_v36 = vpop.f32.mrb[83].mxu1  ;;  %v7563_v2 = vpack.c.bf16 %v5952_v0, %v5951_v23 }
 0x1b3   : > { %7637 = vmatpush3.bf16.msra.mxu0 %v7634_v59  ;;  %v6656_v43 = vpop.f32.mrb[68].mxu0  ;;  %v489_v36 = vld [vmem:[%s8642_s11 + $0x51] sm:$0xff] }
 0x1b4   : > { %7639 = vmatprep.subr.bf16.mxu0 %v7638_v14  ;;  %v10009_v49 = vadd.f32 %v6656_v43, %v9565_v3  ;;  %v1668_v40 = vpop.f32.mrb[69].mxu0 }
 0x1b5   : > { %7525 = vmatpush3.bf16.msra.mxu1 %v7524_v22  ;;  %v1553_v52 = vpop.f32.mrb[84].mxu1  ;;  %v10018_v54 = vadd.f32 %v1668_v40, %v9557_v47  ;;  %v5953_v47 = vld [vmem:[%s11843_s4 + $0x190] sm:$0xff] }
 0x1b6   : > { %7527 = vmatprep.subr.bf16.mxu1 %v7526_v55  ;;  %v10021_v20 = vadd.f32 %v1553_v52, %v9821_v42  ;;  %v1555_v3 = vpop.f32.mrb[85].mxu1  ;;  %v5954_v42 = vld [vmem:[%s11843_s4 + $0x198] sm:$0xff]  ;;  %v408_v52 = vld [vmem:[%s8642_s11 + $0x50] sm:$0xff] }
 0x1b7   : > { %7641 = vmatpush3.bf16.msra.mxu0 %v7638_v14  ;;  %v6659_v27 = vpop.f32.mrb[70].mxu0  ;;  %v7566_v26 = vpack.c.bf16 %v5954_v42, %v5953_v47 }
 0x1b8   : > { %7642 = vmatprep.subr.bf16.mxu0 %v11994_v45  ;;  %v10025_v59 = vadd.f32 %v6659_v27, %v9584_v41  ;;  %v1678_v24 = vpop.f32.mrb[71].mxu0  ;;  %v7925_v41 = vld [vmem:[%s8642_s11 + $0x30] sm:$0xff] }
 0x1b9   : > { %7529 = vmatpush3.bf16.msra.mxu1 %v7528_v58  ;;  %v1558_v10 = vpop.f32.mrb[86].mxu1  ;;  %v10035_v39 = vadd.f32 %v1678_v24, %v9574_v15  ;;  %v5955_v15 = vld [vmem:[%s11843_s4 + $0x1a0] sm:$0xff] }
 0x1ba   : > { %7562 = vmatprep.subr.bf16.mxu1 %v11994_v45  ;;  %v10038_v18 = vadd.f32 %v1558_v10, %v9849_v62  ;;  %v1560_v21 = vpop.f32.mrb[87].mxu1  ;;  %v5956_v62 = vld [vmem:[%s11843_s4 + $0x1a8] sm:$0xff] }
 0x1bb   : > { %v6662_v37 = vpop.f32.mrb[72].mxu0  ;;  %v7569_v55 = vpack.c.bf16 %v5956_v62, %v5955_v15 }
 0x1bc   : > { %3479 = vmatmul.mubr.f32.vlgmr.msra.gmra.mrb[184].mxu1 %v7925_v41  ;;  %v10043_v35 = vadd.f32 %v6662_v37, %v9604_v48  ;;  %v1688_v28 = vpop.f32.mrb[73].mxu0  ;;  %v5961_v37 = vld [vmem:[%s11843_s4 + $0x1d0] sm:$0xff] }
 0x1bd   : > { %3483 = vmatprep.mubr.f32.mxu1 %v7926_v12  ;;  %7564 = vmatpush1.bf16.msra.mxu1 %v7563_v2  ;;  %v1563_v8 = vpop.f32.mrb[88].mxu1  ;;  %v10054_v14 = vadd.f32 %v1688_v28, %v9594_v57  ;;  %v5957_v57 = vld [vmem:[%s11843_s4 + $0x1b0] sm:$0xff] }
 0x1be   : > { %7565 = vmatprep.subr.bf16.mxu1 %v11994_v45  ;;  %v10057_v48 = vadd.f32 %v1563_v8, %v9877_v53  ;;  %v1565_v22 = vpop.f32.mrb[89].mxu1  ;;  %v5958_v53 = vld [vmem:[%s11843_s4 + $0x1b8] sm:$0xff]  ;;  %v5963_v8 = vld [vmem:[%s11843_s4 + $0x1e0] sm:$0xff] }
 0x1bf   : > { %v6665_v31 = vpop.f32.mrb[74].mxu0  ;;  %v7572_v0 = vpack.c.bf16 %v5958_v53, %v5957_v57 }
 0x1c0   : > { %3484 = vmatmul.mubr.f32.gmra.mrb[186].mxu1 %v7927_v61  ;;  %v10062_v7 = vadd.f32 %v6665_v31, %v9661_v29  ;;  %v1698_v34 = vpop.f32.mrb[75].mxu0 }
 0x1c1   : > { %7567 = vmatpush1.bf16.msra.mxu1 %v7566_v26  ;;  %3488 = vmatprep.mubr.f32.mxu1 %v488_v60  ;;  %v1568_v43 = vpop.f32.mrb[90].mxu1  ;;  %v10073_v58 = vadd.f32 %v1698_v34, %v9626_v38  ;;  %v5959_v38 = vld [vmem:[%s11843_s4 + $0x1c0] sm:$0xff]  ;;  %v5965_v34 = vld [vmem:[%s11843_s4 + $0x1f0] sm:$0xff] }
 0x1c2   : > { %7568 = vmatprep.subr.bf16.mxu1 %v11994_v45  ;;  %v10076_v40 = vadd.f32 %v1568_v43, %v9903_v13  ;;  %v1570_v29 = vpop.f32.mrb[91].mxu1  ;;  %v5960_v13 = vld [vmem:[%s11843_s4 + $0x1c8] sm:$0xff] }
 0x1c3   : > { %v6668_v23 = vpop.f32.mrb[76].mxu0  ;;  %v7575_v10 = vpack.c.bf16 %v5960_v13, %v5959_v38 }
 0x1c4   : > { %3489 = vmatmul.mubr.f32.gmra.mrb[188].mxu1 %v407_v32  ;;  %v10080_v3 = vadd.f32 %v6668_v23, %v9717_v1  ;;  %v1708_v27 = vpop.f32.mrb[77].mxu0 }
 0x1c5   : > { %7570 = vmatpush1.bf16.msra.mxu1 %v7569_v55  ;;  %3493 = vmatprep.mubr.f32.mxu1 %v489_v36  ;;  %v1573_v2 = vpop.f32.mrb[92].mxu1  ;;  %v10090_v24 = vadd.f32 %v1708_v27, %v9693_v19  ;;  %v5962_v19 = vld [vmem:[%s11843_s4 + $0x1d8] sm:$0xff] }
 0x1c6   : > { %7571 = vmatprep.subr.bf16.mxu1 %v11994_v45  ;;  %v10093_v47 = vadd.f32 %v1573_v2, %v9929_v9  ;;  %v1575_v1 = vpop.f32.mrb[93].mxu1  ;;  %v7578_v15 = vpack.c.bf16 %v5962_v19, %v5961_v37 }
 0x1c7   : > { %v6671_v42 = vpop.f32.mrb[78].mxu0 }
 0x1c8   : > { %3494 = vmatmul.mubr.f32.gmra.mrb[190].mxu1 %v408_v52  ;;  %v10096_v41 = vadd.f32 %v6671_v42, %v9761_v44  ;;  %v1718_v21 = vpop.f32.mrb[79].mxu0  ;;  %v5969_v42 = vld [vmem:[%s11843_s4 + $0x210] sm:$0xff] }
 0x1c9   : > { %7573 = vmatpush1.bf16.msra.mxu1 %v7572_v0  ;;  %v1578_v9 = vpop.f32.mrb[94].mxu1  ;;  %v10106_v12 = vadd.f32 %v1718_v21, %v9739_v16  ;;  %v5964_v16 = vld [vmem:[%s11843_s4 + $0x1e8] sm:$0xff]  ;;  %v5967_v0 = vld [vmem:[%s11843_s4 + $0x200] sm:$0xff] }
 0x1ca   : > { %7574 = vmatprep.subr.bf16.mxu1 %v11994_v45  ;;  %v10109_v26 = vadd.f32 %v1578_v9, %v9955_v46  ;;  %v1580_v44 = vpop.f32.mrb[95].mxu1 }
 0x1cb   : > { %v6674_v28 = vpop.f32.mrb[80].mxu0 }
 0x1cc   : > { %v10112_v62 = vadd.f32 %v6674_v28, %v9809_v17  ;;  %v1728_v60 = vpop.f32.mrb[81].mxu0  ;;  %v7581_v17 = vpack.c.bf16 %v5964_v16, %v5963_v8  ;;  %v5971_v28 = vld [vmem:[%s11843_s4 + $0x220] sm:$0xff] }
 0x1cd   : > { %7576 = vmatpush1.bf16.msra.mxu1 %v7575_v10  ;;  %v10122_v46 = vadd.f32 %v1728_v60, %v9781_v11  ;;  %v2019_v61 = vpop.f32.mrb[96].mxu1  ;;  %v5966_v11 = vld [vmem:[%s11843_s4 + $0x1f8] sm:$0xff] }
 0x1ce   : > { %7577 = vmatprep.subr.bf16.mxu1 %v11994_v45  ;;  %v2021_v22 = vpop.f32.mrb[97].mxu1 }
 0x1cf   : > { %v6677_v31 = vpop.f32.mrb[82].mxu0 }
 0x1d0   : > { %v10125_v55 = vadd.f32 %v6677_v31, %v9866_v4  ;;  %v1738_v32 = vpop.f32.mrb[83].mxu0  ;;  %v7584_v4 = vpack.c.bf16 %v5966_v11, %v5965_v34  ;;  %v5973_v31 = vld [vmem:[%s11843_s4 + $0x230] sm:$0xff] }
 0x1d1   : > { %7579 = vmatpush1.bf16.msra.mxu1 %v7578_v15  ;;  %v10135_v57 = vadd.f32 %v1738_v32, %v9837_v33  ;;  %v2024_v53 = vpop.f32.mrb[98].mxu1  ;;  %v5968_v33 = vld [vmem:[%s11843_s4 + $0x208] sm:$0xff] }
 0x1d2   : > { %7580 = vmatprep.subr.bf16.mxu1 %v11994_v45  ;;  %v2026_v36 = vpop.f32.mrb[99].mxu1 }
 0x1d3   : > { %v6680_v43 = vpop.f32.mrb[84].mxu0 }
 0x1d4   : > { %v10138_v29 = vadd.f32 %v6680_v43, %v9918_v50  ;;  %v1748_v23 = vpop.f32.mrb[85].mxu0  ;;  %v7587_v50 = vpack.c.bf16 %v5968_v33, %v5967_v0  ;;  %v5975_v43 = vld [vmem:[%s11843_s4 + $0x240] sm:$0xff] }
 0x1d5   : > { %7582 = vmatpush1.bf16.msra.mxu1 %v7581_v17  ;;  %v10148_v52 = vadd.f32 %v1748_v23, %v9892_v6  ;;  %v10150_v27 = vpop.f32.mrb[100].mxu1  ;;  %v5970_v6 = vld [vmem:[%s11843_s4 + $0x218] sm:$0xff] }
 0x1d6   : > { %7583 = vmatprep.subr.bf16.mxu1 %v11994_v45  ;;  %v2031_v38 = vpop.f32.mrb[101].mxu1 }
 0x1d7   : > { %v6683_v13 = vpop.f32.mrb[86].mxu0 }
 0x1d8   : > { %v10153_v2 = vadd.f32 %v6683_v13, %v9970_v25  ;;  %v1758_v1 = vpop.f32.mrb[87].mxu0  ;;  %v7590_v25 = vpack.c.bf16 %v5970_v6, %v5969_v42 }
 0x1d9   : > { %7585 = vmatpush1.bf16.msra.mxu1 %v7584_v4  ;;  %v10163_v10 = vadd.f32 %v1758_v1, %v9944_v30  ;;  %v2034_v21 = vpop.f32.mrb[102].mxu1  ;;  %v5972_v30 = vld [vmem:[%s11843_s4 + $0x228] sm:$0xff] }
 0x1da   : > { %7586 = vmatprep.subr.bf16.mxu1 %v11994_v45  ;;  %v2036_v37 = vpop.f32.mrb[103].mxu1 }
 0x1db   : > { %v6686_v19 = vpop.f32.mrb[88].mxu0 }
 0x1dc   : > { %v10166_v9 = vadd.f32 %v6686_v19, %v10006_v51  ;;  %v1768_v44 = vpop.f32.mrb[89].mxu0  ;;  %v7593_v51 = vpack.c.bf16 %v5972_v30, %v5971_v28 }
 0x1dd   : > { %7588 = vmatpush1.bf16.msra.mxu1 %v7587_v50  ;;  %v10176_v15 = vadd.f32 %v1768_v44, %v9991_v63  ;;  %v10178_v60 = vpop.f32.mrb[104].mxu1  ;;  %v5974_v63 = vld [vmem:[%s11843_s4 + $0x238] sm:$0xff]  ;;  %v5977_v50 = vld [vmem:[%s11843_s4 + $0x250] sm:$0xff]  ;;  %v5980_v44 = vld [vmem:[%s11843_s4 + $0x268] sm:$0xff] }
 0x1de   : > { %7589 = vmatprep.subr.bf16.mxu1 %v11994_v45  ;;  %v2041_v8 = vpop.f32.mrb[105].mxu1 }
 0x1df   : > { %v6689_v16 = vpop.f32.mrb[90].mxu0 }
 0x1e0   : > { %v10181_v61 = vadd.f32 %v6689_v16, %v10038_v18  ;;  %v1778_v22 = vpop.f32.mrb[91].mxu0  ;;  %v7596_v18 = vpack.c.bf16 %v5974_v63, %v5973_v31  ;;  %v5982_v31 = vld [vmem:[%s11843_s4 + $0x278] sm:$0xff]  ;;  %v10240_v63 = vld [vmem:[%s11842_s3] ss:$0 sm:$0xff] }
 0x1e1   : > { %7591 = vmatpush1.bf16.msra.mxu1 %v7590_v25  ;;  %v10191_v17 = vadd.f32 %v1778_v22, %v10021_v20  ;;  %v2044_v32 = vpop.f32.mrb[106].mxu1  ;;  %v5976_v20 = vld [vmem:[%s11843_s4 + $0x248] sm:$0xff]  ;;  %v5979_v25 = vld [vmem:[%s11843_s4 + $0x260] sm:$0xff]  ;;  %v5981_v22 = vld [vmem:[%s11843_s4 + $0x270] sm:$0xff] }
 0x1e2   : > { %7592 = vmatprep.subr.bf16.mxu1 %v11994_v45  ;;  %v2046_v34 = vpop.f32.mrb[107].mxu1  ;;  %v7605_v8 = vpack.c.bf16 %v5980_v44, %v5979_v25 }
 0x1e3   : > { %v6692_v11 = vpop.f32.mrb[92].mxu0 }
 0x1e4   : > { %v10194_v53 = vadd.f32 %v6692_v11, %v10076_v40  ;;  %v1788_v36 = vpop.f32.mrb[93].mxu0  ;;  %v7599_v40 = vpack.c.bf16 %v5976_v20, %v5975_v43  ;;  %v7608_v20 = vpack.c.bf16 %v5982_v31, %v5981_v22 }
 0x1e5   : > { %7594 = vmatpush1.bf16.msra.mxu1 %v7593_v51  ;;  %v10204_v4 = vadd.f32 %v1788_v36, %v10057_v48  ;;  %v10206_v23 = vpop.f32.mrb[108].mxu1  ;;  %v5978_v48 = vld [vmem:[%s11843_s4 + $0x258] sm:$0xff] }
 0x1e6   : > { %7595 = vmatprep.subr.bf16.mxu1 %v11994_v45  ;;  %v2051_v0 = vpop.f32.mrb[109].mxu1 }
 0x1e7   : > { %v6695_v33 = vpop.f32.mrb[94].mxu0 }
 0x1e8   : > { %v10209_v38 = vadd.f32 %v6695_v33, %v10109_v26  ;;  %v1798_v13 = vpop.f32.mrb[95].mxu0  ;;  %v7602_v26 = vpack.c.bf16 %v5978_v48, %v5977_v50 }
 0x1e9   : > { %7597 = vmatpush1.bf16.msra.mxu1 %v7596_v18  ;;  %v10219_v1 = vadd.f32 %v1798_v13, %v10093_v47  ;;  %v2054_v42 = vpop.f32.mrb[110].mxu1 }
 0x1ea   : > { %7598 = vmatprep.subr.bf16.mxu1 %v11994_v45  ;;  %v2056_v6 = vpop.f32.mrb[111].mxu1 }
 0x1eb   : > { %v6730_v37 = vpop.f32.mrb[96].mxu0 }
 0x1ec   : > { %v2244_v19 = vpop.f32.mrb[97].mxu0 }
 0x1ed   : > { %7600 = vmatpush1.bf16.msra.mxu1 %v7599_v40  ;;  %v10228_v28 = vpop.f32.mrb[112].mxu1 }
 0x1ee   : > { %7601 = vmatprep.subr.bf16.mxu1 %v11994_v45  ;;  %v2061_v47 = vpop.f32.mrb[113].mxu1 }
 0x1ef   : > { %v6733_v30 = vpop.f32.mrb[98].mxu0 }
 0x1f0   : > { %v2260_v16 = vadd.f32 %v6733_v30, %v2034_v21  ;;  %v2254_v51 = vpop.f32.mrb[99].mxu0 }
 0x1f1   : > { %7603 = vmatpush1.bf16.msra.mxu1 %v7602_v26  ;;  %v2064_v34 = vpop.f32.mrb[114].mxu1  ;;  %v2255_v11 = vadd.f32 %v2254_v51, %v10150_v27 }
 0x1f2   : > { %7604 = vmatprep.subr.bf16.mxu1 %v11994_v45  ;;  %v2406_v21 = vadd.f32 %v2260_v16, %v9994_v5  ;;  %v2066_v18 = vpop.f32.mrb[115].mxu1 }
 0x1f3   : > { %v2405_v36 = vadd.f32 %v2255_v11, %v10003_v56  ;;  %v6736_v43 = vpop.f32.mrb[100].mxu0 }
 0x1f4   : > { %v2444_v0 = vadd.f32 %v10240_v63, %v2406_v21  ;;  %v2270_v33 = vadd.f32 %v6736_v43, %v2044_v32  ;;  %v2264_v40 = vpop.f32.mrb[101].mxu0 }
 0x1f5   : > { %7606 = vmatpush1.bf16.msra.mxu1 %v7605_v8  ;;  %v2443_v13 = vadd.f32 %v10240_v63, %v2405_v36  ;;  %v10248_v50 = vpop.f32.mrb[116].mxu1  ;;  %v2265_v27 = vadd.f32 %v2264_v40, %v10178_v60 }
 0x1f6   : > { %7607 = vmatprep.subr.bf16.mxu1 %v11994_v45  ;;  %v10251_v48 = vmax.f32 %v2444_v0, 0.0  ;;  %v2408_v5 = vadd.f32 %v2270_v33, %v10009_v49  ;;  %v2071_v56 = vpop.f32.mrb[117].mxu1 }
 0x1f7   : > { %v2475_v6 = vmax.f32 %v2443_v13, 0.0  ;;  %v2407_v37 = vadd.f32 %v2265_v27, %v10018_v54  ;;  %v6739_v32 = vpop.f32.mrb[102].mxu0 }
 0x1f8   : > { %v2639_v26 = vrot.slane %v10251_v48, 7  ;;  %2750 = vst [vmem:[#allocation3 + $0x50] sm:$0xff] %v10251_v48  ;;  %v2784_v19 = vrot.slane %v10251_v48, 1  ;;  %v2446_v60 = vadd.f32 %v10240_v63, %v2408_v5  ;;  %v2280_v25 = vadd.f32 %v6739_v32, %v2054_v42  ;;  %v2274_v44 = vpop.f32.mrb[103].mxu0 }
 0x1f9   : > { %7609 = vmatpush1.bf16.msra.mxu1 %v7608_v20  ;;  %v2638_v47 = vrot.slane %v2475_v6, 7  ;;  %2749 = vst [vmem:[#allocation3 + $0x38] sm:$0xff] %v2475_v6  ;;  %v2783_v49 = vrot.slane %v2475_v6, 1  ;;  %v2445_v30 = vadd.f32 %v10240_v63, %v2407_v37  ;;  %v2074_v8 = vpop.f32.mrb[118].mxu1  ;;  %v2275_v54 = vadd.f32 %v2274_v44, %v10206_v23  ;;  %4000 = vmatprep.mubr.f32.mxu1 %v2475_v6  ;;  %v10274_v23 = vld [vmem:[%s11843_s4] sm:$0xff] }
 0x1fa   : > { %2863 = vst [vmem:[#allocation3 + $0x58] sm:$0x7f] %v2784_v19  ;;  %v10261_v16 = vmax.f32 %v2446_v60, 0.0  ;;  %v2410_v51 = vadd.f32 %v2280_v25, %v10025_v59  ;;  %v2076_v22 = vpop.f32.mrb[119].mxu1  ;;  %v10279_v59 = vld [vmem:[%s11843_s4 + $0x8] sm:$0xff]  ;;  %v10306_v25 = vld [vmem:[%s11843_s4 + $0x10] sm:$0xff] }
 0x1fb   : > { %v10265_v31 = vsel %vm2634_vm0, %v2638_v47, %v2639_v26  ;;  %2717 = vst [vmem:[#allocation3 + $0x30] sm:$0xfe] %v2638_v47  ;;  %v2785_v42 = vsel %vm2779_vm1, %v2783_v49, %v2784_v19  ;;  %v10268_v11 = vmax.f32 %v2445_v30, 0.0  ;;  %v2409_v21 = vadd.f32 %v2275_v54, %v10035_v39  ;;  %v6742_v18 = vpop.f32.mrb[104].mxu0 }
 0x1fc   : > { %2718 = vst [vmem:[#allocation3 + $0x48] sm:$0xff] %v10265_v31  ;;  %2862 = vst [vmem:[#allocation3 + $0x40] sm:$0xff] %v2785_v42  ;;  %v2642_v36 = vrot.slane %v10261_v16, 7  ;;  %v2787_v39 = vrot.slane %v10261_v16, 1  ;;  %v2448_v43 = vadd.f32 %v10240_v63, %v2410_v51  ;;  %v2290_v20 = vadd.f32 %v6742_v18, %v2064_v34  ;;  %v2284_v0 = vpop.f32.mrb[105].mxu0  ;;  %6922 = vmatprep.mubr.f32.mxu0 %v2785_v42 }
 0x1fd   : > { %2752 = vst [vmem:[#allocation3 + $0x80] sm:$0xff] %v10261_v16  ;;  %v2641_v33 = vrot.slane %v10268_v11, 7  ;;  %2751 = vst [vmem:[#allocation3 + $0x68] sm:$0xff] %v10268_v11  ;;  %v2786_v40 = vrot.slane %v10268_v11, 1  ;;  %v2447_v13 = vadd.f32 %v10240_v63, %v2409_v21  ;;  %v2079_v27 = vpop.f32.mrb[120].mxu1  ;;  %v2285_v5 = vadd.f32 %v2284_v0, %v10228_v28 }
 0x1fe   : > { %2865 = vst [vmem:[#allocation3 + $0x88] sm:$0x7f] %v2787_v39  ;;  %v10291_v56 = vmax.f32 %v2448_v43, 0.0  ;;  %v2412_v6 = vadd.f32 %v2290_v20, %v10043_v35  ;;  %v2081_v37 = vpop.f32.mrb[121].mxu1  ;;  %v7643_v34 = vpack.c.bf16 %v10279_v59, %v10274_v23  ;;  %v10311_v35 = vld [vmem:[%s11843_s4 + $0x18] sm:$0xff] }
 0x1ff   : > { %v10297_v32 = vsel %vm2634_vm0, %v2641_v33, %v2642_v36  ;;  %2719 = vst [vmem:[#allocation3 + $0x60] sm:$0xfe] %v2641_v33  ;;  %v2788_v26 = vsel %vm2779_vm1, %v2786_v40, %v2787_v39  ;;  %v10300_v19 = vmax.f32 %v2447_v13, 0.0  ;;  %v2411_v60 = vadd.f32 %v2285_v5, %v10054_v14  ;;  %v6745_v28 = vpop.f32.mrb[106].mxu0 }
 0x200   : > { %2720 = vst [vmem:[#allocation3 + $0x78] sm:$0xff] %v10297_v32  ;;  %2864 = vst [vmem:[#allocation3 + $0x70] sm:$0xff] %v2788_v26  ;;  %v2645_v44 = vrot.slane %v10291_v56, 7  ;;  %v2790_v14 = vrot.slane %v10291_v56, 1  ;;  %v2450_v47 = vadd.f32 %v10240_v63, %v2412_v6  ;;  %v2300_v49 = vadd.f32 %v6745_v28, %v2074_v8  ;;  %v2294_v30 = vpop.f32.mrb[107].mxu0 }
 0x201   : > { %2754 = vst [vmem:[#allocation3 + $0xb0] sm:$0xff] %v10291_v56  ;;  %v2644_v54 = vrot.slane %v10300_v19, 7  ;;  %2753 = vst [vmem:[#allocation3 + $0x98] sm:$0xff] %v10300_v19  ;;  %v2789_v51 = vrot.slane %v10300_v19, 1  ;;  %v2449_v22 = vadd.f32 %v10240_v63, %v2411_v60  ;;  %v2084_v42 = vpop.f32.mrb[122].mxu1  ;;  %v2295_v21 = vadd.f32 %v2294_v30, %v10248_v50  ;;  %v3796_v18 = vld [vmem:[#allocation3 + $0x58] sm:$0xff] }
 0x202   : > { %2867 = vst [vmem:[#allocation3 + $0xb8] sm:$0x7f] %v2790_v14  ;;  %v10323_v23 = vmax.f32 %v2450_v47, 0.0  ;;  %v2414_v59 = vadd.f32 %v2300_v49, %v10062_v7  ;;  %v2086_v36 = vpop.f32.mrb[123].mxu1  ;;  %v3791_v8 = vld [vmem:[#allocation3 + $0x30] sm:$0xff]  ;;  %6923 = vmatmul.mubr.f32.vlgmr.msra.gmra.mrb[128].mxu0 %v3796_v18  ;;  %v7646_v39 = vpack.c.bf16 %v10311_v35, %v10306_v25  ;;  %v3746_v35 = vld [vmem:[%s11843_s4 + $0x20] sm:$0xff] }
 0x203   : > { %v10329_v43 = vsel %vm2634_vm0, %v2644_v54, %v2645_v44  ;;  %2721 = vst [vmem:[#allocation3 + $0x90] sm:$0xfe] %v2644_v54  ;;  %v2791_v20 = vsel %vm2779_vm1, %v2789_v51, %v2790_v14  ;;  %v10332_v0 = vmax.f32 %v2449_v22, 0.0  ;;  %v2413_v50 = vadd.f32 %v2295_v21, %v10073_v58  ;;  %v6748_v33 = vpop.f32.mrb[108].mxu0  ;;  %4001 = vmatmul.mubr.f32.vlgmr.msra.gmra.mrb[192].mxu1 %v3791_v8  ;;  %v3775_v21 = vld [vmem:[%s11843_s4 + $0x108] sm:$0xff] }
 0x204   : > { %6925 = vmatprep.mubr.f32.mxu0 %v2788_v26  ;;  %2722 = vst [vmem:[#allocation3 + $0xa8] sm:$0xff] %v10329_v43  ;;  %2866 = vst [vmem:[#allocation3 + $0xa0] sm:$0xff] %v2791_v20  ;;  %v2648_v7 = vrot.slane %v10323_v23, 7  ;;  %v2793_v40 = vrot.slane %v10323_v23, 1  ;;  %v2452_v13 = vadd.f32 %v10240_v63, %v2414_v59  ;;  %v2310_v5 = vadd.f32 %v6748_v33, %v2084_v42  ;;  %v2304_v6 = vpop.f32.mrb[109].mxu0 }
 0x205   : > { %2756 = vst [vmem:[#allocation3 + $0xe0] sm:$0xff] %v10323_v23  ;;  %4005 = vmatprep.mubr.f32.mxu1 %v10251_v48  ;;  %7644 = vmatpush1.bf16.msra.mxu0 %v7643_v34  ;;  %v2647_v58 = vrot.slane %v10332_v0, 7  ;;  %2755 = vst [vmem:[#allocation3 + $0xc8] sm:$0xff] %v10332_v0  ;;  %v2792_v37 = vrot.slane %v10332_v0, 1  ;;  %v2451_v26 = vadd.f32 %v10240_v63, %v2413_v50  ;;  %v2089_v60 = vpop.f32.mrb[124].mxu1  ;;  %v3802_v25 = vld [vmem:[#allocation3 + $0x88] sm:$0xff] }
 0x206   : > { %v2305_v28 = vadd.f32 %v2304_v6, %v2079_v27  ;;  %7645 = vmatprep.subr.bf16.mxu0 %v11994_v45  ;;  %v3747_v48 = vld [vmem:[%s11843_s4 + $0x28] sm:$0xff]  ;;  %2869 = vst [vmem:[#allocation3 + $0xe8] sm:$0x7f] %v2793_v40  ;;  %v10352_v34 = vmax.f32 %v2452_v13, 0.0  ;;  %v2416_v44 = vadd.f32 %v2310_v5, %v10080_v3  ;;  %v2091_v14 = vpop.f32.mrb[125].mxu1  ;;  %6926 = vmatmul.mubr.f32.gmra.mrb[130].mxu0 %v3802_v25  ;;  %v3749_v50 = vld [vmem:[%s11843_s4 + $0x38] sm:$0xff] }
 0x207   : > { %v10356_v27 = vsel %vm2634_vm0, %v2647_v58, %v2648_v7  ;;  %2723 = vst [vmem:[#allocation3 + $0xc0] sm:$0xfe] %v2647_v58  ;;  %v2794_v47 = vsel %vm2779_vm1, %v2792_v37, %v2793_v40  ;;  %v10359_v49 = vmax.f32 %v2451_v26, 0.0  ;;  %v6751_v54 = vpop.f32.mrb[110].mxu0  ;;  %4006 = vmatmul.mubr.f32.gmra.mrb[194].mxu1 %v10265_v31  ;;  %6928 = vmatprep.mubr.f32.mxu0 %v2791_v20  ;;  %v3774_v31 = vld [vmem:[%s11843_s4 + $0x100] sm:$0xff]  ;;  %v3748_v20 = vld [vmem:[%s11843_s4 + $0x30] sm:$0xff] }
 0x208   : > { %v2415_v30 = vadd.f32 %v2305_v28, %v10090_v24  ;;  %2724 = vst [vmem:[#allocation3 + $0xd8] sm:$0xff] %v10356_v27  ;;  %2868 = vst [vmem:[#allocation3 + $0xd0] sm:$0xff] %v2794_v47  ;;  %v2651_v3 = vrot.slane %v10352_v34, 7  ;;  %v2796_v51 = vrot.slane %v10352_v34, 1  ;;  %v2454_v22 = vadd.f32 %v10240_v63, %v2416_v44  ;;  %v2314_v42 = vpop.f32.mrb[111].mxu0  ;;  %4010 = vmatprep.mubr.f32.mxu1 %v10268_v11  ;;  %v3797_v13 = vld [vmem:[#allocation3 + $0x60] sm:$0xff] }
 0x209   : > { %2758 = vst [vmem:[#allocation3 + $0x110] sm:$0xff] %v10352_v34  ;;  %7647 = vmatpush1.bf16.msra.mxu0 %v7646_v39  ;;  %v7649_v24 = vpack.c.bf16 %v3747_v48, %v3746_v35  ;;  %v2650_v18 = vrot.slane %v10359_v49, 7  ;;  %2757 = vst [vmem:[#allocation3 + $0xf8] sm:$0xff] %v10359_v49  ;;  %v2795_v59 = vrot.slane %v10359_v49, 1  ;;  %v2094_v8 = vpop.f32.mrb[126].mxu1  ;;  %v2315_v11 = vadd.f32 %v2314_v42, %v2089_v60  ;;  %v3808_v39 = vld [vmem:[#allocation3 + $0xb8] sm:$0xff] }
 0x20a   : > { %v2453_v36 = vadd.f32 %v10240_v63, %v2415_v30  ;;  %7648 = vmatprep.subr.bf16.mxu0 %v11994_v45  ;;  %2871 = vst [vmem:[#allocation3 + $0x118] sm:$0x7f] %v2796_v51  ;;  %v10386_v33 = vmax.f32 %v2454_v22, 0.0  ;;  %v2320_v7 = vadd.f32 %v6751_v54, %v2094_v8  ;;  %v2096_v40 = vpop.f32.mrb[127].mxu1  ;;  %6929 = vmatmul.mubr.f32.gmra.mrb[132].mxu0 %v3808_v39  ;;  %v3777_v14 = vld [vmem:[%s11843_s4 + $0x118] sm:$0xff]  ;;  %v3751_v22 = vld [vmem:[%s11843_s4 + $0x48] sm:$0xff] }
 0x20b   : > { %v7690_v5 = vpack.c.bf16 %v3775_v21, %v3774_v31  ;;  %v10389_v6 = vsel %vm2634_vm0, %v2650_v18, %v2651_v3  ;;  %2725 = vst [vmem:[#allocation3 + $0xf0] sm:$0xfe] %v2650_v18  ;;  %v2797_v58 = vsel %vm2779_vm1, %v2795_v59, %v2796_v51  ;;  %v2417_v26 = vadd.f32 %v2315_v11, %v10106_v12  ;;  %v6232_v60 = vpop.f32.mrb[112].mxu0  ;;  %v3776_v12 = vld [vmem:[%s11843_s4 + $0x110] sm:$0xff]  ;;  %v3750_v51 = vld [vmem:[%s11843_s4 + $0x40] sm:$0xff] }
 0x20c   : > { %v10392_v37 = vmax.f32 %v2453_v36, 0.0  ;;  %4011 = vmatmul.mubr.f32.gmra.mrb[196].mxu1 %v3797_v13  ;;  %6931 = vmatprep.mubr.f32.mxu0 %v2794_v47  ;;  %2726 = vst [vmem:[#allocation3 + $0x108] sm:$0xff] %v10389_v6  ;;  %2870 = vst [vmem:[#allocation3 + $0x100] sm:$0xff] %v2797_v58  ;;  %v2654_v28 = vrot.slane %v10386_v33, 7  ;;  %v2799_v25 = vrot.slane %v10386_v33, 1  ;;  %v2418_v35 = vadd.f32 %v2320_v7, %v10096_v41  ;;  %v6233_v48 = vpop.f32.mrb[113].mxu0 }
 0x20d   : > { %2760 = vst [vmem:[#allocation3 + $0x140] sm:$0xff] %v10386_v33  ;;  %4015 = vmatprep.mubr.f32.mxu1 %v10261_v16  ;;  %7650 = vmatpush1.bf16.msra.mxu0 %v7649_v24  ;;  %v7652_v44 = vpack.c.bf16 %v3749_v50, %v3748_v20  ;;  %v2455_v41 = vadd.f32 %v10240_v63, %v2417_v26  ;;  %v10411_v16 = vpop.f32.mrb[128].mxu1  ;;  %v3814_v54 = vld [vmem:[#allocation3 + $0xe8] sm:$0xff]  ;;  %v3778_v20 = vld [vmem:[%s11843_s4 + $0x120] sm:$0xff] }
 0x20e   : > { %v2653_v47 = vrot.slane %v10392_v37, 7  ;;  %2759 = vst [vmem:[#allocation3 + $0x128] sm:$0xff] %v10392_v37  ;;  %v2798_v30 = vrot.slane %v10392_v37, 1  ;;  %v10413_v3 = vadd.f32 %v6233_v48, %v6232_v60  ;;  %7651 = vmatprep.subr.bf16.mxu0 %v11994_v45  ;;  %7691 = vmatprep.subr.bf16.mxu1 %v7690_v5  ;;  %2873 = vst [vmem:[#allocation3 + $0x148] sm:$0x7f] %v2799_v25  ;;  %v2101_v24 = vpop.f32.mrb[129].mxu1 }
 0x20f   : > { %v2456_v42 = vadd.f32 %v10240_v63, %v2418_v35  ;;  %6932 = vmatmul.mubr.f32.gmra.mrb[134].mxu0 %v3814_v54  ;;  %7693 = vmatpush3.bf16.msra.mxu1 %v7690_v5  ;;  %v7694_v31 = vpack.c.bf16 %v3777_v14, %v3776_v12  ;;  %v10427_v59 = vmax.f32 %v2455_v41, 0.0  ;;  %v6235_v36 = vpop.f32.mrb[114].mxu0  ;;  %v7655_v39 = vpack.c.bf16 %v3751_v22, %v3750_v51  ;;  %v3752_v5 = vld [vmem:[%s11843_s4 + $0x50] sm:$0xff]  ;;  %v3781_v41 = vld [vmem:[%s11843_s4 + $0x138] sm:$0xff]  ;;  %v3755_v24 = vld [vmem:[%s11843_s4 + $0x68] sm:$0xff] }
 0x210   : > { %v10424_v21 = vsel %vm2634_vm0, %v2653_v47, %v2654_v28  ;;  %2727 = vst [vmem:[#allocation3 + $0x120] sm:$0xfe] %v2653_v47  ;;  %v2800_v18 = vsel %vm2779_vm1, %v2798_v30, %v2799_v25  ;;  %4016 = vmatmul.mubr.f32.gmra.mrb[198].mxu1 %v10297_v32  ;;  %6934 = vmatprep.mubr.f32.mxu0 %v2797_v58  ;;  %v6236_v11 = vpop.f32.mrb[115].mxu0  ;;  %v3779_v32 = vld [vmem:[%s11843_s4 + $0x128] sm:$0xff]  ;;  %v3753_v58 = vld [vmem:[%s11843_s4 + $0x58] sm:$0xff]  ;;  %v3803_v35 = vld [vmem:[#allocation3 + $0x90] sm:$0xff] }
 0x211   : > { %2728 = vst [vmem:[#allocation3 + $0x138] sm:$0xff] %v10424_v21  ;;  %2872 = vst [vmem:[#allocation3 + $0x130] sm:$0xff] %v2800_v18  ;;  %v10431_v8 = vmax.f32 %v2456_v42, 0.0  ;;  %4020 = vmatprep.mubr.f32.mxu1 %v10300_v19  ;;  %7653 = vmatpush1.bf16.msra.mxu0 %v7652_v44  ;;  %v2656_v50 = vrot.slane %v10427_v59, 7  ;;  %v2801_v7 = vrot.slane %v10427_v59, 1  ;;  %v10443_v40 = vpop.f32.mrb[130].mxu1  ;;  %v10445_v13 = vadd.f32 %v6236_v11, %v6235_v36 }
 0x212   : > { %2761 = vst [vmem:[#allocation3 + $0x158] sm:$0xff] %v10427_v59  ;;  %v3820_v19 = vld [vmem:[#allocation3 + $0x118] sm:$0xff]  ;;  %7654 = vmatprep.subr.bf16.mxu0 %v11994_v45  ;;  %7695 = vmatprep.subr.bf16.mxu1 %v7694_v31  ;;  %v7698_v26 = vpack.c.bf16 %v3779_v32, %v3778_v20  ;;  %v2106_v25 = vpop.f32.mrb[131].mxu1  ;;  %v7658_v47 = vpack.c.bf16 %v3753_v58, %v3752_v5  ;;  %v3780_v30 = vld [vmem:[%s11843_s4 + $0x130] sm:$0xff]  ;;  %v3754_v42 = vld [vmem:[%s11843_s4 + $0x60] sm:$0xff] }
 0x213   : > { %v2657_v60 = vrot.slane %v10431_v8, 7  ;;  %2762 = vst [vmem:[#allocation3 + $0x170] sm:$0xff] %v10431_v8  ;;  %v2802_v28 = vrot.slane %v10431_v8, 1  ;;  %6935 = vmatmul.mubr.f32.gmra.mrb[136].mxu0 %v3820_v19  ;;  %7697 = vmatpush3.bf16.msra.mxu1 %v7694_v31  ;;  %2729 = vst [vmem:[#allocation3 + $0x150] sm:$0xfe] %v2656_v50  ;;  %v6238_v48 = vpop.f32.mrb[116].mxu0  ;;  %v7661_v20 = vpack.c.bf16 %v3755_v24, %v3754_v42 }
 0x214   : > { %4021 = vmatmul.mubr.f32.gmra.mrb[200].mxu1 %v3803_v35  ;;  %6937 = vmatprep.mubr.f32.mxu0 %v2800_v18  ;;  %v6239_v14 = vpop.f32.mrb[117].mxu0  ;;  %v3782_v36 = vld [vmem:[%s11843_s4 + $0x140] sm:$0xff]  ;;  %v3783_v11 = vld [vmem:[%s11843_s4 + $0x148] sm:$0xff]  ;;  %v3784_v5 = vld [vmem:[%s11843_s4 + $0x150] sm:$0xff] }
 0x215   : > { %2875 = vst [vmem:[#allocation3 + $0x178] sm:$0x7f] %v2802_v28  ;;  %v10458_v44 = vsel %vm2634_vm0, %v2656_v50, %v2657_v60  ;;  %v2803_v12 = vsel %vm2779_vm1, %v2801_v7, %v2802_v28  ;;  %4025 = vmatprep.mubr.f32.mxu1 %v10291_v56  ;;  %7656 = vmatpush1.bf16.msra.mxu0 %v7655_v39  ;;  %v10469_v54 = vpop.f32.mrb[132].mxu1  ;;  %v3826_v51 = vld [vmem:[#allocation3 + $0x148] sm:$0xff]  ;;  %v3809_v50 = vld [vmem:[#allocation3 + $0xc0] sm:$0xff]  ;;  %v3757_v7 = vld [vmem:[%s11843_s4 + $0x78] sm:$0xff] }
 0x216   : > { %2730 = vst [vmem:[#allocation3 + $0x168] sm:$0xff] %v10458_v44  ;;  %2874 = vst [vmem:[#allocation3 + $0x160] sm:$0xff] %v2803_v12  ;;  %7657 = vmatprep.subr.bf16.mxu0 %v11994_v45  ;;  %7699 = vmatprep.subr.bf16.mxu1 %v7698_v26  ;;  %v7702_v56 = vpack.c.bf16 %v3781_v41, %v3780_v30  ;;  %v2111_v22 = vpop.f32.mrb[133].mxu1  ;;  %v3785_v58 = vld [vmem:[%s11843_s4 + $0x158] sm:$0xff]  ;;  %v3759_v35 = vld [vmem:[%s11843_s4 + $0x88] sm:$0xff] }
 0x217   : > { %6938 = vmatmul.mubr.f32.gmra.mrb[138].mxu0 %v3826_v51  ;;  %7701 = vmatpush3.bf16.msra.mxu1 %v7698_v26  ;;  %v6241_v31 = vpop.f32.mrb[118].mxu0  ;;  %v7710_v28 = vpack.c.bf16 %v3785_v58, %v3784_v5  ;;  %v3786_v48 = vld [vmem:[%s11843_s4 + $0x160] sm:$0xff]  ;;  %v10521_v41 = vld [vmem:[#allocation3 + $0x8] sm:$0xff]  ;;  %v3760_v22 = vld [vmem:[%s11843_s4 + $0x90] sm:$0xff] }
 0x218   : > { %4026 = vmatmul.mubr.f32.gmra.mrb[202].mxu1 %v10329_v43  ;;  %6940 = vmatprep.mubr.f32.mxu0 %v2803_v12  ;;  %v6242_v18 = vpop.f32.mrb[119].mxu0  ;;  %v7706_v43 = vpack.c.bf16 %v3783_v11, %v3782_v36  ;;  %v3787_v12 = vld [vmem:[%s11843_s4 + $0x168] sm:$0xff]  ;;  %v3761_v42 = vld [vmem:[%s11843_s4 + $0x98] sm:$0xff]  ;;  %v3788_v24 = vld [vmem:[%s11843_s4 + $0x170] sm:$0xff] }
 0x219   : > { %4030 = vmatprep.mubr.f32.mxu1 %v10332_v0  ;;  %7659 = vmatpush1.bf16.msra.mxu0 %v7658_v47  ;;  %v10486_v39 = vpop.f32.mrb[134].mxu1  ;;  %v3756_v0 = vld [vmem:[%s11843_s4 + $0x70] sm:$0xff]  ;;  %v7714_v30 = vpack.c.bf16 %v3787_v12, %v3786_v48  ;;  %v3789_v31 = vld [vmem:[%s11843_s4 + $0x178] sm:$0xff]  ;;  %v7670_v36 = vpack.c.bf16 %v3761_v42, %v3760_v22  ;;  %v3771_v22 = vld [vmem:[%s11843_s4 + $0xe8] sm:$0xff] }
 0x21a   : > { %7660 = vmatprep.subr.bf16.mxu0 %v11994_v45  ;;  %7703 = vmatprep.subr.bf16.mxu1 %v7702_v56  ;;  %v2116_v32 = vpop.f32.mrb[135].mxu1  ;;  %v7664_v60 = vpack.c.bf16 %v3757_v7, %v3756_v0  ;;  %v7718_v11 = vpack.c.bf16 %v3789_v31, %v3788_v24  ;;  %v3821_v7 = vld [vmem:[#allocation3 + $0x120] sm:$0xff]  ;;  %v3765_v5 = vld [vmem:[%s11843_s4 + $0xb8] sm:$0xff]  ;;  %v3827_v12 = vld [vmem:[#allocation3 + $0x150] sm:$0xff] }
 0x21b   : > { %7705 = vmatpush3.bf16.msra.mxu1 %v7702_v56  ;;  %v3815_v56 = vld [vmem:[#allocation3 + $0xf0] sm:$0xff] }
 0x21c   : > { %4031 = vmatmul.mubr.f32.gmra.mrb[204].mxu1 %v3809_v50  ;;  %v3832_v19 = vld [vmem:[#allocation3 + $0x178] sm:$0xff]  ;;  %7707 = vmatprep.subr.bf16.mxu1 %v7706_v43  ;;  %v3772_v31 = vld [vmem:[%s11843_s4 + $0xf0] sm:$0xff] }
 0x21d   : > { %4035 = vmatprep.mubr.f32.mxu1 %v10323_v23  ;;  %6941 = vmatmul.mubr.f32.gmra.mrb[140].mxu0 %v3832_v19  ;;  %v10502_v26 = vpop.f32.mrb[136].mxu1  ;;  %v3758_v23 = vld [vmem:[%s11843_s4 + $0x80] sm:$0xff]  ;;  %v3764_v19 = vld [vmem:[%s11843_s4 + $0xb0] sm:$0xff] }
 0x21e   : > { %7662 = vmatpush1.bf16.msra.mxu0 %v7661_v20  ;;  %v2121_v25 = vpop.f32.mrb[137].mxu1  ;;  %v7667_v47 = vpack.c.bf16 %v3759_v35, %v3758_v23 }
 0x21f   : > { %7663 = vmatprep.subr.bf16.mxu0 %v11994_v45  ;;  %7709 = vmatpush3.bf16.msra.mxu1 %v7706_v43  ;;  %v3763_v43 = vld [vmem:[%s11843_s4 + $0xa8] sm:$0xff] }
 0x220   : > { %4036 = vmatmul.mubr.f32.gmra.mrb[206].mxu1 %v10356_v27  ;;  %7711 = vmatprep.subr.bf16.mxu1 %v7710_v28  ;;  %v10524_v27 = vrot.slane %v10521_v41, 1 }
 0x221   : > { %4040 = vmatprep.mubr.f32.mxu1 %v10359_v49  ;;  %v10519_v14 = vpop.f32.mrb[138].mxu1  ;;  %v10527_v49 = vrot.slane %v10521_v41, 7 }
 0x222   : > { %7665 = vmatpush1.bf16.msra.mxu0 %v7664_v60  ;;  %v2126_v51 = vpop.f32.mrb[139].mxu1  ;;  %2861 = vst [vmem:[#allocation3 + $0x28] sm:$0x7f] %v10524_v27  ;;  %3644 = vst [vmem:[#allocation3 + $0x340] sm:$0xff] %v10524_v27  ;;  %v3766_v60 = vld [vmem:[%s11843_s4 + $0xc0] sm:$0xff] }
 0x223   : > { %7666 = vmatprep.subr.bf16.mxu0 %v11994_v45  ;;  %7713 = vmatpush3.bf16.msra.mxu1 %v7710_v28  ;;  %3645 = vst [vmem:[#allocation3 + $0x358] sm:$0x7f] %v10524_v27  ;;  %2715 = vst [vmem:[#allocation3] sm:$0xfe] %v10527_v49  ;;  %v3767_v28 = vld [vmem:[%s11843_s4 + $0xc8] sm:$0xff] }
 0x224   : > { %4041 = vmatmul.mubr.f32.gmra.mrb[208].mxu1 %v3815_v56  ;;  %7715 = vmatprep.subr.bf16.mxu1 %v7714_v30  ;;  %3626 = vst [vmem:[#allocation3 + $0x330] sm:$0xfe] %v10527_v49  ;;  %3627 = vst [vmem:[#allocation3 + $0x348] sm:$0xff] %v10527_v49  ;;  %v7679_v35 = vpack.c.bf16 %v3767_v28, %v3766_v60  ;;  %v3770_v56 = vld [vmem:[%s11843_s4 + $0xe0] sm:$0xff] }
 0x225   : > { %4045 = vmatprep.mubr.f32.mxu1 %v10352_v34  ;;  %v10549_v18 = vpop.f32.mrb[140].mxu1  ;;  %v3762_v34 = vld [vmem:[%s11843_s4 + $0xa0] sm:$0xff] }
 0x226   : > { %7668 = vmatpush1.bf16.msra.mxu0 %v7667_v47  ;;  %v2131_v20 = vpop.f32.mrb[141].mxu1  ;;  %v7673_v50 = vpack.c.bf16 %v3763_v43, %v3762_v34  ;;  %v3768_v47 = vld [vmem:[%s11843_s4 + $0xd0] sm:$0xff] }
 0x227   : > { %7669 = vmatprep.subr.bf16.mxu0 %v11994_v45  ;;  %7717 = vmatpush3.bf16.msra.mxu1 %v7714_v30 }
 0x228   : > { %4046 = vmatmul.mubr.f32.gmra.mrb[210].mxu1 %v10389_v6  ;;  %7719 = vmatprep.subr.bf16.mxu1 %v7718_v11 }
 0x229   : > { %4050 = vmatprep.mubr.f32.mxu1 %v10392_v37  ;;  %v10560_v32 = vpop.f32.mrb[142].mxu1  ;;  %v7676_v37 = vpack.c.bf16 %v3765_v5, %v3764_v19  ;;  %v6032_v19 = vld [vmem:[%s11843_s4 + $0x408] sm:$0xff] }
 0x22a   : > { %7671 = vmatpush1.bf16.msra.mxu0 %v7670_v36  ;;  %v2136_v0 = vpop.f32.mrb[143].mxu1  ;;  %v3773_v36 = vld [vmem:[%s11843_s4 + $0xf8] sm:$0xff] }
 0x22b   : > { %7672 = vmatprep.subr.bf16.mxu0 %v11994_v45  ;;  %7721 = vmatpush3.bf16.msra.mxu1 %v7718_v11  ;;  %v7688_v20 = vpack.c.bf16 %v3773_v36, %v3772_v31 }
 0x22c   : > { %4051 = vmatmul.mubr.f32.gmra.mrb[212].mxu1 %v3821_v7  ;;  %v6031_v7 = vld [vmem:[%s11843_s4 + $0x400] sm:$0xff] }
 0x22d   : > { %4055 = vmatprep.mubr.f32.mxu1 %v10386_v33  ;;  %v10570_v6 = vpop.f32.mrb[144].mxu1 }
 0x22e   : > { %7674 = vmatpush1.bf16.msra.mxu0 %v7673_v50  ;;  %v2141_v58 = vpop.f32.mrb[145].mxu1 }
 0x22f   : > { %7675 = vmatprep.subr.bf16.mxu0 %v11994_v45  ;;  %v6813_v25 = vpop.f32.mrb[122].mxu0 }
 0x230   : > { %4056 = vmatmul.mubr.f32.gmra.mrb[214].mxu1 %v10424_v21  ;;  %v3174_v33 = vpop.f32.mrb[123].mxu0  ;;  %v3769_v21 = vld [vmem:[%s11843_s4 + $0xd8] sm:$0xff] }
 0x231   : > { %4060 = vmatprep.mubr.f32.mxu1 %v10427_v59  ;;  %v10581_v23 = vpop.f32.mrb[146].mxu1  ;;  %v7682_v30 = vpack.c.bf16 %v3769_v21, %v3768_v47 }
 0x232   : > { %7677 = vmatpush1.bf16.msra.mxu0 %v7676_v37  ;;  %v2146_v48 = vpop.f32.mrb[147].mxu1  ;;  %v10626_v37 = vpack.c.bf16 %v6032_v19, %v6031_v7 }
 0x233   : > { %7678 = vmatprep.subr.bf16.mxu0 %v11994_v45 }
 0x234   : > { %4061 = vmatmul.mubr.f32.gmra.mrb[216].mxu1 %v3827_v12  ;;  %7771 = vmatprep.subr.bf16.mxu1 %v10626_v37 }
 0x235   : > { %4065 = vmatprep.mubr.f32.mxu1 %v10431_v8  ;;  %v10591_v59 = vpop.f32.mrb[148].mxu1  ;;  %v7685_v8 = vpack.c.bf16 %v3771_v22, %v3770_v56 }
 0x236   : > { %7680 = vmatpush1.bf16.msra.mxu0 %v7679_v35  ;;  %v2151_v51 = vpop.f32.mrb[149].mxu1 }
 0x237   : > { %7681 = vmatprep.subr.bf16.mxu0 %v11994_v45 }
 0x238   : > { %4066 = vmatmul.mubr.f32.gmra.mrb[218].mxu1 %v10458_v44 }
 0x239   : > { %v10601_v42 = vpop.f32.mrb[150].mxu1 }
 0x23a   : > { %7683 = vmatpush1.bf16.msra.mxu0 %v7682_v30  ;;  %v2156_v24 = vpop.f32.mrb[151].mxu1 }
 0x23b   : > { %7684 = vmatprep.subr.bf16.mxu0 %v11994_v45 }
 0x23d   : > { %v10610_v11 = vpop.f32.mrb[152].mxu1 }
 0x23e   : > { %7686 = vmatpush1.bf16.msra.mxu0 %v7685_v8  ;;  %v2161_v44 = vpop.f32.mrb[153].mxu1 }
 0x23f   : > { %7687 = vmatprep.subr.bf16.mxu0 %v11994_v45 }
 0x241   : > { %v10613_v34 = vpop.f32.mrb[154].mxu1 }
 0x242   : > { %7689 = vmatpush1.bf16.msra.mxu0 %v7688_v20  ;;  %v2166_v43 = vpop.f32.mrb[155].mxu1 }
 0x243   : > { %7722 = vmatprep.subr.bf16.mxu0 %v11994_v45 }
 0x245   : > { %v10616_v50 = vpop.f32.mrb[156].mxu1 }
 0x246   : > { %v2171_v0 = vpop.f32.mrb[157].mxu1 }
 0x249   : > { %v10624_v5 = vpop.f32.mrb[158].mxu1 }
 0x24a   : > { %v2176_v58 = vpop.f32.mrb[159].mxu1 }
 0x24d   : > { %v6754_v60 = vpop.f32.mrb[160].mxu1 }
 0x24e   : > { %v2330_v28 = vadd.f32 %v6754_v60, %v10443_v40  ;;  %v2324_v25 = vpop.f32.mrb[161].mxu1 }
 0x24f   : > { %v2325_v33 = vadd.f32 %v2324_v25, %v10411_v16  ;;  %v6851_v35 = vpop.f32.mrb[124].mxu0 }
 0x250   : > { %v2420_v48 = vadd.f32 %v2330_v28, %v10112_v62  ;;  %v3344_v12 = vpop.f32.mrb[125].mxu0 }
 0x251   : > { %v2419_v47 = vadd.f32 %v2325_v33, %v10122_v46  ;;  %v6757_v21 = vpop.f32.mrb[162].mxu1 }
 0x252   : > { %v2458_v30 = vadd.f32 %v10240_v63, %v2420_v48  ;;  %v2340_v51 = vadd.f32 %v6757_v21, %v10486_v39  ;;  %v2334_v56 = vpop.f32.mrb[163].mxu1 }
 0x253   : > { %v2457_v22 = vadd.f32 %v10240_v63, %v2419_v47  ;;  %v2335_v8 = vadd.f32 %v2334_v56, %v10469_v54 }
 0x254   : > { %v10637_v40 = vmax.f32 %v2458_v30, 0.0  ;;  %v2422_v16 = vadd.f32 %v2340_v51, %v10125_v55 }
 0x255   : > { %v2489_v24 = vmax.f32 %v2457_v22, 0.0  ;;  %v2421_v62 = vadd.f32 %v2335_v8, %v10135_v57  ;;  %v6760_v31 = vpop.f32.mrb[164].mxu1 }
 0x256   : > { %v2660_v46 = vrot.slane %v10637_v40, 7  ;;  %2764 = vst [vmem:[#allocation3 + $0x1a0] sm:$0xff] %v10637_v40  ;;  %v2805_v36 = vrot.slane %v10637_v40, 1  ;;  %v2460_v39 = vadd.f32 %v10240_v63, %v2422_v16  ;;  %v2350_v20 = vadd.f32 %v6760_v31, %v10519_v14  ;;  %v2344_v44 = vpop.f32.mrb[165].mxu1 }
 0x257   : > { %v2659_v54 = vrot.slane %v2489_v24, 7  ;;  %2763 = vst [vmem:[#allocation3 + $0x188] sm:$0xff] %v2489_v24  ;;  %v2804_v43 = vrot.slane %v2489_v24, 1  ;;  %v2459_v55 = vadd.f32 %v10240_v63, %v2421_v62  ;;  %v2345_v0 = vadd.f32 %v2344_v44, %v10502_v26  ;;  %4070 = vmatprep.mubr.f32.mxu1 %v2489_v24 }
 0x258   : > { %2877 = vst [vmem:[#allocation3 + $0x1a8] sm:$0x7f] %v2805_v36  ;;  %v10648_v57 = vmax.f32 %v2460_v39, 0.0  ;;  %v2424_v7 = vadd.f32 %v2350_v20, %v10138_v29 }
 0x259   : > { %v10652_v19 = vsel %vm2634_vm0, %v2659_v54, %v2660_v46  ;;  %2731 = vst [vmem:[#allocation3 + $0x180] sm:$0xfe] %v2659_v54  ;;  %v2806_v14 = vsel %vm2779_vm1, %v2804_v43, %v2805_v36  ;;  %v10655_v58 = vmax.f32 %v2459_v55, 0.0  ;;  %v2423_v60 = vadd.f32 %v2345_v0, %v10148_v52  ;;  %v6763_v28 = vpop.f32.mrb[166].mxu1 }
 0x25a   : > { %2732 = vst [vmem:[#allocation3 + $0x198] sm:$0xff] %v10652_v19  ;;  %2876 = vst [vmem:[#allocation3 + $0x190] sm:$0xff] %v2806_v14  ;;  %v2663_v26 = vrot.slane %v10648_v57, 7  ;;  %v2808_v29 = vrot.slane %v10648_v57, 1  ;;  %v2462_v25 = vadd.f32 %v10240_v63, %v2424_v7  ;;  %v2360_v33 = vadd.f32 %v6763_v28, %v10560_v32  ;;  %v2354_v35 = vpop.f32.mrb[167].mxu1  ;;  %6943 = vmatprep.mubr.f32.mxu0 %v2806_v14 }
 0x25b   : > { %2766 = vst [vmem:[#allocation3 + $0x1d0] sm:$0xff] %v10648_v57  ;;  %v2662_v48 = vrot.slane %v10655_v58, 7  ;;  %2765 = vst [vmem:[#allocation3 + $0x1b8] sm:$0xff] %v10655_v58  ;;  %v2807_v52 = vrot.slane %v10655_v58, 1  ;;  %v2461_v12 = vadd.f32 %v10240_v63, %v2423_v60  ;;  %v2355_v47 = vadd.f32 %v2354_v35, %v10549_v18 }
 0x25c   : > { %2879 = vst [vmem:[#allocation3 + $0x1d8] sm:$0x7f] %v2808_v29  ;;  %v10669_v21 = vmax.f32 %v2462_v25, 0.0  ;;  %v2426_v30 = vadd.f32 %v2360_v33, %v10153_v2 }
 0x25d   : > { %v10673_v51 = vsel %vm2634_vm0, %v2662_v48, %v2663_v26  ;;  %2733 = vst [vmem:[#allocation3 + $0x1b0] sm:$0xfe] %v2662_v48  ;;  %v10676_v32 = vsel %vm2779_vm1, %v2807_v52, %v2808_v29  ;;  %v10678_v56 = vmax.f32 %v2461_v12, 0.0  ;;  %v2425_v22 = vadd.f32 %v2355_v47, %v10163_v10  ;;  %v10747_v47 = vld [vmem:[%s11842_s3] ss:$0 sm:$0xff] }
 0x25e   : > { %2734 = vst [vmem:[#allocation3 + $0x1c8] sm:$0xff] %v10673_v51  ;;  %2878 = vst [vmem:[#allocation3 + $0x1c0] sm:$0xff] %v10676_v32  ;;  %v2666_v18 = vrot.slane %v10669_v21, 7  ;;  %v2811_v2 = vrot.slane %v10669_v21, 1  ;;  %v2464_v16 = vadd.f32 %v10240_v63, %v2426_v30 }
 0x25f   : > { %v6766_v8 = vpop.f32.mrb[168].mxu1  ;;  %2768 = vst [vmem:[#allocation3 + $0x200] sm:$0xff] %v10669_v21  ;;  %v2665_v31 = vrot.slane %v10678_v56, 7  ;;  %2767 = vst [vmem:[#allocation3 + $0x1e8] sm:$0xff] %v10678_v56  ;;  %v2810_v10 = vrot.slane %v10678_v56, 1  ;;  %v2463_v46 = vadd.f32 %v10240_v63, %v2425_v22  ;;  %v10693_v39 = vld [vmem:[#allocation3 + $0x1a8] sm:$0xff] }
 0x260   : > { %v2370_v24 = vadd.f32 %v6766_v8, %v10581_v23  ;;  %v2364_v62 = vpop.f32.mrb[169].mxu1  ;;  %2881 = vst [vmem:[#allocation3 + $0x208] sm:$0x7f] %v2811_v2  ;;  %v10695_v20 = vmax.f32 %v2464_v16, 0.0  ;;  %v3833_v54 = vld [vmem:[#allocation3 + $0x180] sm:$0xff]  ;;  %6944 = vmatmul.mubr.f32.gmra.mrb[142].mxu0 %v10693_v39 }
 0x261   : > { %v2365_v36 = vadd.f32 %v2364_v62, %v10570_v6  ;;  %v10700_v23 = vsel %vm2634_vm0, %v2665_v31, %v2666_v18  ;;  %2735 = vst [vmem:[#allocation3 + $0x1e0] sm:$0xfe] %v2665_v31  ;;  %v10703_v43 = vsel %vm2779_vm1, %v2810_v10, %v2811_v2  ;;  %v10705_v55 = vmax.f32 %v2463_v46, 0.0  ;;  %4071 = vmatmul.mubr.f32.gmra.mrb[220].mxu1 %v3833_v54 }
 0x262   : > { %v2428_v44 = vadd.f32 %v2370_v24, %v10166_v9  ;;  %6946 = vmatprep.mubr.f32.mxu0 %v10676_v32  ;;  %2736 = vst [vmem:[#allocation3 + $0x1f8] sm:$0xff] %v10700_v23  ;;  %2880 = vst [vmem:[#allocation3 + $0x1f0] sm:$0xff] %v10703_v43  ;;  %v2669_v9 = vrot.slane %v10695_v20, 7  ;;  %v2814_v7 = vrot.slane %v10695_v20, 1  ;;  %4075 = vmatprep.mubr.f32.mxu1 %v10637_v40 }
 0x263   : > { %v2427_v6 = vadd.f32 %v2365_v36, %v10176_v15  ;;  %v6769_v0 = vpop.f32.mrb[170].mxu1  ;;  %2770 = vst [vmem:[#allocation3 + $0x230] sm:$0xff] %v10695_v20  ;;  %v2668_v15 = vrot.slane %v10705_v55, 7  ;;  %2769 = vst [vmem:[#allocation3 + $0x218] sm:$0xff] %v10705_v55  ;;  %v2813_v26 = vrot.slane %v10705_v55, 1  ;;  %v10722_v33 = vld [vmem:[#allocation3 + $0x1d8] sm:$0xff] }
 0x264   : > { %v2466_v14 = vadd.f32 %v10240_v63, %v2428_v44  ;;  %v2380_v60 = vadd.f32 %v6769_v0, %v10601_v42  ;;  %v2374_v28 = vpop.f32.mrb[171].mxu1  ;;  %2883 = vst [vmem:[#allocation3 + $0x238] sm:$0x7f] %v2814_v7  ;;  %6947 = vmatmul.mubr.f32.gmra.mrb[144].mxu0 %v10722_v33  ;;  %v3839_v62 = vld [vmem:[#allocation3 + $0x1b0] sm:$0xff] }
 0x265   : > { %v2465_v29 = vadd.f32 %v10240_v63, %v2427_v6  ;;  %v2375_v25 = vadd.f32 %v2374_v28, %v10591_v59  ;;  %v10729_v40 = vsel %vm2634_vm0, %v2668_v15, %v2669_v9  ;;  %2737 = vst [vmem:[#allocation3 + $0x210] sm:$0xfe] %v2668_v15  ;;  %v10732_v48 = vsel %vm2779_vm1, %v2813_v26, %v2814_v7 }
 0x266   : > { %v10724_v35 = vmax.f32 %v2466_v14, 0.0  ;;  %v2430_v42 = vadd.f32 %v2380_v60, %v10181_v61  ;;  %4076 = vmatmul.mubr.f32.gmra.mrb[222].mxu1 %v10652_v19  ;;  %6949 = vmatprep.mubr.f32.mxu0 %v10703_v43  ;;  %2738 = vst [vmem:[#allocation3 + $0x228] sm:$0xff] %v10729_v40  ;;  %2882 = vst [vmem:[#allocation3 + $0x220] sm:$0xff] %v10732_v48 }
 0x267   : > { %v10734_v52 = vmax.f32 %v2465_v29, 0.0  ;;  %v2429_v63 = vadd.f32 %v2375_v25, %v10191_v17  ;;  %v6772_v59 = vpop.f32.mrb[172].mxu1  ;;  %4080 = vmatprep.mubr.f32.mxu1 %v10655_v58  ;;  %v10757_v16 = vld [vmem:[#allocation3 + $0x208] sm:$0xff] }
 0x268   : > { %v2672_v61 = vrot.slane %v10724_v35, 7  ;;  %2772 = vst [vmem:[#allocation3 + $0x260] sm:$0xff] %v10724_v35  ;;  %v2817_v12 = vrot.slane %v10724_v35, 1  ;;  %v2468_v17 = vadd.f32 %v10747_v47, %v2430_v42  ;;  %v2390_v19 = vadd.f32 %v6772_v59, %v10613_v34  ;;  %v2384_v30 = vpop.f32.mrb[173].mxu1  ;;  %6950 = vmatmul.mubr.f32.gmra.mrb[146].mxu0 %v10757_v16 }
 0x269   : > { %v2671_v22 = vrot.slane %v10734_v52, 7  ;;  %2771 = vst [vmem:[#allocation3 + $0x248] sm:$0xff] %v10734_v52  ;;  %v2816_v8 = vrot.slane %v10734_v52, 1  ;;  %v2467_v18 = vadd.f32 %v10747_v47, %v2429_v63  ;;  %v2385_v2 = vadd.f32 %v2384_v30, %v10610_v11  ;;  %6952 = vmatprep.mubr.f32.mxu0 %v10732_v48 }
 0x26a   : > { %2885 = vst [vmem:[#allocation3 + $0x268] sm:$0x7f] %v2817_v12  ;;  %v10759_v24 = vmax.f32 %v2468_v17, 0.0  ;;  %v2432_v34 = vadd.f32 %v2390_v19, %v10194_v53  ;;  %4081 = vmatmul.mubr.f32.gmra.mrb[224].mxu1 %v3839_v62 }
 0x26b   : > { %v10764_v58 = vsel %vm2634_vm0, %v2671_v22, %v2672_v61  ;;  %2739 = vst [vmem:[#allocation3 + $0x240] sm:$0xfe] %v2671_v22  ;;  %v10767_v31 = vsel %vm2779_vm1, %v2816_v8, %v2817_v12  ;;  %v10769_v10 = vmax.f32 %v2467_v18, 0.0  ;;  %v2431_v11 = vadd.f32 %v2385_v2, %v10204_v4  ;;  %v6775_v46 = vpop.f32.mrb[174].mxu1  ;;  %4085 = vmatprep.mubr.f32.mxu1 %v10648_v57  ;;  %v10788_v60 = vld [vmem:[#allocation3 + $0x238] sm:$0xff]  ;;  %v3845_v22 = vld [vmem:[#allocation3 + $0x1e0] sm:$0xff] }
 0x26c   : > { %2740 = vst [vmem:[#allocation3 + $0x258] sm:$0xff] %v10764_v58  ;;  %2884 = vst [vmem:[#allocation3 + $0x250] sm:$0xff] %v10767_v31  ;;  %v2675_v53 = vrot.slane %v10759_v24, 7  ;;  %v2820_v36 = vrot.slane %v10759_v24, 1  ;;  %v2470_v44 = vadd.f32 %v10747_v47, %v2432_v34  ;;  %v2400_v54 = vadd.f32 %v6775_v46, %v10624_v5  ;;  %v2394_v6 = vpop.f32.mrb[175].mxu1  ;;  %v10786_v14 = vpop.f32.mrb[120].mxu0  ;;  %6953 = vmatmul.mubr.f32.gmra.mrb[148].mxu0 %v10788_v60 }
 0x26d   : > { %2774 = vst [vmem:[#allocation3 + $0x290] sm:$0xff] %v10759_v24  ;;  %v2674_v4 = vrot.slane %v10769_v10, 7  ;;  %2773 = vst [vmem:[#allocation3 + $0x278] sm:$0xff] %v10769_v10  ;;  %v2819_v0 = vrot.slane %v10769_v10, 1  ;;  %v2469_v9 = vadd.f32 %v10747_v47, %v2431_v11  ;;  %v2395_v7 = vadd.f32 %v2394_v6, %v10616_v50  ;;  %v10793_v57 = vpop.f32.mrb[121].mxu0  ;;  %6955 = vmatprep.mubr.f32.mxu0 %v10767_v31 }
 0x26e   : > { %2887 = vst [vmem:[#allocation3 + $0x298] sm:$0x7f] %v2820_v36  ;;  %v10790_v28 = vmax.f32 %v2470_v44, 0.0  ;;  %v2434_v5 = vadd.f32 %v2400_v54, %v10209_v38  ;;  %4086 = vmatmul.mubr.f32.gmra.mrb[226].mxu1 %v10673_v51 }
 0x26f   : > { %v10797_v15 = vsel %vm2634_vm0, %v2674_v4, %v2675_v53  ;;  %2741 = vst [vmem:[#allocation3 + $0x270] sm:$0xfe] %v2674_v4  ;;  %v10800_v26 = vsel %vm2779_vm1, %v2819_v0, %v2820_v36  ;;  %v10802_v50 = vmax.f32 %v2469_v9, 0.0  ;;  %v2433_v29 = vadd.f32 %v2395_v7, %v10219_v1  ;;  %v6296_v25 = vpop.f32.mrb[176].mxu1  ;;  %4090 = vmatprep.mubr.f32.mxu1 %v10678_v56 }
 0x270   : > { %2742 = vst [vmem:[#allocation3 + $0x288] sm:$0xff] %v10797_v15  ;;  %2886 = vst [vmem:[#allocation3 + $0x280] sm:$0xff] %v10800_v26  ;;  %v2678_v38 = vrot.slane %v10790_v28, 7  ;;  %v2823_v42 = vrot.slane %v10790_v28, 1  ;;  %v2472_v63 = vadd.f32 %v10747_v47, %v2434_v5  ;;  %v6297_v59 = vpop.f32.mrb[177].mxu1  ;;  %v3851_v5 = vld [vmem:[#allocation3 + $0x210] sm:$0xff] }
 0x271   : > { %2776 = vst [vmem:[#allocation3 + $0x2c0] sm:$0xff] %v10790_v28  ;;  %v2677_v1 = vrot.slane %v10802_v50, 7  ;;  %2775 = vst [vmem:[#allocation3 + $0x2a8] sm:$0xff] %v10802_v50  ;;  %v2822_v51 = vrot.slane %v10802_v50, 1  ;;  %v2471_v61 = vadd.f32 %v10747_v47, %v2433_v29  ;;  %v6298_v12 = vadd.f32 %v6297_v59, %v6296_v25  ;;  %v10818_v17 = vld [vmem:[#allocation3 + $0x268] sm:$0xff]  ;;  %v6889_v19 = vpop.f32.mrb[126].mxu0 }
 0x272   : > { %2889 = vst [vmem:[#allocation3 + $0x2c8] sm:$0x7f] %v2823_v42  ;;  %v10820_v30 = vmax.f32 %v2472_v63, 0.0  ;;  %6956 = vmatmul.mubr.f32.gmra.mrb[150].mxu0 %v10818_v17  ;;  %v3575_v8 = vpop.f32.mrb[127].mxu0  ;;  %4091 = vmatmul.mubr.f32.gmra.mrb[228].mxu1 %v3845_v22 }
 0x273   : > { %v10824_v56 = vsel %vm2634_vm0, %v2677_v1, %v2678_v38  ;;  %2743 = vst [vmem:[#allocation3 + $0x2a0] sm:$0xfe] %v2677_v1  ;;  %v10827_v18 = vsel %vm2779_vm1, %v2822_v51, %v2823_v42  ;;  %v10829_v2 = vmax.f32 %v2471_v61, 0.0  ;;  %v7821_v34 = vadd.f32 %v6298_v12, %v10413_v3  ;;  %v6299_v62 = vpop.f32.mrb[178].mxu1  ;;  %6958 = vmatprep.mubr.f32.mxu0 %v10800_v26 }
 0x274   : > { %2744 = vst [vmem:[#allocation3 + $0x2b8] sm:$0xff] %v10824_v56  ;;  %2888 = vst [vmem:[#allocation3 + $0x2b0] sm:$0xff] %v10827_v18  ;;  %v2681_v11 = vrot.slane %v10820_v30, 7  ;;  %v2826_v46 = vrot.slane %v10820_v30, 1  ;;  %v6300_v53 = vpop.f32.mrb[179].mxu1  ;;  %4095 = vmatprep.mubr.f32.mxu1 %v10669_v21 }
 0x275   : > { %2778 = vst [vmem:[#allocation3 + $0x2f0] sm:$0xff] %v10820_v30  ;;  %v2680_v36 = vrot.slane %v10829_v2, 7  ;;  %2777 = vst [vmem:[#allocation3 + $0x2d8] sm:$0xff] %v10829_v2  ;;  %v2825_v3 = vrot.slane %v10829_v2, 1  ;;  %v6301_v44 = vadd.f32 %v6300_v53, %v6299_v62  ;;  %v10842_v54 = vld [vmem:[#allocation3 + $0x298] sm:$0xff]  ;;  %v6000_v62 = vld [vmem:[%s11843_s4 + $0x308] sm:$0xff] }
 0x276   : > { %2891 = vst [vmem:[#allocation3 + $0x2f8] sm:$0x7f] %v2826_v46  ;;  %6959 = vmatmul.mubr.f32.gmra.mrb[152].mxu0 %v10842_v54  ;;  %4096 = vmatmul.mubr.f32.gmra.mrb[230].mxu1 %v10700_v23  ;;  %v3863_v25 = vld [vmem:[#allocation3 + $0x270] sm:$0xff]  ;;  %v3646_v53 = vld [vmem:[#allocation3] sm:$0xff] }
 0x277   : > { %v10846_v6 = vsel %vm2634_vm0, %v2680_v36, %v2681_v11  ;;  %2745 = vst [vmem:[#allocation3 + $0x2d0] sm:$0xfe] %v2680_v36  ;;  %v10849_v4 = vsel %vm2779_vm1, %v2825_v3, %v2826_v46  ;;  %v7818_v21 = vadd.f32 %v6301_v44, %v10445_v13  ;;  %6961 = vmatprep.mubr.f32.mxu0 %v10827_v18  ;;  %v6302_v0 = vpop.f32.mrb[180].mxu1  ;;  %v3651_v46 = vld [vmem:[#allocation3 + $0x28] sm:$0xff]  ;;  %v6001_v3 = vld [vmem:[%s11843_s4 + $0x310] sm:$0xff]  ;;  %v6002_v44 = vld [vmem:[%s11843_s4 + $0x318] sm:$0xff] }
 0x278   : > { %2746 = vst [vmem:[#allocation3 + $0x2e8] sm:$0xff] %v10846_v6  ;;  %2890 = vst [vmem:[#allocation3 + $0x2e0] sm:$0xff] %v10849_v4  ;;  %4100 = vmatprep.mubr.f32.mxu1 %v10705_v55  ;;  %v6303_v9 = vpop.f32.mrb[181].mxu1  ;;  %v3857_v55 = vld [vmem:[#allocation3 + $0x240] sm:$0xff]  ;;  %v3657_v0 = vld [vmem:[#allocation3 + $0x58] sm:$0xff] }
 0x279   : > { %v10857_v7 = vld [vmem:[#allocation3 + $0x2c8] sm:$0xff]  ;;  %v7726_v9 = vpack.c.bf16 %v6002_v44, %v6001_v3  ;;  %v11000_v3 = vld [vmem:[#allocation3 + $0x78] sm:$0xff] }
 0x27a   : > { %6962 = vmatmul.mubr.f32.gmra.mrb[154].mxu0 %v10857_v7  ;;  %4101 = vmatmul.mubr.f32.gmra.mrb[232].mxu1 %v3851_v5  ;;  %v6003_v5 = vld [vmem:[%s11843_s4 + $0x320] sm:$0xff] }
 0x27b   : > { %6964 = vmatprep.mubr.f32.mxu0 %v10849_v4  ;;  %v6305_v13 = vpop.f32.mrb[182].mxu1  ;;  %4105 = vmatprep.mubr.f32.mxu1 %v10695_v20 }
 0x27c   : > { %v6306_v23 = vpop.f32.mrb[183].mxu1 }
 0x27d   : > { %v10862_v29 = vld [vmem:[#allocation3 + $0x2f8] sm:$0xff]  ;;  %v6004_v23 = vld [vmem:[%s11843_s4 + $0x328] sm:$0xff] }
 0x27e   : > { %6965 = vmatmul.mubr.f32.gmra.mrb[156].mxu0 %v10862_v29  ;;  %4106 = vmatmul.mubr.f32.gmra.mrb[234].mxu1 %v10729_v40  ;;  %v10882_v61 = vld [vmem:[#allocation3 + $0x2d0] sm:$0xff] }
 0x27f   : > { %4110 = vmatprep.mubr.f32.mxu1 %v10734_v52  ;;  %v10873_v52 = vld [vmem:[#allocation3 + $0x2a0] sm:$0xff] }
 0x282   : > { %4111 = vmatmul.mubr.f32.gmra.mrb[236].mxu1 %v3857_v55  ;;  %v6035_v55 = vld [vmem:[%s11843_s4 + $0x420] sm:$0xff] }
 0x283   : > { %4115 = vmatprep.mubr.f32.mxu1 %v10724_v35 }
 0x286   : > { %4116 = vmatmul.mubr.f32.gmra.mrb[238].mxu1 %v10764_v58 }
 0x287   : > { %4120 = vmatprep.mubr.f32.mxu1 %v10769_v10 }
 0x28a   : > { %4121 = vmatmul.mubr.f32.gmra.mrb[240].mxu1 %v3863_v25  ;;  %v10929_v25 = vld [vmem:[#allocation3 + $0x70] sm:$0xff] }
 0x28b   : > { %4125 = vmatprep.mubr.f32.mxu1 %v10759_v24 }
 0x28e   : > { %4126 = vmatmul.mubr.f32.gmra.mrb[242].mxu1 %v10797_v15 }
 0x28f   : > { %v6360_v20 = vpop.f32.mrb[184].mxu1  ;;  %4130 = vmatprep.mubr.f32.mxu1 %v10802_v50 }
 0x290   : > { %v6361_v38 = vpop.f32.mrb[185].mxu1 }
 0x291   : > { %v6362_v40 = vadd.f32 %v6361_v38, %v6360_v20  ;;  %v3653_v20 = vld [vmem:[#allocation3 + $0x38] sm:$0xff]  ;;  %v10932_v38 = vld [vmem:[#allocation3 + $0x88] sm:$0xff] }
 0x292   : > { %4131 = vmatmul.mubr.f32.gmra.mrb[244].mxu1 %v10873_v52 }
 0x293   : > { %v7822_v42 = vadd.f32 %v7821_v34, %v6362_v40  ;;  %v6363_v63 = vpop.f32.mrb[186].mxu1  ;;  %4135 = vmatprep.mubr.f32.mxu1 %v10790_v28  ;;  %v7729_v40 = vpack.c.bf16 %v6004_v23, %v6003_v5  ;;  %v11017_v5 = vld [vmem:[#allocation3 + $0x130] sm:$0xff]  ;;  %v11023_v23 = vld [vmem:[#allocation3 + $0x148] sm:$0xff] }
 0x294   : > { %v6364_v35 = vpop.f32.mrb[187].mxu1 }
 0x295   : > { %v7823_v58 = vadd.f32 %v7822_v42, %v10793_v57  ;;  %v6365_v10 = vadd.f32 %v6364_v35, %v6363_v63  ;;  %v6005_v42 = vld [vmem:[%s11843_s4 + $0x330] sm:$0xff] }
 0x296   : > { %4136 = vmatmul.mubr.f32.gmra.mrb[246].mxu1 %v10824_v56  ;;  %v6037_v35 = vld [vmem:[%s11843_s4 + $0x430] sm:$0xff] }
 0x297   : > { %v3588_v24 = vadd.f32 %v10747_v47, %v7823_v58  ;;  %v7819_v59 = vadd.f32 %v7818_v21, %v6365_v10  ;;  %v6366_v15 = vpop.f32.mrb[188].mxu1  ;;  %4140 = vmatprep.mubr.f32.mxu1 %v10829_v2  ;;  %v3654_v21 = vld [vmem:[#allocation3 + $0x40] sm:$0xff]  ;;  %v6038_v58 = vld [vmem:[%s11843_s4 + $0x438] sm:$0xff] }
 0x298   : > { %v6367_v50 = vpop.f32.mrb[189].mxu1  ;;  %v10948_v10 = vld [vmem:[#allocation3 + $0xa0] sm:$0xff]  ;;  %v3655_v15 = vld [vmem:[#allocation3 + $0x48] sm:$0xff] }
 0x299   : > { %v3592_v1 = vmax.f32 %v3588_v24, 0.0  ;;  %v7820_v51 = vadd.f32 %v7819_v59, %v10786_v14  ;;  %v3656_v24 = vld [vmem:[#allocation3 + $0x50] sm:$0xff]  ;;  %v10951_v59 = vld [vmem:[#allocation3 + $0xb8] sm:$0xff] }
 0x29a   : > { %4141 = vmatmul.mubr.f32.gmra.mrb[248].mxu1 %v10882_v61 }
 0x29b   : > { %v3613_v12 = vrot.slane %v3592_v1, 7  ;;  %3628 = vst [vmem:[#allocation3 + $0x308] sm:$0xff] %v3592_v1  ;;  %v3589_v28 = vadd.f32 %v10747_v47, %v7820_v51  ;;  %v6369_v57 = vpop.f32.mrb[190].mxu1  ;;  %4145 = vmatprep.mubr.f32.mxu1 %v10820_v30  ;;  %v3632_v8 = vrot.slane %v3592_v1, 1  ;;  %v5999_v30 = vld [vmem:[%s11843_s4 + $0x300] sm:$0xff]  ;;  %v7782_v51 = vpack.c.bf16 %v6038_v58, %v6037_v35  ;;  %v11044_v35 = vld [vmem:[#allocation3 + $0xb0] sm:$0xff] }
 0x29c   : > { %v6370_v19 = vpop.f32.mrb[191].mxu1  ;;  %v7723_v36 = vpack.c.bf16 %v6000_v62, %v5999_v30  ;;  %v6040_v57 = vld [vmem:[%s11843_s4 + $0x448] sm:$0xff]  ;;  %v6041_v30 = vld [vmem:[%s11843_s4 + $0x450] sm:$0xff]  ;;  %v6042_v62 = vld [vmem:[%s11843_s4 + $0x458] sm:$0xff] }
 0x29d   : > { %3624 = vst [vmem:[#allocation3 + $0x300] sm:$0xfe] %v3613_v12  ;;  %v3593_v22 = vmax.f32 %v3589_v28, 0.0  ;;  %v6039_v28 = vld [vmem:[%s11843_s4 + $0x440] sm:$0xff]  ;;  %v10967_v19 = vld [vmem:[#allocation3 + $0xd0] sm:$0xff]  ;;  %v11048_v58 = vld [vmem:[#allocation3 + $0xa8] sm:$0xff] }
 0x29e   : > { %4146 = vmatmul.mubr.f32.gmra.mrb[250].mxu1 %v10846_v6  ;;  %v6033_v6 = vld [vmem:[%s11843_s4 + $0x410] sm:$0xff] }
 0x29f   : > { %v3614_v56 = vrot.slane %v3593_v22, 7  ;;  %3629 = vst [vmem:[#allocation3 + $0x320] sm:$0xff] %v3593_v22  ;;  %v3633_v2 = vrot.slane %v3593_v22, 1  ;;  %4150 = vmatprep.mubr.f32.mxu1 %v3592_v1  ;;  %v6007_v1 = vld [vmem:[%s11843_s4 + $0x340] sm:$0xff] }
 0x2a1   : > { %v3615_v14 = vsel %vm2634_vm0, %v3613_v12, %v3614_v56  ;;  %v3634_v34 = vsel %vm2779_vm1, %v3632_v8, %v3633_v2  ;;  %3643 = vst [vmem:[#allocation3 + $0x328] sm:$0x7f] %v3633_v2  ;;  %v6008_v12 = vld [vmem:[%s11843_s4 + $0x348] sm:$0xff]  ;;  %v10975_v56 = vld [vmem:[#allocation3 + $0x60] sm:$0xff] }
 0x2a2   : > { %3625 = vst [vmem:[#allocation3 + $0x318] sm:$0xff] %v3615_v14  ;;  %3642 = vst [vmem:[#allocation3 + $0x310] sm:$0xff] %v3634_v34  ;;  %6967 = vmatprep.mubr.f32.mxu0 %v3634_v34  ;;  %v10973_v8 = vld [vmem:[#allocation3 + $0xe8] sm:$0xff]  ;;  %v7735_v2 = vpack.c.bf16 %v6008_v12, %v6007_v1  ;;  %v7786_v34 = vpack.c.bf16 %v6040_v57, %v6039_v28  ;;  %v6015_v1 = vld [vmem:[%s11843_s4 + $0x380] sm:$0xff] }
 0x2a3   : > { %v11061_v12 = vld [vmem:[#allocation3 + $0x190] sm:$0xff]  ;;  %v11063_v28 = vld [vmem:[#allocation3 + $0xc8] sm:$0xff] }
 0x2a4   : > { %v3881_v47 = vld [vmem:[#allocation3 + $0x300] sm:$0xff] }
 0x2a5   : > { %4151 = vmatmul.mubr.f32.gmra.mrb[252].mxu1 %v3881_v47  ;;  %v6010_v47 = vld [vmem:[%s11843_s4 + $0x358] sm:$0xff] }
 0x2a6   : > { %4155 = vmatprep.mubr.f32.mxu1 %v3593_v22  ;;  %v10969_v22 = vld [vmem:[#allocation3 + $0x68] sm:$0xff] }
 0x2a8   : > { %v10896_v11 = vld [vmem:[#allocation3 + $0x328] sm:$0xff] }
 0x2a9   : > { %4156 = vmatmul.mubr.f32.gmra.mrb[254].mxu1 %v3615_v14  ;;  %6968 = vmatmul.mubr.f32.gmra.mrb[158].mxu0 %v10896_v11  ;;  %v6009_v14 = vld [vmem:[%s11843_s4 + $0x350] sm:$0xff] }
 0x2aa   : > { %7002 = vmatprep.mubr.f32.mxu1 %v10524_v27  ;;  %4450 = vmatprep.mubr.f32.mxu0 %v10521_v41  ;;  %v6034_v27 = vld [vmem:[%s11843_s4 + $0x418] sm:$0xff]  ;;  %v7738_v44 = vpack.c.bf16 %v6010_v47, %v6009_v14  ;;  %v6017_v14 = vld [vmem:[%s11843_s4 + $0x390] sm:$0xff]  ;;  %v11078_v47 = vld [vmem:[#allocation3 + $0xe0] sm:$0xff] }
 0x2ab   : > { %v7774_v13 = vpack.c.bf16 %v6034_v27, %v6033_v6  ;;  %v6011_v6 = vld [vmem:[%s11843_s4 + $0x360] sm:$0xff]  ;;  %v7790_v27 = vpack.c.bf16 %v6042_v62, %v6041_v30  ;;  %v11082_v62 = vld [vmem:[#allocation3 + $0xd8] sm:$0xff] }
 0x2ad   : > { %7003 = vmatmul.mubr.f32.vlgmr.msra.gmra.mrb[0].mxu1 %v3651_v46  ;;  %4451 = vmatmul.mubr.f32.vlgmr.msra.gmra.mrb[160].mxu0 %v3646_v53  ;;  %v10992_v46 = vld [vmem:[#allocation3 + $0x100] sm:$0xff] }
 0x2ae   : > { %7005 = vmatprep.mubr.f32.mxu1 %v3654_v21  ;;  %7724 = vmatpush1.bf16.msra.mxu0 %v7723_v36  ;;  %v10994_v53 = vld [vmem:[#allocation3 + $0x80] sm:$0xff]  ;;  %v10998_v36 = vld [vmem:[#allocation3 + $0x118] sm:$0xff]  ;;  %v6012_v21 = vld [vmem:[%s11843_s4 + $0x368] sm:$0xff] }
 0x2af   : > { %4455 = vmatprep.mubr.f32.mxu0 %v10521_v41  ;;  %7725 = vmatprep.subr.bf16.mxu0 %v11994_v45  ;;  %v6036_v41 = vld [vmem:[%s11843_s4 + $0x428] sm:$0xff] }
 0x2b0   : > { %7773 = vmatpush3.bf16.msra.mxu1 %v10626_v37  ;;  %v3652_v37 = vld [vmem:[#allocation3 + $0x30] sm:$0xff]  ;;  %v7778_v63 = vpack.c.bf16 %v6036_v41, %v6035_v55  ;;  %v7741_v41 = vpack.c.bf16 %v6012_v21, %v6011_v6 }
 0x2b1   : > { %7006 = vmatmul.mubr.f32.gmra.mrb[2].mxu1 %v3657_v0  ;;  %4456 = vmatmul.mubr.f32.gmra.mrb[162].mxu0 %v10527_v49  ;;  %v6006_v49 = vld [vmem:[%s11843_s4 + $0x338] sm:$0xff]  ;;  %v6043_v0 = vld [vmem:[%s11843_s4 + $0x460] sm:$0xff]  ;;  %v11025_v55 = vld [vmem:[#allocation3 + $0x90] sm:$0xff] }
 0x2b2   : > { %7008 = vmatprep.mubr.f32.mxu1 %v10929_v25  ;;  %4460 = vmatprep.mubr.f32.mxu0 %v3653_v20  ;;  %v7732_v50 = vpack.c.bf16 %v6006_v49, %v6005_v42  ;;  %v6045_v42 = vld [vmem:[%s11843_s4 + $0x470] sm:$0xff]  ;;  %v11042_v49 = vld [vmem:[#allocation3 + $0x160] sm:$0xff] }
 0x2b3   : > { %7727 = vmatpush1.bf16.msra.mxu0 %v7726_v9  ;;  %7775 = vmatprep.subr.bf16.mxu1 %v7774_v13  ;;  %v6044_v9 = vld [vmem:[%s11843_s4 + $0x468] sm:$0xff]  ;;  %v6021_v21 = vld [vmem:[%s11843_s4 + $0x3b0] sm:$0xff] }
 0x2b4   : > { %7728 = vmatprep.subr.bf16.mxu0 %v11994_v45  ;;  %7777 = vmatpush3.bf16.msra.mxu1 %v7774_v13  ;;  %v11019_v13 = vld [vmem:[#allocation3 + $0x98] sm:$0xff]  ;;  %v7794_v20 = vpack.c.bf16 %v6044_v9, %v6043_v0 }
 0x2b5   : > { %7009 = vmatmul.mubr.f32.gmra.mrb[4].mxu1 %v10932_v38  ;;  %4461 = vmatmul.mubr.f32.gmra.mrb[164].mxu0 %v3652_v37  ;;  %v6013_v37 = vld [vmem:[%s11843_s4 + $0x370] sm:$0xff] }
 0x2b6   : > { %7011 = vmatprep.mubr.f32.mxu1 %v10948_v10  ;;  %4465 = vmatprep.mubr.f32.mxu0 %v3656_v24 }
 0x2b7   : > { %7730 = vmatpush1.bf16.msra.mxu0 %v7729_v40  ;;  %7779 = vmatprep.subr.bf16.mxu1 %v7778_v63  ;;  %v6014_v40 = vld [vmem:[%s11843_s4 + $0x378] sm:$0xff] }
 0x2b8   : > { %7731 = vmatprep.subr.bf16.mxu0 %v11994_v45  ;;  %7781 = vmatpush3.bf16.msra.mxu1 %v7778_v63  ;;  %v6046_v63 = vld [vmem:[%s11843_s4 + $0x478] sm:$0xff]  ;;  %v7744_v24 = vpack.c.bf16 %v6014_v40, %v6013_v37  ;;  %v6024_v40 = vld [vmem:[%s11843_s4 + $0x3c8] sm:$0xff] }
 0x2b9   : > { %7012 = vmatmul.mubr.f32.gmra.mrb[6].mxu1 %v10951_v59  ;;  %4466 = vmatmul.mubr.f32.gmra.mrb[166].mxu0 %v3655_v15  ;;  %v7798_v15 = vpack.c.bf16 %v6046_v63, %v6045_v42  ;;  %v11123_v42 = vld [vmem:[#allocation3 + $0x128] sm:$0xff] }
 0x2ba   : > { %7014 = vmatprep.mubr.f32.mxu1 %v10967_v19  ;;  %4470 = vmatprep.mubr.f32.mxu0 %v10969_v22 }
 0x2bb   : > { %7733 = vmatpush1.bf16.msra.mxu0 %v7732_v50  ;;  %7783 = vmatprep.subr.bf16.mxu1 %v7782_v51  ;;  %v11050_v50 = vld [vmem:[#allocation3 + $0x178] sm:$0xff] }
 0x2bc   : > { %7734 = vmatprep.subr.bf16.mxu0 %v11994_v45  ;;  %7785 = vmatpush3.bf16.msra.mxu1 %v7782_v51  ;;  %v6016_v51 = vld [vmem:[%s11843_s4 + $0x388] sm:$0xff] }
 0x2bd   : > { %7015 = vmatmul.mubr.f32.gmra.mrb[8].mxu1 %v10973_v8  ;;  %4471 = vmatmul.mubr.f32.gmra.mrb[168].mxu0 %v10975_v56  ;;  %v7747_v57 = vpack.c.bf16 %v6016_v51, %v6015_v1  ;;  %v11129_v51 = vld [vmem:[#allocation3 + $0x120] sm:$0xff] }
 0x2be   : > { %7017 = vmatprep.mubr.f32.mxu1 %v10992_v46  ;;  %4475 = vmatprep.mubr.f32.mxu0 %v10994_v53 }
 0x2bf   : > { %7736 = vmatpush1.bf16.msra.mxu0 %v7735_v2  ;;  %7787 = vmatprep.subr.bf16.mxu1 %v7786_v34  ;;  %v11067_v2 = vld [vmem:[#allocation3 + $0xc0] sm:$0xff] }
 0x2c0   : > { %7737 = vmatprep.subr.bf16.mxu0 %v11994_v45  ;;  %7789 = vmatpush3.bf16.msra.mxu1 %v7786_v34  ;;  %v6018_v34 = vld [vmem:[%s11843_s4 + $0x398] sm:$0xff] }
 0x2c1   : > { %7018 = vmatmul.mubr.f32.gmra.mrb[10].mxu1 %v10998_v36  ;;  %4476 = vmatmul.mubr.f32.gmra.mrb[170].mxu0 %v11000_v3  ;;  %v7750_v30 = vpack.c.bf16 %v6018_v34, %v6017_v14  ;;  %v6026_v14 = vld [vmem:[%s11843_s4 + $0x3d8] sm:$0xff] }
 0x2c2   : > { %7020 = vmatprep.mubr.f32.mxu1 %v11017_v5  ;;  %4480 = vmatprep.mubr.f32.mxu0 %v11019_v13 }
 0x2c3   : > { %7739 = vmatpush1.bf16.msra.mxu0 %v7738_v44  ;;  %7791 = vmatprep.subr.bf16.mxu1 %v7790_v27  ;;  %v6019_v44 = vld [vmem:[%s11843_s4 + $0x3a0] sm:$0xff] }
 0x2c4   : > { %7740 = vmatprep.subr.bf16.mxu0 %v11994_v45  ;;  %7793 = vmatpush3.bf16.msra.mxu1 %v7790_v27  ;;  %v11097_v27 = vld [vmem:[#allocation3 + $0xf0] sm:$0xff] }
 0x2c5   : > { %7021 = vmatmul.mubr.f32.gmra.mrb[12].mxu1 %v11023_v23  ;;  %4481 = vmatmul.mubr.f32.gmra.mrb[172].mxu0 %v11025_v55 }
 0x2c6   : > { %7023 = vmatprep.mubr.f32.mxu1 %v11042_v49  ;;  %4485 = vmatprep.mubr.f32.mxu0 %v11044_v35 }
 0x2c7   : > { %7742 = vmatpush1.bf16.msra.mxu0 %v7741_v41  ;;  %7795 = vmatprep.subr.bf16.mxu1 %v7794_v20 }
 0x2c8   : > { %7743 = vmatprep.subr.bf16.mxu0 %v11994_v45  ;;  %7797 = vmatpush3.bf16.msra.mxu1 %v7794_v20  ;;  %v11112_v20 = vld [vmem:[#allocation3 + $0x108] sm:$0xff] }
 0x2c9   : > { %7024 = vmatmul.mubr.f32.gmra.mrb[14].mxu1 %v11050_v50  ;;  %4486 = vmatmul.mubr.f32.gmra.mrb[174].mxu0 %v11048_v58 }
 0x2ca   : > { %7026 = vmatprep.mubr.f32.mxu1 %v11061_v12  ;;  %4490 = vmatprep.mubr.f32.mxu0 %v11063_v28 }
 0x2cb   : > { %7745 = vmatpush1.bf16.msra.mxu0 %v7744_v24  ;;  %7799 = vmatprep.subr.bf16.mxu1 %v7798_v15 }
 0x2cc   : > { %7801 = vmatpush3.bf16.msra.mxu1 %v7798_v15  ;;  %7746 = vmatprep.subr.bf16.mxu0 %v11994_v45 }
 0x2cd   : > { %7027 = vmatmul.mubr.f32.gmra.mrb[16].mxu1 %v10693_v39  ;;  %4491 = vmatmul.mubr.f32.gmra.mrb[176].mxu0 %v11067_v2  ;;  %v6020_v39 = vld [vmem:[%s11843_s4 + $0x3a8] sm:$0xff] }
 0x2ce   : > { %7029 = vmatprep.mubr.f32.mxu1 %v10676_v32  ;;  %4495 = vmatprep.mubr.f32.mxu0 %v11078_v47  ;;  %v11093_v32 = vld [vmem:[#allocation3 + $0xf8] sm:$0xff]  ;;  %v7753_v6 = vpack.c.bf16 %v6020_v39, %v6019_v44 }
 0x2cf   : > { %7748 = vmatpush1.bf16.msra.mxu0 %v7747_v57 }
 0x2d0   : > { %7749 = vmatprep.subr.bf16.mxu0 %v11994_v45 }
 0x2d1   : > { %7030 = vmatmul.mubr.f32.gmra.mrb[18].mxu1 %v10722_v33  ;;  %4496 = vmatmul.mubr.f32.gmra.mrb[178].mxu0 %v11082_v62  ;;  %v6022_v33 = vld [vmem:[%s11843_s4 + $0x3b8] sm:$0xff] }
 0x2d2   : > { %7032 = vmatprep.mubr.f32.mxu1 %v10703_v43  ;;  %4500 = vmatprep.mubr.f32.mxu0 %v11093_v32  ;;  %v11108_v43 = vld [vmem:[#allocation3 + $0x110] sm:$0xff]  ;;  %v7756_v9 = vpack.c.bf16 %v6022_v33, %v6021_v21  ;;  %v11146_v21 = vld [vmem:[#allocation3 + $0x138] sm:$0xff] }
 0x2d3   : > { %7751 = vmatpush1.bf16.msra.mxu0 %v7750_v30  ;;  %v11142_v30 = vld [vmem:[#allocation3 + $0x140] sm:$0xff] }
 0x2d4   : > { %7752 = vmatprep.subr.bf16.mxu0 %v11994_v45 }
 0x2d5   : > { %7033 = vmatmul.mubr.f32.gmra.mrb[20].mxu1 %v10757_v16  ;;  %4501 = vmatmul.mubr.f32.gmra.mrb[180].mxu0 %v11097_v27  ;;  %v6924_v0 = vpop.f32.mrb[128].mxu0  ;;  %v6023_v16 = vld [vmem:[%s11843_s4 + $0x3c0] sm:$0xff] }
 0x2d6   : > { %7035 = vmatprep.mubr.f32.mxu1 %v10732_v48  ;;  %4505 = vmatprep.mubr.f32.mxu0 %v11108_v43  ;;  %v4002_v41 = vpop.f32.mrb[192].mxu1  ;;  %v4227_v37 = vpop.f32.mrb[129].mxu0  ;;  %v7759_v15 = vpack.c.bf16 %v6024_v40, %v6023_v16 }
 0x2d7   : > { %7754 = vmatpush1.bf16.msra.mxu0 %v7753_v6  ;;  %v4004_v48 = vpop.f32.mrb[193].mxu1  ;;  %v11125_v63 = vadd.f32 %v4227_v37, %v4002_v41  ;;  %v11159_v41 = vld [vmem:[#allocation3 + $0x158] sm:$0xff] }
 0x2d8   : > { %7755 = vmatprep.subr.bf16.mxu0 %v11994_v45  ;;  %v11163_v48 = vld [vmem:[#allocation3 + $0x150] sm:$0xff] }
 0x2d9   : > { %7036 = vmatmul.mubr.f32.gmra.mrb[22].mxu1 %v10788_v60  ;;  %4506 = vmatmul.mubr.f32.gmra.mrb[182].mxu0 %v11112_v20  ;;  %v6927_v24 = vpop.f32.mrb[130].mxu0  ;;  %v6025_v60 = vld [vmem:[%s11843_s4 + $0x3d0] sm:$0xff] }
 0x2da   : > { %7038 = vmatprep.mubr.f32.mxu1 %v10767_v31  ;;  %4510 = vmatprep.mubr.f32.mxu0 %v11123_v42  ;;  %v4007_v1 = vpop.f32.mrb[194].mxu1  ;;  %v4237_v57 = vpop.f32.mrb[131].mxu0  ;;  %v7762_v39 = vpack.c.bf16 %v6026_v14, %v6025_v60  ;;  %v11176_v60 = vld [vmem:[#allocation3 + $0x170] sm:$0xff] }
 0x2db   : > { %7757 = vmatpush1.bf16.msra.mxu0 %v7756_v9  ;;  %v11138_v31 = vadd.f32 %v6924_v0, %v4007_v1  ;;  %v4009_v34 = vpop.f32.mrb[195].mxu1  ;;  %v6028_v0 = vld [vmem:[%s11843_s4 + $0x3e8] sm:$0xff]  ;;  %v6030_v1 = vld [vmem:[%s11843_s4 + $0x3f8] sm:$0xff] }
 0x2dc   : > { %7758 = vmatprep.subr.bf16.mxu0 %v11994_v45 }
 0x2dd   : > { %7039 = vmatmul.mubr.f32.gmra.mrb[24].mxu1 %v10818_v17  ;;  %4511 = vmatmul.mubr.f32.gmra.mrb[184].mxu0 %v11129_v51  ;;  %v6930_v44 = vpop.f32.mrb[132].mxu0  ;;  %v6027_v17 = vld [vmem:[%s11843_s4 + $0x3e0] sm:$0xff] }
 0x2de   : > { %7041 = vmatprep.mubr.f32.mxu1 %v10800_v26  ;;  %4515 = vmatprep.mubr.f32.mxu0 %v11142_v30  ;;  %v4247_v33 = vpop.f32.mrb[133].mxu0  ;;  %v7765_v16 = vpack.c.bf16 %v6028_v0, %v6027_v17  ;;  %v11187_v0 = vld [vmem:[#allocation3 + $0x188] sm:$0xff] }
 0x2df   : > { %7760 = vmatpush1.bf16.msra.mxu0 %v7759_v15  ;;  %v4012_v6 = vpop.f32.mrb[196].mxu1 }
 0x2e0   : > { %7761 = vmatprep.subr.bf16.mxu0 %v11994_v45  ;;  %v11155_v26 = vadd.f32 %v4237_v57, %v4012_v6  ;;  %v4014_v9 = vpop.f32.mrb[197].mxu1  ;;  %v11180_v6 = vld [vmem:[#allocation3 + $0x168] sm:$0xff] }
 0x2e1   : > { %7042 = vmatmul.mubr.f32.gmra.mrb[26].mxu1 %v10842_v54  ;;  %4516 = vmatmul.mubr.f32.gmra.mrb[186].mxu0 %v11146_v21  ;;  %v6029_v54 = vld [vmem:[%s11843_s4 + $0x3f0] sm:$0xff] }
 0x2e2   : > { %7044 = vmatprep.mubr.f32.mxu1 %v10827_v18  ;;  %4520 = vmatprep.mubr.f32.mxu0 %v11159_v41  ;;  %v6933_v37 = vpop.f32.mrb[134].mxu0  ;;  %v7768_v34 = vpack.c.bf16 %v6030_v1, %v6029_v54  ;;  %v11201_v54 = vld [vmem:[#allocation3 + $0x198] sm:$0xff] }
 0x2e3   : > { %7763 = vmatpush1.bf16.msra.mxu0 %v7762_v39  ;;  %v4017_v40 = vpop.f32.mrb[198].mxu1  ;;  %v4257_v15 = vpop.f32.mrb[135].mxu0 }
 0x2e4   : > { %7764 = vmatprep.subr.bf16.mxu0 %v11994_v45  ;;  %v11172_v18 = vadd.f32 %v6927_v24, %v4017_v40  ;;  %v4019_v57 = vpop.f32.mrb[199].mxu1 }
 0x2e5   : > { %7045 = vmatmul.mubr.f32.gmra.mrb[28].mxu1 %v10857_v7  ;;  %4521 = vmatmul.mubr.f32.gmra.mrb[188].mxu0 %v11163_v48  ;;  %v11209_v57 = vld [vmem:[#allocation3 + $0x1b8] sm:$0xff] }
 0x2e6   : > { %7047 = vmatprep.mubr.f32.mxu1 %v10849_v4  ;;  %4525 = vmatprep.mubr.f32.mxu0 %v11176_v60  ;;  %v6936_v14 = vpop.f32.mrb[136].mxu0 }
 0x2e7   : > { %7766 = vmatpush1.bf16.msra.mxu0 %v7765_v16  ;;  %v4022_v39 = vpop.f32.mrb[200].mxu1  ;;  %v4267_v17 = vpop.f32.mrb[137].mxu0  ;;  %v11191_v16 = vld [vmem:[#allocation3 + $0x180] sm:$0xff] }
 0x2e8   : > { %7767 = vmatprep.subr.bf16.mxu0 %v11994_v45  ;;  %v11183_v24 = vadd.f32 %v4247_v33, %v4022_v39  ;;  %v4024_v7 = vpop.f32.mrb[201].mxu1  ;;  %v11197_v33 = vld [vmem:[#allocation3 + $0x1a0] sm:$0xff]  ;;  %v11213_v39 = vld [vmem:[#allocation3 + $0x1b0] sm:$0xff] }
 0x2e9   : > { %7048 = vmatmul.mubr.f32.gmra.mrb[30].mxu1 %v10862_v29  ;;  %4526 = vmatmul.mubr.f32.gmra.mrb[190].mxu0 %v11180_v6 }
 0x2ea   : > { %7082 = vmatprep.mubr.f32.mxu1 %v10929_v25  ;;  %4530 = vmatprep.mubr.f32.mxu0 %v11187_v0  ;;  %v6939_v4 = vpop.f32.mrb[138].mxu0 }
 0x2eb   : > { %7769 = vmatpush1.bf16.msra.mxu0 %v7768_v34  ;;  %v4027_v9 = vpop.f32.mrb[202].mxu1  ;;  %v4277_v40 = vpop.f32.mrb[139].mxu0 }
 0x2ec   : > { %v11193_v45 = vadd.f32 %v6930_v44, %v4027_v9  ;;  %v4029_v29 = vpop.f32.mrb[203].mxu1  ;;  %v11223_v9 = vld [vmem:[#allocation3 + $0x1c8] sm:$0xff] }
 0x2ed   : > { %7083 = vmatmul.mubr.f32.vlgmr.msra.gmra.mrb[32].mxu1 %v10932_v38  ;;  %4531 = vmatmul.mubr.f32.gmra.mrb[192].mxu0 %v11191_v16 }
 0x2ee   : > { %11995 = vst [vmem:[#allocation11_spill] sm:$0xff] %v11193_v45  ;;  %7085 = vmatprep.mubr.f32.mxu1 %v10948_v10  ;;  %4535 = vmatprep.mubr.f32.mxu0 %v11197_v33  ;;  %v4923_v45 = vld [vmem:[#allocation3 + $0x310] sm:$0xff] }
 0x2ef   : > { %v4032_v25 = vpop.f32.mrb[204].mxu1 }
 0x2f0   : > { %v11203_v1 = vadd.f32 %v4257_v15, %v4032_v25  ;;  %v4034_v44 = vpop.f32.mrb[205].mxu1  ;;  %v11207_v38 = vpop.f32.mrb[140].mxu0  ;;  %v11219_v15 = vld [vmem:[#allocation3 + $0x1d0] sm:$0xff] }
 0x2f1   : > { %7086 = vmatmul.mubr.f32.gmra.mrb[34].mxu1 %v10951_v59  ;;  %4536 = vmatmul.mubr.f32.gmra.mrb[194].mxu0 %v11201_v54  ;;  %v4287_v10 = vpop.f32.mrb[141].mxu0 }
 0x2f2   : > { %11996 = vst [vmem:[#allocation19_spill] sm:$0xff] %v11203_v1  ;;  %7088 = vmatprep.mubr.f32.mxu1 %v10967_v19  ;;  %4540 = vmatprep.mubr.f32.mxu0 %v11209_v57  ;;  %v4920_v1 = vld [vmem:[#allocation3 + $0x2f8] sm:$0xff] }
 0x2f3   : > { %v4037_v34 = vpop.f32.mrb[206].mxu1 }
 0x2f4   : > { %v11215_v7 = vadd.f32 %v6933_v37, %v4037_v34  ;;  %v4039_v59 = vpop.f32.mrb[207].mxu1 }
 0x2f5   : > { %7089 = vmatmul.mubr.f32.gmra.mrb[36].mxu1 %v10973_v8  ;;  %4541 = vmatmul.mubr.f32.gmra.mrb[196].mxu0 %v11213_v39  ;;  %v11229_v8 = vld [vmem:[#allocation3 + $0x1e8] sm:$0xff] }
 0x2f6   : > { %11997 = vst [vmem:[#allocation20_spill] sm:$0xff] %v11215_v7  ;;  %7091 = vmatprep.mubr.f32.mxu1 %v10992_v46  ;;  %4545 = vmatprep.mubr.f32.mxu0 %v11219_v15  ;;  %v11233_v46 = vld [vmem:[#allocation3 + $0x1e0] sm:$0xff] }
 0x2f7   : > { %v4042_v19 = vpop.f32.mrb[208].mxu1  ;;  %v4917_v7 = vld [vmem:[#allocation3 + $0x2e0] sm:$0xff] }
 0x2f8   : > { %v11225_v29 = vadd.f32 %v4267_v17, %v4042_v19  ;;  %v4044_v37 = vpop.f32.mrb[209].mxu1 }
 0x2f9   : > { %7092 = vmatmul.mubr.f32.gmra.mrb[38].mxu1 %v10998_v36  ;;  %4546 = vmatmul.mubr.f32.gmra.mrb[198].mxu0 %v11223_v9  ;;  %v11239_v36 = vld [vmem:[#allocation3 + $0x200] sm:$0xff]  ;;  %v11253_v37 = vld [vmem:[#allocation3 + $0x210] sm:$0xff] }
 0x2fa   : > { %11998 = vst [vmem:[#allocation13_spill] sm:$0xff] %v11225_v29  ;;  %7094 = vmatprep.mubr.f32.mxu1 %v11017_v5  ;;  %4550 = vmatprep.mubr.f32.mxu0 %v11229_v8  ;;  %v11243_v5 = vld [vmem:[#allocation3 + $0x1f8] sm:$0xff] }
 0x2fb   : > { %v4047_v25 = vpop.f32.mrb[210].mxu1  ;;  %v11281_v29 = vld [vmem:[#allocation3 + $0x278] sm:$0xff] }
 0x2fc   : > { %v11235_v44 = vadd.f32 %v6936_v14, %v4047_v25  ;;  %v4049_v17 = vpop.f32.mrb[211].mxu1 }
 0x2fd   : > { %7095 = vmatmul.mubr.f32.gmra.mrb[40].mxu1 %v11023_v23  ;;  %4551 = vmatmul.mubr.f32.gmra.mrb[200].mxu0 %v11233_v46  ;;  %v11249_v23 = vld [vmem:[#allocation3 + $0x218] sm:$0xff]  ;;  %v11258_v17 = vld [vmem:[#allocation3 + $0x230] sm:$0xff] }
 0x2fe   : > { %11999 = vst [vmem:[#allocation14_spill] sm:$0xff] %v11235_v44  ;;  %7097 = vmatprep.mubr.f32.mxu1 %v11042_v49  ;;  %4555 = vmatprep.mubr.f32.mxu0 %v11239_v36  ;;  %v4878_v49 = vld [vmem:[#allocation3 + $0x1a8] sm:$0xff] }
 0x2ff   : > { %v4052_v34 = vpop.f32.mrb[212].mxu1 }
 0x300   : > { %v11245_v59 = vadd.f32 %v4277_v40, %v4052_v34  ;;  %v4054_v14 = vpop.f32.mrb[213].mxu1 }
 0x301   : > { %7098 = vmatmul.mubr.f32.gmra.mrb[42].mxu1 %v11050_v50  ;;  %4556 = vmatmul.mubr.f32.gmra.mrb[202].mxu0 %v11243_v5  ;;  %v4881_v50 = vld [vmem:[#allocation3 + $0x1c0] sm:$0xff]  ;;  %v11261_v14 = vld [vmem:[#allocation3 + $0x228] sm:$0xff] }
 0x302   : > { %12000 = vst [vmem:[#allocation21_spill] sm:$0xff] %v11245_v59  ;;  %7100 = vmatprep.mubr.f32.mxu1 %v11061_v12  ;;  %4560 = vmatprep.mubr.f32.mxu0 %v11249_v23  ;;  %v4884_v12 = vld [vmem:[#allocation3 + $0x1d8] sm:$0xff] }
 0x303   : > { %v4057_v19 = vpop.f32.mrb[214].mxu1 }
 0x304   : > { %v11255_v25 = vadd.f32 %v6939_v4, %v4057_v19  ;;  %v4059_v40 = vpop.f32.mrb[215].mxu1  ;;  %v4887_v4 = vld [vmem:[#allocation3 + $0x1f0] sm:$0xff]  ;;  %v11266_v19 = vld [vmem:[#allocation3 + $0x248] sm:$0xff] }
 0x305   : > { %7101 = vmatmul.mubr.f32.gmra.mrb[44].mxu1 %v4878_v49  ;;  %4561 = vmatmul.mubr.f32.gmra.mrb[204].mxu0 %v11253_v37  ;;  %v4890_v40 = vld [vmem:[#allocation3 + $0x208] sm:$0xff] }
 0x306   : > { %12001 = vst [vmem:[#allocation22_spill] sm:$0xff] %v11255_v25  ;;  %7103 = vmatprep.mubr.f32.mxu1 %v4881_v50  ;;  %4565 = vmatprep.mubr.f32.mxu0 %v11258_v17  ;;  %v11269_v50 = vld [vmem:[#allocation3 + $0x240] sm:$0xff] }
 0x307   : > { %v4062_v34 = vpop.f32.mrb[216].mxu1 }
 0x308   : > { %v11263_v59 = vadd.f32 %v4287_v10, %v4062_v34  ;;  %v4064_v44 = vpop.f32.mrb[217].mxu1  ;;  %v11275_v34 = vld [vmem:[#allocation3 + $0x260] sm:$0xff] }
 0x309   : > { %7104 = vmatmul.mubr.f32.gmra.mrb[46].mxu1 %v4884_v12  ;;  %4566 = vmatmul.mubr.f32.gmra.mrb[206].mxu0 %v11261_v14  ;;  %v4893_v44 = vld [vmem:[#allocation3 + $0x220] sm:$0xff]  ;;  %v4896_v12 = vld [vmem:[#allocation3 + $0x238] sm:$0xff] }
 0x30a   : > { %12002 = vst [vmem:[#allocation18_spill] sm:$0xff] %v11263_v59  ;;  %7106 = vmatprep.mubr.f32.mxu1 %v4887_v4  ;;  %4570 = vmatprep.mubr.f32.mxu0 %v11266_v19  ;;  %v11278_v4 = vld [vmem:[#allocation3 + $0x258] sm:$0xff]  ;;  %v4899_v59 = vld [vmem:[#allocation3 + $0x250] sm:$0xff] }
 0x30b   : > { %v4067_v49 = vpop.f32.mrb[218].mxu1 }
 0x30c   : > { %v11272_v25 = vadd.f32 %v11207_v38, %v4067_v49  ;;  %v4069_v10 = vpop.f32.mrb[219].mxu1  ;;  %v4902_v38 = vld [vmem:[#allocation3 + $0x268] sm:$0xff]  ;;  %v11284_v49 = vld [vmem:[#allocation3 + $0x270] sm:$0xff] }
 0x30d   : > { %7107 = vmatmul.mubr.f32.gmra.mrb[48].mxu1 %v4890_v40  ;;  %4571 = vmatmul.mubr.f32.gmra.mrb[208].mxu0 %v11269_v50  ;;  %v4905_v40 = vld [vmem:[#allocation3 + $0x280] sm:$0xff]  ;;  %v11287_v10 = vld [vmem:[#allocation3 + $0x290] sm:$0xff] }
 0x30e   : > { %12003 = vst [vmem:[#allocation23_spill] sm:$0xff] %v11272_v25  ;;  %7109 = vmatprep.mubr.f32.mxu1 %v4893_v44  ;;  %4575 = vmatprep.mubr.f32.mxu0 %v11275_v34  ;;  %v4908_v44 = vld [vmem:[#allocation3 + $0x298] sm:$0xff]  ;;  %v11293_v25 = vld [vmem:[#allocation3 + $0x2a8] sm:$0xff] }
 0x311   : > { %7110 = vmatmul.mubr.f32.gmra.mrb[50].mxu1 %v4896_v12  ;;  %4576 = vmatmul.mubr.f32.gmra.mrb[210].mxu0 %v11278_v4  ;;  %v11290_v12 = vld [vmem:[#allocation3 + $0x288] sm:$0xff] }
 0x312   : > { %7112 = vmatprep.mubr.f32.mxu1 %v4899_v59  ;;  %4580 = vmatprep.mubr.f32.mxu0 %v11281_v29  ;;  %v4911_v59 = vld [vmem:[#allocation3 + $0x2b0] sm:$0xff] }
 0x315   : > { %7113 = vmatmul.mubr.f32.gmra.mrb[52].mxu1 %v4902_v38  ;;  %4581 = vmatmul.mubr.f32.gmra.mrb[212].mxu0 %v11284_v49  ;;  %v4914_v38 = vld [vmem:[#allocation3 + $0x2c8] sm:$0xff] }
 0x316   : > { %7115 = vmatprep.mubr.f32.mxu1 %v4905_v40  ;;  %4585 = vmatprep.mubr.f32.mxu0 %v11287_v10  ;;  %v11297_v40 = vld [vmem:[#allocation3 + $0x2c0] sm:$0xff] }
 0x319   : > { %7116 = vmatmul.mubr.f32.gmra.mrb[54].mxu1 %v4908_v44  ;;  %4586 = vmatmul.mubr.f32.gmra.mrb[214].mxu0 %v11290_v12  ;;  %v11300_v44 = vld [vmem:[#allocation3 + $0x2b8] sm:$0xff] }
 0x31a   : > { %7118 = vmatprep.mubr.f32.mxu1 %v4911_v59  ;;  %4590 = vmatprep.mubr.f32.mxu0 %v11293_v25  ;;  %v11303_v59 = vld [vmem:[#allocation3 + $0x2d8] sm:$0xff] }
 0x31d   : > { %7119 = vmatmul.mubr.f32.gmra.mrb[56].mxu1 %v4914_v38  ;;  %4591 = vmatmul.mubr.f32.gmra.mrb[216].mxu0 %v10873_v52  ;;  %v4929_v38 = vld [vmem:[#allocation3 + $0x340] sm:$0xff]  ;;  %v11308_v52 = vld [vmem:[#allocation3 + $0x2f0] sm:$0xff] }
 0x31e   : > { %7121 = vmatprep.mubr.f32.mxu1 %v4917_v7  ;;  %4595 = vmatprep.mubr.f32.mxu0 %v11297_v40  ;;  %v4932_v7 = vld [vmem:[#allocation3 + $0x358] sm:$0xff] }
 0x321   : > { %7122 = vmatmul.mubr.f32.gmra.mrb[58].mxu1 %v4920_v1  ;;  %4596 = vmatmul.mubr.f32.gmra.mrb[218].mxu0 %v11300_v44  ;;  %v11311_v1 = vld [vmem:[#allocation3 + $0x2e8] sm:$0xff] }
 0x322   : > { %7124 = vmatprep.mubr.f32.mxu1 %v4923_v45  ;;  %4600 = vmatprep.mubr.f32.mxu0 %v11303_v59  ;;  %12004 = vst [vmem:[#allocation24_spill] sm:$0xff] %v11311_v1 }
 0x325   : > { %7125 = vmatmul.mubr.f32.gmra.mrb[60].mxu1 %v10896_v11  ;;  %4601 = vmatmul.mubr.f32.gmra.mrb[220].mxu0 %v10882_v61 }
 0x326   : > { %4605 = vmatprep.mubr.f32.mxu0 %v11308_v52  ;;  %7127 = vmatprep.mubr.f32.mxu1 %v4929_v38 }
 0x329   : > { %4606 = vmatmul.mubr.f32.gmra.mrb[222].mxu0 %v11311_v1  ;;  %7128 = vmatmul.mubr.f32.gmra.mrb[62].mxu1 %v4932_v7 }
 0x32a   : > { %5046 = vmatprep.mubr.f32.mxu0 %v10969_v22 }
 0x32d   : > { %5047 = vmatmul.mubr.f32.vlgmr.msra.gmra.mrb[224].mxu0 %v10975_v56 }
 0x32e   : > { %5051 = vmatprep.mubr.f32.mxu0 %v10994_v53 }
 0x331   : > { %5052 = vmatmul.mubr.f32.gmra.mrb[226].mxu0 %v11000_v3 }
 0x332   : > { %5056 = vmatprep.mubr.f32.mxu0 %v11019_v13 }
 0x333   : > { %v6945_v61 = vpop.f32.mrb[142].mxu0 }
 0x334   : > { %v4072_v11 = vpop.f32.mrb[220].mxu1  ;;  %v4297_v45 = vpop.f32.mrb[143].mxu0 }
 0x335   : > { %5057 = vmatmul.mubr.f32.gmra.mrb[228].mxu0 %v11025_v55  ;;  %v4074_v38 = vpop.f32.mrb[221].mxu1  ;;  %v11321_v1 = vadd.f32 %v4297_v45, %v4072_v11 }
 0x336   : > { %5061 = vmatprep.mubr.f32.mxu0 %v11044_v35 }
 0x337   : > { %v6948_v22 = vpop.f32.mrb[144].mxu0 }
 0x338   : > { %v4307_v53 = vpop.f32.mrb[145].mxu0 }
 0x339   : > { %5062 = vmatmul.mubr.f32.gmra.mrb[230].mxu0 %v11048_v58  ;;  %v4077_v56 = vpop.f32.mrb[222].mxu1 }
 0x33a   : > { %5066 = vmatprep.mubr.f32.mxu0 %v11063_v28  ;;  %v11325_v3 = vadd.f32 %v6945_v61, %v4077_v56  ;;  %v4079_v13 = vpop.f32.mrb[223].mxu1 }
 0x33b   : > { %v6951_v55 = vpop.f32.mrb[146].mxu0 }
 0x33c   : > { %v4317_v35 = vpop.f32.mrb[147].mxu0 }
 0x33d   : > { %5067 = vmatmul.mubr.f32.gmra.mrb[232].mxu0 %v11067_v2  ;;  %v4082_v7 = vpop.f32.mrb[224].mxu1 }
 0x33e   : > { %5071 = vmatprep.mubr.f32.mxu0 %v11078_v47  ;;  %v11329_v38 = vadd.f32 %v4307_v53, %v4082_v7  ;;  %v4084_v11 = vpop.f32.mrb[225].mxu1 }
 0x33f   : > { %v6954_v58 = vpop.f32.mrb[148].mxu0 }
 0x340   : > { %v4327_v28 = vpop.f32.mrb[149].mxu0 }
 0x341   : > { %5072 = vmatmul.mubr.f32.gmra.mrb[234].mxu0 %v11082_v62  ;;  %v4087_v45 = vpop.f32.mrb[226].mxu1 }
 0x342   : > { %5076 = vmatprep.mubr.f32.mxu0 %v11093_v32  ;;  %v11333_v61 = vadd.f32 %v6948_v22, %v4087_v45  ;;  %v4089_v56 = vpop.f32.mrb[227].mxu1 }
 0x345   : > { %5077 = vmatmul.mubr.f32.gmra.mrb[236].mxu0 %v11097_v27  ;;  %v6957_v2 = vpop.f32.mrb[150].mxu0  ;;  %v4092_v13 = vpop.f32.mrb[228].mxu1 }
 0x346   : > { %5081 = vmatprep.mubr.f32.mxu0 %v11108_v43  ;;  %v4337_v47 = vpop.f32.mrb[151].mxu0  ;;  %v11337_v53 = vadd.f32 %v4317_v35, %v4092_v13  ;;  %v4094_v7 = vpop.f32.mrb[229].mxu1 }
 0x349   : > { %5082 = vmatmul.mubr.f32.gmra.mrb[238].mxu0 %v11112_v20  ;;  %v6960_v62 = vpop.f32.mrb[152].mxu0  ;;  %v4097_v11 = vpop.f32.mrb[230].mxu1 }
 0x34a   : > { %5086 = vmatprep.mubr.f32.mxu0 %v11123_v42  ;;  %v4347_v32 = vpop.f32.mrb[153].mxu0  ;;  %v11341_v22 = vadd.f32 %v6951_v55, %v4097_v11  ;;  %v4099_v45 = vpop.f32.mrb[231].mxu1 }
 0x34d   : > { %5087 = vmatmul.mubr.f32.gmra.mrb[240].mxu0 %v11129_v51  ;;  %v6963_v27 = vpop.f32.mrb[154].mxu0  ;;  %v4102_v56 = vpop.f32.mrb[232].mxu1 }
 0x34e   : > { %5091 = vmatprep.mubr.f32.mxu0 %v11142_v30  ;;  %v4357_v43 = vpop.f32.mrb[155].mxu0  ;;  %v11345_v35 = vadd.f32 %v4327_v28, %v4102_v56  ;;  %v4104_v13 = vpop.f32.mrb[233].mxu1 }
 0x351   : > { %5092 = vmatmul.mubr.f32.gmra.mrb[242].mxu0 %v11146_v21  ;;  %v6966_v20 = vpop.f32.mrb[156].mxu0  ;;  %v4107_v7 = vpop.f32.mrb[234].mxu1 }
 0x352   : > { %5096 = vmatprep.mubr.f32.mxu0 %v11159_v41  ;;  %v4367_v42 = vpop.f32.mrb[157].mxu0  ;;  %v11349_v55 = vadd.f32 %v6954_v58, %v4107_v7  ;;  %v4109_v11 = vpop.f32.mrb[235].mxu1 }
 0x355   : > { %5097 = vmatmul.mubr.f32.gmra.mrb[244].mxu0 %v11163_v48  ;;  %v4112_v51 = vpop.f32.mrb[236].mxu1 }
 0x356   : > { %5101 = vmatprep.mubr.f32.mxu0 %v11176_v60  ;;  %v11353_v30 = vadd.f32 %v4337_v47, %v4112_v51  ;;  %v4114_v28 = vpop.f32.mrb[237].mxu1 }
 0x359   : > { %5102 = vmatmul.mubr.f32.gmra.mrb[246].mxu0 %v11180_v6  ;;  %v4117_v45 = vpop.f32.mrb[238].mxu1 }
 0x35a   : > { %5106 = vmatprep.mubr.f32.mxu0 %v11187_v0  ;;  %v11357_v21 = vadd.f32 %v6957_v2, %v4117_v45  ;;  %v4119_v41 = vpop.f32.mrb[239].mxu1 }
 0x35d   : > { %5107 = vmatmul.mubr.f32.gmra.mrb[248].mxu0 %v11191_v16  ;;  %v4122_v58 = vpop.f32.mrb[240].mxu1 }
 0x35e   : > { %5111 = vmatprep.mubr.f32.mxu0 %v11197_v33  ;;  %v11361_v48 = vadd.f32 %v4347_v32, %v4122_v58  ;;  %v4124_v56 = vpop.f32.mrb[241].mxu1 }
 0x361   : > { %5112 = vmatmul.mubr.f32.gmra.mrb[250].mxu0 %v11201_v54  ;;  %v4127_v60 = vpop.f32.mrb[242].mxu1 }
 0x362   : > { %5116 = vmatprep.mubr.f32.mxu0 %v11209_v57  ;;  %v11365_v6 = vadd.f32 %v6960_v62, %v4127_v60  ;;  %v4129_v47 = vpop.f32.mrb[243].mxu1 }
 0x363   : > { %v4909_v47 = vld [vmem:[#allocation3 + $0x2a0] sm:$0xff] }
 0x365   : > { %5117 = vmatmul.mubr.f32.gmra.mrb[252].mxu0 %v11213_v39  ;;  %v4132_v0 = vpop.f32.mrb[244].mxu1 }
 0x366   : > { %5121 = vmatprep.mubr.f32.mxu0 %v11219_v15  ;;  %v11369_v16 = vadd.f32 %v4357_v43, %v4132_v0  ;;  %v4134_v2 = vpop.f32.mrb[245].mxu1 }
 0x369   : > { %5122 = vmatmul.mubr.f32.gmra.mrb[254].mxu0 %v11223_v9  ;;  %v4137_v33 = vpop.f32.mrb[246].mxu1 }
 0x36a   : > { %5126 = vmatprep.mubr.f32.mxu0 %v11229_v8  ;;  %v11373_v54 = vadd.f32 %v6963_v27, %v4137_v33  ;;  %v4139_v32 = vpop.f32.mrb[247].mxu1 }
 0x36d   : > { %5127 = vmatmul.mubr.f32.gmra.mrb[0].mxu0 %v11233_v46  ;;  %v4142_v57 = vpop.f32.mrb[248].mxu1 }
 0x36e   : > { %5131 = vmatprep.mubr.f32.mxu0 %v11239_v36  ;;  %v11377_v39 = vadd.f32 %v4367_v42, %v4142_v57  ;;  %v4144_v62 = vpop.f32.mrb[249].mxu1 }
 0x371   : > { %5132 = vmatmul.mubr.f32.gmra.mrb[2].mxu0 %v11243_v5  ;;  %v4147_v15 = vpop.f32.mrb[250].mxu1 }
 0x372   : > { %5136 = vmatprep.mubr.f32.mxu0 %v11249_v23  ;;  %v11381_v9 = vadd.f32 %v6966_v20, %v4147_v15  ;;  %v4149_v43 = vpop.f32.mrb[251].mxu1  ;;  %v4915_v15 = vld [vmem:[#allocation3 + $0x2d0] sm:$0xff] }
 0x373   : > { %v12005_v43 = vld [vmem:[#allocation11_spill] sm:$0xff] }
 0x375   : > { %5137 = vmatmul.mubr.f32.gmra.mrb[4].mxu0 %v11253_v37 }
 0x376   : > { %5141 = vmatprep.mubr.f32.mxu0 %v11258_v17 }
 0x378   : > { %v4152_v8 = vpop.f32.mrb[252].mxu1 }
 0x379   : > { %v4154_v46 = vpop.f32.mrb[253].mxu1  ;;  %5142 = vmatmul.mubr.f32.gmra.mrb[6].mxu0 %v11261_v14 }
 0x37a   : > { %5146 = vmatprep.mubr.f32.mxu0 %v11266_v19 }
 0x37c   : > { %v4157_v36 = vpop.f32.mrb[254].mxu1  ;;  %v6969_v27 = vpop.f32.mrb[158].mxu0 }
 0x37d   : > { %v4159_v13 = vpop.f32.mrb[255].mxu1  ;;  %v11387_v5 = vadd.f32 %v6969_v27, %v4157_v36  ;;  %v4377_v7 = vpop.f32.mrb[159].mxu0  ;;  %5147 = vmatmul.mubr.f32.gmra.mrb[8].mxu0 %v11269_v50 }
 0x37e   : > { %v11390_v23 = vadd.f32 %v4377_v7, %v4152_v8  ;;  %5151 = vmatprep.mubr.f32.mxu0 %v11275_v34 }
 0x380   : > { %v4452_v37 = vpop.f32.mrb[160].mxu0  ;;  %v7004_v17 = vpop.f32.mrb[0].mxu1 }
 0x381   : > { %v4453_v20 = vadd.f32 %v4452_v37, %v11125_v63  ;;  %v4454_v42 = vpop.f32.mrb[161].mxu0  ;;  %5152 = vmatmul.mubr.f32.gmra.mrb[10].mxu0 %v11278_v4  ;;  %v4677_v14 = vpop.f32.mrb[1].mxu1  ;;  %v12007_v37 = vld [vmem:[#allocation24_spill] sm:$0xff] }
 0x382   : > { %5156 = vmatprep.mubr.f32.mxu0 %v11281_v29 }
 0x383   : > { %v11396_v19 = vadd.f32 %v4677_v14, %v4453_v20 }
 0x384   : > { %v7007_v11 = vpop.f32.mrb[2].mxu1  ;;  %v4457_v51 = vpop.f32.mrb[162].mxu0 }
 0x385   : > { %v4458_v50 = vadd.f32 %v4457_v51, %v11138_v31  ;;  %v4687_v28 = vpop.f32.mrb[3].mxu1  ;;  %v4459_v45 = vpop.f32.mrb[163].mxu0  ;;  %5157 = vmatmul.mubr.f32.gmra.mrb[12].mxu0 %v11284_v49 }
 0x386   : > { %5161 = vmatprep.mubr.f32.mxu0 %v11287_v10  ;;  %v4925_v45 = vld [vmem:[#allocation3 + $0x320] sm:$0xff] }
 0x387   : > { %v11401_v34 = vadd.f32 %v7004_v17, %v4458_v50  ;;  %v4922_v17 = vld [vmem:[#allocation3 + $0x308] sm:$0xff] }
 0x388   : > { %v7010_v63 = vpop.f32.mrb[4].mxu1  ;;  %v4462_v41 = vpop.f32.mrb[164].mxu0 }
 0x389   : > { %v4463_v4 = vadd.f32 %v4462_v41, %v11155_v26  ;;  %v4697_v58 = vpop.f32.mrb[5].mxu1  ;;  %v4464_v29 = vpop.f32.mrb[165].mxu0  ;;  %5162 = vmatmul.mubr.f32.gmra.mrb[14].mxu0 %v11290_v12 }
 0x38a   : > { %5166 = vmatprep.mubr.f32.mxu0 %v11293_v25  ;;  %v12009_v29 = vld [vmem:[#allocation13_spill] sm:$0xff] }
 0x38b   : > { %v11406_v56 = vadd.f32 %v4687_v28, %v4463_v4 }
 0x38c   : > { %v7013_v31 = vpop.f32.mrb[6].mxu1  ;;  %v4467_v60 = vpop.f32.mrb[166].mxu0 }
 0x38d   : > { %v4468_v49 = vadd.f32 %v4467_v60, %v11172_v18  ;;  %v4707_v10 = vpop.f32.mrb[7].mxu1  ;;  %v4469_v0 = vpop.f32.mrb[167].mxu0  ;;  %5167 = vmatmul.mubr.f32.gmra.mrb[16].mxu0 %v4909_v47 }
 0x38e   : > { %5171 = vmatprep.mubr.f32.mxu0 %v11297_v40  ;;  %v4927_v0 = vld [vmem:[#allocation3 + $0x330] sm:$0xff] }
 0x38f   : > { %v11410_v2 = vadd.f32 %v7007_v11, %v4468_v49  ;;  %v4921_v11 = vld [vmem:[#allocation3 + $0x300] sm:$0xff] }
 0x390   : > { %v7016_v26 = vpop.f32.mrb[8].mxu1  ;;  %v4472_v33 = vpop.f32.mrb[168].mxu0 }
 0x391   : > { %v4473_v12 = vadd.f32 %v4472_v33, %v11183_v24  ;;  %v4717_v32 = vpop.f32.mrb[9].mxu1  ;;  %v4474_v25 = vpop.f32.mrb[169].mxu0  ;;  %5172 = vmatmul.mubr.f32.gmra.mrb[18].mxu0 %v11300_v44  ;;  %v12006_v44 = vld [vmem:[#allocation19_spill] sm:$0xff] }
 0x392   : > { %5176 = vmatprep.mubr.f32.mxu0 %v11303_v59 }
 0x393   : > { %v11415_v57 = vadd.f32 %v4697_v58, %v4473_v12  ;;  %v4924_v58 = vld [vmem:[#allocation3 + $0x318] sm:$0xff] }
 0x394   : > { %v7019_v18 = vpop.f32.mrb[10].mxu1  ;;  %v4477_v62 = vpop.f32.mrb[170].mxu0 }
 0x395   : > { %v4478_v8 = vadd.f32 %v4477_v62, %v12005_v43  ;;  %v4727_v40 = vpop.f32.mrb[11].mxu1  ;;  %v4479_v46 = vpop.f32.mrb[171].mxu0  ;;  %5177 = vmatmul.mubr.f32.gmra.mrb[20].mxu0 %v4915_v15  ;;  %v12010_v62 = vld [vmem:[#allocation14_spill] sm:$0xff] }
 0x396   : > { %5181 = vmatprep.mubr.f32.mxu0 %v11308_v52  ;;  %v12008_v52 = vld [vmem:[#allocation20_spill] sm:$0xff] }
 0x397   : > { %v11419_v36 = vadd.f32 %v7010_v63, %v4478_v8  ;;  %v4930_v8 = vld [vmem:[#allocation3 + $0x348] sm:$0xff] }
 0x398   : > { %v11421_v24 = vpop.f32.mrb[12].mxu1  ;;  %v4482_v27 = vpop.f32.mrb[172].mxu0 }
 0x399   : > { %v4483_v13 = vadd.f32 %v4482_v27, %v12006_v44  ;;  %v4737_v59 = vpop.f32.mrb[13].mxu1  ;;  %v4484_v7 = vpop.f32.mrb[173].mxu0  ;;  %5182 = vmatmul.mubr.f32.gmra.mrb[22].mxu0 %v12007_v37 }
 0x39a   : > { %5186 = vmatprep.mubr.f32.mxu0 %v4922_v17 }
 0x39b   : > { %v11425_v20 = vadd.f32 %v4707_v10, %v4483_v13  ;;  %v7930_v10 = vld [vmem:[#allocation3 + $0x8] sm:$0xff]  ;;  %v12011_v13 = vld [vmem:[#allocation21_spill] sm:$0xff] }
 0x39c   : > { %v11427_v42 = vpop.f32.mrb[14].mxu1  ;;  %v4487_v14 = vpop.f32.mrb[174].mxu0 }
 0x39d   : > { %v4488_v51 = vadd.f32 %v4487_v14, %v12008_v52  ;;  %v4747_v50 = vpop.f32.mrb[15].mxu1  ;;  %v4489_v28 = vpop.f32.mrb[175].mxu0  ;;  %5187 = vmatmul.mubr.f32.gmra.mrb[24].mxu0 %v4921_v11  ;;  %v12012_v52 = vld [vmem:[#allocation22_spill] sm:$0xff] }
 0x39e   : > { %5191 = vmatprep.mubr.f32.mxu0 %v4925_v45 }
 0x39f   : > { %v11430_v63 = vadd.f32 %v7013_v31, %v4488_v51 }
 0x3a0   : > { %v11432_v41 = vpop.f32.mrb[16].mxu1  ;;  %v4492_v4 = vpop.f32.mrb[176].mxu0 }
 0x3a1   : > { %v4493_v60 = vadd.f32 %v4492_v4, %v12009_v29  ;;  %v4757_v47 = vpop.f32.mrb[17].mxu1  ;;  %v4494_v49 = vpop.f32.mrb[177].mxu0  ;;  %5192 = vmatmul.mubr.f32.gmra.mrb[26].mxu0 %v4924_v58  ;;  %v12013_v29 = vld [vmem:[#allocation18_spill] sm:$0xff] }
 0x3a2   : > { %5196 = vmatprep.mubr.f32.mxu0 %v7930_v10 }
 0x3a3   : > { %v11435_v33 = vadd.f32 %v4717_v32, %v4493_v60 }
 0x3a4   : > { %v11437_v12 = vpop.f32.mrb[18].mxu1  ;;  %v4497_v25 = vpop.f32.mrb[178].mxu0 }
 0x3a5   : > { %v4498_v31 = vadd.f32 %v4497_v25, %v12010_v62  ;;  %v4767_v15 = vpop.f32.mrb[19].mxu1  ;;  %v4499_v43 = vpop.f32.mrb[179].mxu0  ;;  %5197 = vmatmul.mubr.f32.gmra.mrb[28].mxu0 %v4927_v0  ;;  %v12014_v62 = vld [vmem:[#allocation23_spill] sm:$0xff] }
 0x3a6   : > { %5201 = vmatprep.mubr.f32.mxu0 %v7930_v10 }
 0x3a7   : > { %v11440_v46 = vadd.f32 %v7016_v26, %v4498_v31 }
 0x3a8   : > { %v11442_v27 = vpop.f32.mrb[20].mxu1  ;;  %v4502_v44 = vpop.f32.mrb[180].mxu0 }
 0x3a9   : > { %v4503_v7 = vadd.f32 %v4502_v44, %v12011_v13  ;;  %v11445_v37 = vpop.f32.mrb[21].mxu1  ;;  %v4504_v32 = vpop.f32.mrb[181].mxu0  ;;  %5202 = vmatmul.mubr.f32.gmra.mrb[30].mxu0 %v4930_v8 }
 0x3ab   : > { %v11447_v17 = vadd.f32 %v4727_v40, %v4503_v7 }
 0x3ac   : > { %v11449_v14 = vpop.f32.mrb[22].mxu1  ;;  %v4507_v11 = vpop.f32.mrb[182].mxu0 }
 0x3ad   : > { %v4508_v51 = vadd.f32 %v4507_v11, %v12012_v52  ;;  %v11452_v28 = vpop.f32.mrb[23].mxu1  ;;  %v4509_v26 = vpop.f32.mrb[183].mxu0 }
 0x3af   : > { %v11454_v45 = vadd.f32 %v7019_v18, %v4508_v51 }
 0x3b0   : > { %v11456_v4 = vpop.f32.mrb[24].mxu1  ;;  %v4512_v58 = vpop.f32.mrb[184].mxu0 }
 0x3b1   : > { %v4513_v60 = vadd.f32 %v4512_v58, %v12013_v29  ;;  %v11459_v49 = vpop.f32.mrb[25].mxu1  ;;  %v4514_v10 = vpop.f32.mrb[185].mxu0 }
 0x3b3   : > { %v11461_v40 = vadd.f32 %v4737_v59, %v4513_v60 }
 0x3b4   : > { %v11463_v0 = vpop.f32.mrb[26].mxu1  ;;  %v4517_v25 = vpop.f32.mrb[186].mxu0 }
 0x3b5   : > { %v4518_v31 = vadd.f32 %v4517_v25, %v12014_v62  ;;  %v11466_v43 = vpop.f32.mrb[27].mxu1  ;;  %v4519_v8 = vpop.f32.mrb[187].mxu0 }
 0x3b7   : > { %v11469_v18 = vadd.f32 %v11421_v24, %v4518_v31 }
 0x3b8   : > { %v11471_v44 = vpop.f32.mrb[28].mxu1  ;;  %v4522_v13 = vpop.f32.mrb[188].mxu0 }
 0x3b9   : > { %v4523_v7 = vadd.f32 %v4522_v13, %v11321_v1  ;;  %v11474_v32 = vpop.f32.mrb[29].mxu1  ;;  %v4524_v59 = vpop.f32.mrb[189].mxu0 }
 0x3bb   : > { %v11476_v11 = vadd.f32 %v4747_v50, %v4523_v7 }
 0x3bc   : > { %v11478_v52 = vpop.f32.mrb[30].mxu1  ;;  %v4527_v51 = vpop.f32.mrb[190].mxu0 }
 0x3bd   : > { %v4528_v26 = vadd.f32 %v4527_v51, %v11325_v3  ;;  %v11481_v58 = vpop.f32.mrb[31].mxu1  ;;  %v4529_v29 = vpop.f32.mrb[191].mxu0 }
 0x3bf   : > { %v11484_v24 = vadd.f32 %v11427_v42, %v4528_v26 }
 0x3c0   : > { %v11486_v60 = vpop.f32.mrb[32].mxu1  ;;  %v4532_v10 = vpop.f32.mrb[192].mxu0 }
 0x3c1   : > { %v4533_v1 = vadd.f32 %v4532_v10, %v11329_v38  ;;  %v11489_v25 = vpop.f32.mrb[33].mxu1  ;;  %v4534_v50 = vpop.f32.mrb[193].mxu0 }
 0x3c3   : > { %v11491_v62 = vadd.f32 %v4757_v47, %v4533_v1 }
 0x3c4   : > { %v11493_v31 = vpop.f32.mrb[34].mxu1  ;;  %v4537_v8 = vpop.f32.mrb[194].mxu0 }
 0x3c5   : > { %v4538_v3 = vadd.f32 %v4537_v8, %v11333_v61  ;;  %v11496_v13 = vpop.f32.mrb[35].mxu1  ;;  %v4539_v7 = vpop.f32.mrb[195].mxu0 }
 0x3c7   : > { %v11499_v42 = vadd.f32 %v11432_v41, %v4538_v3 }
 0x3c8   : > { %v11501_v59 = vpop.f32.mrb[36].mxu1  ;;  %v4542_v51 = vpop.f32.mrb[196].mxu0 }
 0x3c9   : > { %v4543_v38 = vadd.f32 %v4542_v51, %v11337_v53  ;;  %v11504_v26 = vpop.f32.mrb[37].mxu1  ;;  %v4544_v47 = vpop.f32.mrb[197].mxu0 }
 0x3cb   : > { %v11506_v29 = vadd.f32 %v4767_v15, %v4543_v38 }
 0x3cc   : > { %v11508_v10 = vpop.f32.mrb[38].mxu1  ;;  %v4547_v1 = vpop.f32.mrb[198].mxu0 }
 0x3cd   : > { %v4548_v61 = vadd.f32 %v4547_v1, %v11341_v22  ;;  %v11511_v50 = vpop.f32.mrb[39].mxu1  ;;  %v4549_v8 = vpop.f32.mrb[199].mxu0 }
 0x3cf   : > { %v11514_v41 = vadd.f32 %v11437_v12, %v4548_v61 }
 0x3d0   : > { %v11516_v3 = vpop.f32.mrb[40].mxu1  ;;  %v4552_v7 = vpop.f32.mrb[200].mxu0 }
 0x3d1   : > { %12015 = vst [vmem:[#allocation25_spill] sm:$0xff] %v11514_v41  ;;  %v4553_v53 = vadd.f32 %v4552_v7, %v11345_v35  ;;  %v11519_v51 = vpop.f32.mrb[41].mxu1  ;;  %v4554_v15 = vpop.f32.mrb[201].mxu0 }
 0x3d3   : > { %v11522_v38 = vadd.f32 %v11445_v37, %v4553_v53 }
 0x3d4   : > { %v11524_v47 = vpop.f32.mrb[42].mxu1  ;;  %v4557_v22 = vpop.f32.mrb[202].mxu0 }
 0x3d5   : > { %12016 = vst [vmem:[#allocation26_spill] sm:$0xff] %v11522_v38  ;;  %v4558_v1 = vadd.f32 %v4557_v22, %v11349_v55  ;;  %v11527_v8 = vpop.f32.mrb[43].mxu1  ;;  %v4559_v12 = vpop.f32.mrb[203].mxu0 }
 0x3d7   : > { %v11530_v61 = vadd.f32 %v11442_v27, %v4558_v1 }
 0x3d8   : > { %v11532_v41 = vpop.f32.mrb[44].mxu1  ;;  %v4562_v35 = vpop.f32.mrb[204].mxu0 }
 0x3d9   : > { %12017 = vst [vmem:[#allocation27_spill] sm:$0xff] %v11530_v61  ;;  %v4563_v7 = vadd.f32 %v4562_v35, %v11353_v30  ;;  %v11535_v15 = vpop.f32.mrb[45].mxu1  ;;  %v4564_v37 = vpop.f32.mrb[205].mxu0 }
 0x3db   : > { %v11538_v53 = vadd.f32 %v11452_v28, %v4563_v7 }
 0x3dc   : > { %v11540_v38 = vpop.f32.mrb[46].mxu1  ;;  %v4567_v55 = vpop.f32.mrb[206].mxu0 }
 0x3dd   : > { %12018 = vst [vmem:[#allocation28_spill] sm:$0xff] %v11538_v53  ;;  %v4568_v22 = vadd.f32 %v4567_v55, %v11357_v21  ;;  %v11543_v12 = vpop.f32.mrb[47].mxu1  ;;  %v4569_v27 = vpop.f32.mrb[207].mxu0 }
 0x3df   : > { %v11546_v1 = vadd.f32 %v11449_v14, %v4568_v22 }
 0x3e0   : > { %v11548_v61 = vpop.f32.mrb[48].mxu1  ;;  %v4572_v30 = vpop.f32.mrb[208].mxu0 }
 0x3e1   : > { %12019 = vst [vmem:[#allocation29_spill] sm:$0xff] %v11546_v1  ;;  %v4573_v35 = vadd.f32 %v4572_v30, %v11361_v48  ;;  %v11551_v37 = vpop.f32.mrb[49].mxu1  ;;  %v4574_v28 = vpop.f32.mrb[209].mxu0 }
 0x3e3   : > { %v11554_v7 = vadd.f32 %v11459_v49, %v4573_v35 }
 0x3e4   : > { %v11556_v53 = vpop.f32.mrb[50].mxu1  ;;  %v4577_v21 = vpop.f32.mrb[210].mxu0 }
 0x3e5   : > { %12020 = vst [vmem:[#allocation30_spill] sm:$0xff] %v11554_v7  ;;  %v4578_v55 = vadd.f32 %v4577_v21, %v11365_v6  ;;  %v11559_v27 = vpop.f32.mrb[51].mxu1  ;;  %v4579_v14 = vpop.f32.mrb[211].mxu0 }
 0x3e7   : > { %v11562_v22 = vadd.f32 %v11456_v4, %v4578_v55 }
 0x3e8   : > { %v11564_v1 = vpop.f32.mrb[52].mxu1  ;;  %v4582_v48 = vpop.f32.mrb[212].mxu0 }
 0x3e9   : > { %12021 = vst [vmem:[#allocation31_spill] sm:$0xff] %v11562_v22  ;;  %v4583_v30 = vadd.f32 %v4582_v48, %v11369_v16  ;;  %v11567_v28 = vpop.f32.mrb[53].mxu1  ;;  %v4584_v49 = vpop.f32.mrb[213].mxu0 }
 0x3eb   : > { %v11570_v35 = vadd.f32 %v11466_v43, %v4583_v30 }
 0x3ec   : > { %v11572_v7 = vpop.f32.mrb[54].mxu1  ;;  %v4587_v6 = vpop.f32.mrb[214].mxu0 }
 0x3ed   : > { %12022 = vst [vmem:[#allocation32_spill] sm:$0xff] %v11570_v35  ;;  %v4588_v21 = vadd.f32 %v4587_v6, %v11373_v54  ;;  %v11575_v14 = vpop.f32.mrb[55].mxu1  ;;  %v4589_v4 = vpop.f32.mrb[215].mxu0 }
 0x3ef   : > { %v11578_v55 = vadd.f32 %v11463_v0, %v4588_v21 }
 0x3f0   : > { %v11580_v22 = vpop.f32.mrb[56].mxu1  ;;  %v4592_v16 = vpop.f32.mrb[216].mxu0 }
 0x3f1   : > { %12023 = vst [vmem:[#allocation33_spill] sm:$0xff] %v11578_v55  ;;  %v4593_v48 = vadd.f32 %v4592_v16, %v11377_v39  ;;  %v11583_v49 = vpop.f32.mrb[57].mxu1  ;;  %v4594_v43 = vpop.f32.mrb[217].mxu0 }
 0x3f3   : > { %v11586_v30 = vadd.f32 %v11474_v32, %v4593_v48 }
 0x3f4   : > { %v11588_v35 = vpop.f32.mrb[58].mxu1  ;;  %v4597_v54 = vpop.f32.mrb[218].mxu0 }
 0x3f5   : > { %v4598_v6 = vadd.f32 %v4597_v54, %v11381_v9  ;;  %v11591_v4 = vpop.f32.mrb[59].mxu1  ;;  %v4599_v0 = vpop.f32.mrb[219].mxu0 }
 0x3f7   : > { %v11594_v21 = vadd.f32 %v11471_v44, %v4598_v6 }
 0x3f8   : > { %v11596_v55 = vpop.f32.mrb[60].mxu1  ;;  %v4602_v39 = vpop.f32.mrb[220].mxu0 }
 0x3f9   : > { %12024 = vst [vmem:[#allocation34_spill] sm:$0xff] %v11594_v21  ;;  %12025 = vst [vmem:[#allocation35_spill] sm:$0xff] %v11596_v55  ;;  %v4603_v16 = vadd.f32 %v4602_v39, %v11390_v23  ;;  %v11599_v43 = vpop.f32.mrb[61].mxu1  ;;  %v4604_v32 = vpop.f32.mrb[221].mxu0 }
 0x3fb   : > { %v11602_v48 = vadd.f32 %v11481_v58, %v4603_v16  ;;  %v11617_v58 = vld [vmem:[%s11844_s5] ss:$0 sm:$0xff] }
 0x3fc   : > { %v4607_v9 = vpop.f32.mrb[222].mxu0  ;;  %v11604_v54 = vpop.f32.mrb[62].mxu1 }
 0x3fd   : > { %v4608_v44 = vadd.f32 %v4607_v9, %v11387_v5  ;;  %v4609_v6 = vpop.f32.mrb[223].mxu0  ;;  %v11607_v0 = vpop.f32.mrb[63].mxu1 }
 0x3ff   : > { %v11610_v21 = vadd.f32 %v11478_v52, %v4608_v44  ;;  %v7931_v44 = vld [vmem:[%s8192_s16 + $0x31] sm:$0xff] }
 0x400   : > { %v5048_v23 = vpop.f32.mrb[224].mxu0 }
 0x401   : > { %12026 = vst [vmem:[#allocation36_spill] sm:$0xff] %v11610_v21  ;;  %v5274_v39 = vadd.f32 %v11489_v25, %v5048_v23  ;;  %v5050_v55 = vpop.f32.mrb[225].mxu0 }
 0x403   : > { %v5432_v16 = vadd.f32 %v5274_v39, %v11396_v19 }
 0x404   : > { %v5053_v5 = vpop.f32.mrb[226].mxu0 }
 0x405   : > { %v5502_v32 = vadd.f32 %v11617_v58, %v5432_v16  ;;  %v5279_v52 = vadd.f32 %v11486_v60, %v5053_v5  ;;  %v5055_v9 = vpop.f32.mrb[227].mxu0  ;;  %v7932_v16 = vld [vmem:[%s8192_s16 + $0x39] sm:$0xff] }
 0x407   : > { %v5534_v25 = vadd.f32 %v7931_v44, %v5502_v32  ;;  %v5433_v55 = vadd.f32 %v5279_v52, %v11401_v34 }
 0x408   : > { %v5058_v6 = vpop.f32.mrb[228].mxu0 }
 0x409   : > { %v5566_v23 = vmax.f32 %v5534_v25, 0.0  ;;  %v5503_v21 = vadd.f32 %v11617_v58, %v5433_v55  ;;  %v5284_v19 = vadd.f32 %v11496_v13, %v5058_v6  ;;  %v5060_v39 = vpop.f32.mrb[229].mxu0  ;;  %v7933_v13 = vld [vmem:[%s8192_s16 + $0x49] sm:$0xff] }
 0x40a   : > { %v7934_v39 = vld [vmem:[%s8192_s16 + $0x51] sm:$0xff] }
 0x40b   : > { %5598 = vst [vmem:[%s11628_s12] sm:$0xff] %v5566_v23  ;;  %v5535_v60 = vadd.f32 %v7932_v16, %v5503_v21  ;;  %v5434_v5 = vadd.f32 %v5284_v19, %v11406_v56 }
 0x40c   : > { %v5063_v34 = vpop.f32.mrb[230].mxu0 }
 0x40d   : > { %v5567_v32 = vmax.f32 %v5535_v60, 0.0  ;;  %v5504_v52 = vadd.f32 %v11617_v58, %v5434_v5  ;;  %v5289_v9 = vadd.f32 %v11493_v31, %v5063_v34  ;;  %v5065_v44 = vpop.f32.mrb[231].mxu0 }
 0x40f   : > { %5599 = vst [vmem:[%s11628_s12 + $0x8] sm:$0xff] %v5567_v32  ;;  %v5536_v25 = vadd.f32 %v7933_v13, %v5504_v52  ;;  %v5435_v55 = vadd.f32 %v5289_v9, %v11410_v2  ;;  %v7935_v52 = vld [vmem:[%s8192_s16 + $0x61] sm:$0xff] }
 0x410   : > { %v5068_v6 = vpop.f32.mrb[232].mxu0 }
 0x411   : > { %v5568_v21 = vmax.f32 %v5536_v25, 0.0  ;;  %v5505_v23 = vadd.f32 %v11617_v58, %v5435_v55  ;;  %v5294_v56 = vadd.f32 %v11504_v26, %v5068_v6  ;;  %v5070_v19 = vpop.f32.mrb[233].mxu0  ;;  %v7936_v6 = vld [vmem:[%s8192_s16 + $0x69] sm:$0xff] }
 0x413   : > { %5600 = vst [vmem:[%s11628_s12 + $0x10] sm:$0xff] %v5568_v21  ;;  %v5537_v16 = vadd.f32 %v7934_v39, %v5505_v23  ;;  %v5436_v31 = vadd.f32 %v5294_v56, %v11415_v57 }
 0x414   : > { %v5073_v60 = vpop.f32.mrb[234].mxu0 }
 0x415   : > { %v5569_v5 = vmax.f32 %v5537_v16, 0.0  ;;  %v5506_v34 = vadd.f32 %v11617_v58, %v5436_v31  ;;  %v5299_v2 = vadd.f32 %v11501_v59, %v5073_v60  ;;  %v5075_v32 = vpop.f32.mrb[235].mxu0  ;;  %v7937_v16 = vld [vmem:[%s8192_s16 + $0x79] sm:$0xff] }
 0x416   : > { %v7938_v32 = vld [vmem:[%s8192_s16 + $0x81] sm:$0xff] }
 0x417   : > { %5601 = vst [vmem:[%s11628_s12 + $0x18] sm:$0xff] %v5569_v5  ;;  %v5538_v9 = vadd.f32 %v7935_v52, %v5506_v34  ;;  %v5437_v26 = vadd.f32 %v5299_v2, %v11419_v36 }
 0x418   : > { %v5078_v44 = vpop.f32.mrb[236].mxu0 }
 0x419   : > { %v5570_v13 = vmax.f32 %v5538_v9, 0.0  ;;  %v5507_v25 = vadd.f32 %v11617_v58, %v5437_v26  ;;  %v5304_v57 = vadd.f32 %v11511_v50, %v5078_v44  ;;  %v5080_v55 = vpop.f32.mrb[237].mxu0 }
 0x41b   : > { %5602 = vst [vmem:[%s11628_s12 + $0x20] sm:$0xff] %v5570_v13  ;;  %v5539_v21 = vadd.f32 %v7936_v6, %v5507_v25  ;;  %v5438_v59 = vadd.f32 %v5304_v57, %v11425_v20  ;;  %v7939_v25 = vld [vmem:[%s8192_s16 + $0x91] sm:$0xff] }
 0x41c   : > { %v5083_v23 = vpop.f32.mrb[238].mxu0 }
 0x41d   : > { %v5571_v56 = vmax.f32 %v5539_v21, 0.0  ;;  %v5508_v19 = vadd.f32 %v11617_v58, %v5438_v59  ;;  %v5309_v36 = vadd.f32 %v11508_v10, %v5083_v23  ;;  %v5085_v39 = vpop.f32.mrb[239].mxu0  ;;  %v7940_v23 = vld [vmem:[%s8192_s16 + $0x99] sm:$0xff] }
 0x41f   : > { %5603 = vst [vmem:[%s11628_s12 + $0x28] sm:$0xff] %v5571_v56  ;;  %v5540_v31 = vadd.f32 %v7937_v16, %v5508_v19  ;;  %v5439_v50 = vadd.f32 %v5309_v36, %v11430_v63 }
 0x420   : > { %v5088_v60 = vpop.f32.mrb[240].mxu0 }
 0x421   : > { %v5572_v5 = vmax.f32 %v5540_v31, 0.0  ;;  %v5509_v34 = vadd.f32 %v11617_v58, %v5439_v50  ;;  %v5314_v20 = vadd.f32 %v11519_v51, %v5088_v60  ;;  %v5090_v2 = vpop.f32.mrb[241].mxu0  ;;  %v7941_v31 = vld [vmem:[%s8192_s16 + $0xa9] sm:$0xff] }
 0x422   : > { %v7942_v2 = vld [vmem:[%s8192_s16 + $0xb1] sm:$0xff] }
 0x423   : > { %5604 = vst [vmem:[%s11628_s12 + $0x30] sm:$0xff] %v5572_v5  ;;  %v5541_v52 = vadd.f32 %v7938_v32, %v5509_v34  ;;  %v5440_v10 = vadd.f32 %v5314_v20, %v11435_v33 }
 0x424   : > { %v5093_v9 = vpop.f32.mrb[242].mxu0 }
 0x425   : > { %v5573_v26 = vmax.f32 %v5541_v52, 0.0  ;;  %v5510_v44 = vadd.f32 %v11617_v58, %v5440_v10  ;;  %v5319_v63 = vadd.f32 %v11516_v3, %v5093_v9  ;;  %v5095_v13 = vpop.f32.mrb[243].mxu0 }
 0x427   : > { %5605 = vst [vmem:[%s11628_s12 + $0x38] sm:$0xff] %v5573_v26  ;;  %v5542_v57 = vadd.f32 %v7939_v25, %v5510_v44  ;;  %v5441_v51 = vadd.f32 %v5319_v63, %v11440_v46  ;;  %v7943_v44 = vld [vmem:[%s8192_s16 + $0xc1] sm:$0xff] }
 0x428   : > { %v5098_v55 = vpop.f32.mrb[244].mxu0 }
 0x429   : > { %v5574_v6 = vmax.f32 %v5542_v57, 0.0  ;;  %v5511_v21 = vadd.f32 %v11617_v58, %v5441_v51  ;;  %v5324_v33 = vadd.f32 %v11527_v8, %v5098_v55  ;;  %v5100_v59 = vpop.f32.mrb[245].mxu0  ;;  %v7944_v55 = vld [vmem:[%s8192_s16 + $0xc9] sm:$0xff] }
 0x42b   : > { %5606 = vst [vmem:[%s11628_s12 + $0x40] sm:$0xff] %v5574_v6  ;;  %v5543_v56 = vadd.f32 %v7940_v23, %v5511_v21  ;;  %v5442_v3 = vadd.f32 %v5324_v33, %v11447_v17 }
 0x42c   : > { %v5103_v19 = vpop.f32.mrb[246].mxu0 }
 0x42d   : > { %v5575_v36 = vmax.f32 %v5543_v56, 0.0  ;;  %v5512_v39 = vadd.f32 %v11617_v58, %v5442_v3  ;;  %v5329_v46 = vadd.f32 %v11524_v47, %v5103_v19  ;;  %v5105_v16 = vpop.f32.mrb[247].mxu0  ;;  %v7945_v56 = vld [vmem:[%s8192_s16 + $0xd9] sm:$0xff] }
 0x42e   : > { %v7946_v16 = vld [vmem:[%s8192_s16 + $0xe1] sm:$0xff] }
 0x42f   : > { %5607 = vst [vmem:[%s11628_s12 + $0x48] sm:$0xff] %v5575_v36  ;;  %v5544_v50 = vadd.f32 %v7941_v31, %v5512_v39  ;;  %v5443_v8 = vadd.f32 %v5329_v46, %v11454_v45 }
 0x430   : > { %v5108_v60 = vpop.f32.mrb[248].mxu0 }
 0x431   : > { %v5576_v5 = vmax.f32 %v5544_v50, 0.0  ;;  %v5513_v34 = vadd.f32 %v11617_v58, %v5443_v8  ;;  %v5334_v17 = vadd.f32 %v11535_v15, %v5108_v60  ;;  %v5110_v20 = vpop.f32.mrb[249].mxu0 }
 0x433   : > { %5608 = vst [vmem:[%s11628_s12 + $0x50] sm:$0xff] %v5576_v5  ;;  %v5545_v32 = vadd.f32 %v7942_v2, %v5513_v34  ;;  %v5444_v47 = vadd.f32 %v5334_v17, %v11461_v40  ;;  %v7947_v34 = vld [vmem:[%s8192_s16 + $0xf1] sm:$0xff] }
 0x434   : > { %v5113_v52 = vpop.f32.mrb[250].mxu0 }
 0x435   : > { %v5577_v10 = vmax.f32 %v5545_v32, 0.0  ;;  %v5514_v9 = vadd.f32 %v11617_v58, %v5444_v47  ;;  %v5339_v45 = vadd.f32 %v11532_v41, %v5113_v52  ;;  %v5115_v26 = vpop.f32.mrb[251].mxu0  ;;  %v7948_v52 = vld [vmem:[%s8192_s16 + $0xf9] sm:$0xff] }
 0x437   : > { %5609 = vst [vmem:[%s11628_s12 + $0x58] sm:$0xff] %v5577_v10  ;;  %v5546_v63 = vadd.f32 %v7943_v44, %v5514_v9  ;;  %v5445_v15 = vadd.f32 %v5339_v45, %v11469_v18 }
 0x438   : > { %v5118_v13 = vpop.f32.mrb[252].mxu0 }
 0x439   : > { %v5578_v25 = vmax.f32 %v5546_v63, 0.0  ;;  %v5515_v57 = vadd.f32 %v11617_v58, %v5445_v15  ;;  %v5344_v40 = vadd.f32 %v11543_v12, %v5118_v13  ;;  %v5120_v51 = vpop.f32.mrb[253].mxu0  ;;  %v7949_v63 = vld [vmem:[%s8192_s16 + $0x109] sm:$0xff] }
 0x43a   : > { %v12027_v13 = vld [vmem:[#allocation25_spill] sm:$0xff] }
 0x43b   : > { %5610 = vst [vmem:[%s11628_s12 + $0x60] sm:$0xff] %v5578_v25  ;;  %v5547_v6 = vadd.f32 %v7944_v55, %v5515_v57  ;;  %v5446_v41 = vadd.f32 %v5344_v40, %v11476_v11  ;;  %v7950_v55 = vld [vmem:[%s8192_s16 + $0x111] sm:$0xff] }
 0x43c   : > { %v5123_v21 = vpop.f32.mrb[254].mxu0 }
 0x43d   : > { %v5579_v33 = vmax.f32 %v5547_v6, 0.0  ;;  %v5516_v59 = vadd.f32 %v11617_v58, %v5446_v41  ;;  %v5349_v18 = vadd.f32 %v11540_v38, %v5123_v21  ;;  %v5125_v23 = vpop.f32.mrb[255].mxu0  ;;  %v12028_v41 = vld [vmem:[#allocation26_spill] sm:$0xff] }
 0x43f   : > { %5611 = vst [vmem:[%s11628_s12 + $0x68] sm:$0xff] %v5579_v33  ;;  %v5548_v3 = vadd.f32 %v7945_v56, %v5516_v59  ;;  %v5447_v12 = vadd.f32 %v5349_v18, %v11484_v24  ;;  %v7951_v56 = vld [vmem:[%s8192_s16 + $0x121] sm:$0xff] }
 0x440   : > { %v5128_v19 = vpop.f32.mrb[0].mxu0 }
 0x441   : > { %v5580_v36 = vmax.f32 %v5548_v3, 0.0  ;;  %v5517_v39 = vadd.f32 %v11617_v58, %v5447_v12  ;;  %v5354_v11 = vadd.f32 %v11551_v37, %v5128_v19  ;;  %v5130_v46 = vpop.f32.mrb[1].mxu0  ;;  %v12029_v12 = vld [vmem:[#allocation27_spill] sm:$0xff] }
 0x443   : > { %5612 = vst [vmem:[%s11628_s12 + $0x70] sm:$0xff] %v5580_v36  ;;  %v5549_v31 = vadd.f32 %v7946_v16, %v5517_v39  ;;  %v5448_v38 = vadd.f32 %v5354_v11, %v11491_v62  ;;  %v7952_v16 = vld [vmem:[%s8192_s16 + $0x129] sm:$0xff] }
 0x444   : > { %v5133_v50 = vpop.f32.mrb[2].mxu0 }
 0x445   : > { %v5581_v8 = vmax.f32 %v5549_v31, 0.0  ;;  %v5518_v60 = vadd.f32 %v11617_v58, %v5448_v38  ;;  %v5359_v24 = vadd.f32 %v11548_v61, %v5133_v50  ;;  %v5135_v5 = vpop.f32.mrb[3].mxu0  ;;  %v12030_v38 = vld [vmem:[#allocation28_spill] sm:$0xff] }
 0x447   : > { %5613 = vst [vmem:[%s11628_s12 + $0x78] sm:$0xff] %v5581_v8  ;;  %v5550_v17 = vadd.f32 %v7947_v34, %v5518_v60  ;;  %v5449_v37 = vadd.f32 %v5359_v24, %v11499_v42  ;;  %v7953_v34 = vld [vmem:[%s8192_s16 + $0x139] sm:$0xff] }
 0x448   : > { %v5138_v20 = vpop.f32.mrb[4].mxu0 }
 0x449   : > { %v5582_v2 = vmax.f32 %v5550_v17, 0.0  ;;  %v5519_v32 = vadd.f32 %v11617_v58, %v5449_v37  ;;  %v5364_v62 = vadd.f32 %v11559_v27, %v5138_v20  ;;  %v5140_v47 = vpop.f32.mrb[5].mxu0  ;;  %v12031_v37 = vld [vmem:[#allocation29_spill] sm:$0xff] }
 0x44b   : > { %5614 = vst [vmem:[%s11628_s12 + $0x80] sm:$0xff] %v5582_v2  ;;  %v5551_v10 = vadd.f32 %v7948_v52, %v5519_v32  ;;  %v5450_v61 = vadd.f32 %v5364_v62, %v11506_v29  ;;  %v7954_v52 = vld [vmem:[%s8192_s16 + $0x141] sm:$0xff] }
 0x44c   : > { %v5143_v9 = vpop.f32.mrb[6].mxu0 }
 0x44d   : > { %v5583_v45 = vmax.f32 %v5551_v10, 0.0  ;;  %v5520_v26 = vadd.f32 %v11617_v58, %v5450_v61  ;;  %v5369_v42 = vadd.f32 %v11556_v53, %v5143_v9  ;;  %v5145_v44 = vpop.f32.mrb[7].mxu0  ;;  %v12032_v61 = vld [vmem:[#allocation30_spill] sm:$0xff] }
 0x44f   : > { %5615 = vst [vmem:[%s11628_s12 + $0x88] sm:$0xff] %v5583_v45  ;;  %v5552_v15 = vadd.f32 %v7949_v63, %v5520_v26  ;;  %v5451_v27 = vadd.f32 %v5369_v42, %v12027_v13  ;;  %v7955_v63 = vld [vmem:[%s8192_s16 + $0x151] sm:$0xff]  ;;  %v12033_v13 = vld [vmem:[#allocation31_spill] sm:$0xff] }
 0x450   : > { %v5148_v25 = vpop.f32.mrb[8].mxu0 }
 0x451   : > { %v5584_v57 = vmax.f32 %v5552_v15, 0.0  ;;  %v5521_v40 = vadd.f32 %v11617_v58, %v5451_v27  ;;  %v5374_v29 = vadd.f32 %v11567_v28, %v5148_v25  ;;  %v5150_v51 = vpop.f32.mrb[9].mxu0 }
 0x452   : > { %v7956_v51 = vld [vmem:[%s8192_s16 + $0x159] sm:$0xff] }
 0x453   : > { %5616 = vst [vmem:[%s11628_s12 + $0x90] sm:$0xff] %v5584_v57  ;;  %v5553_v6 = vadd.f32 %v7950_v55, %v5521_v40  ;;  %v5452_v53 = vadd.f32 %v5374_v29, %v12028_v41 }
 0x454   : > { %v5153_v21 = vpop.f32.mrb[10].mxu0 }
 0x455   : > { %v5585_v33 = vmax.f32 %v5553_v6, 0.0  ;;  %v5522_v59 = vadd.f32 %v11617_v58, %v5452_v53  ;;  %v5379_v18 = vadd.f32 %v11564_v1, %v5153_v21  ;;  %v5155_v23 = vpop.f32.mrb[11].mxu0  ;;  %v12034_v6 = vld [vmem:[#allocation32_spill] sm:$0xff] }
 0x457   : > { %5617 = vst [vmem:[%s11628_s12 + $0x98] sm:$0xff] %v5585_v33  ;;  %v5554_v3 = vadd.f32 %v7951_v56, %v5522_v59  ;;  %v5453_v28 = vadd.f32 %v5379_v18, %v12029_v12  ;;  %v7957_v18 = vld [vmem:[%s8192_s16 + $0x169] sm:$0xff] }
 0x458   : > { %v5158_v19 = vpop.f32.mrb[12].mxu0  ;;  %v12035_v56 = vld [vmem:[#allocation33_spill] sm:$0xff] }
 0x459   : > { %v5586_v36 = vmax.f32 %v5554_v3, 0.0  ;;  %v5523_v39 = vadd.f32 %v11617_v58, %v5453_v28  ;;  %v5384_v11 = vadd.f32 %v11575_v14, %v5158_v19  ;;  %v5160_v46 = vpop.f32.mrb[13].mxu0 }
 0x45b   : > { %5618 = vst [vmem:[%s11628_s12 + $0xa0] sm:$0xff] %v5586_v36  ;;  %v5555_v31 = vadd.f32 %v7952_v16, %v5523_v39  ;;  %v5454_v1 = vadd.f32 %v5384_v11, %v12030_v38  ;;  %v7958_v39 = vld [vmem:[%s8192_s16 + $0x171] sm:$0xff]  ;;  %v12036_v38 = vld [vmem:[#allocation35_spill] sm:$0xff]  ;;  %s6055_s16 = sshll.u32 %s8033_s24, 12  ;;  %s7963_s24 = scalar_lea.vmem %s11788_s14, 4096 }
 0x45c   : > { %v5163_v50 = vpop.f32.mrb[14].mxu0  ;;  %s11786_s18 = scalar_lea.hbm %s11845_s6, %s6055_s16  ;;  %p7964_p12 = scmp.ne.s32.totalorder %s11788_s14, %s7963_s24 }
 0x45d   : > { %v5587_v8 = vmax.f32 %v5555_v31, 0.0  ;;  %v5524_v60 = vadd.f32 %v11617_v58, %v5454_v1  ;;  %v5389_v24 = vadd.f32 %v11572_v7, %v5163_v50  ;;  %v5165_v5 = vpop.f32.mrb[15].mxu0 }
 0x45e   : > { %p7965_p13 = pnand %p7964_p12, %p8123_p4 }
 0x45f   : > { %5619 = vst [vmem:[%s11628_s12 + $0xa8] sm:$0xff] %v5587_v8  ;;  %v5556_v17 = vadd.f32 %v7953_v34, %v5524_v60  ;;  %v5455_v14 = vadd.f32 %v5389_v24, %v12031_v37  ;;  %v7959_v8 = vld [vmem:[%s8642_s11 + $0x1] sm:$0xff]  ;;  %v12037_v24 = vld [vmem:[#allocation34_spill] sm:$0xff] }
 0x460   : > { %v5168_v20 = vpop.f32.mrb[16].mxu0  ;;  %p7966_p0 = pneg %p7965_p13 }
 0x461   : > { %v5588_v2 = vmax.f32 %v5556_v17, 0.0  ;;  %v5525_v32 = vadd.f32 %v11617_v58, %v5455_v14  ;;  %v5394_v62 = vadd.f32 %v11583_v49, %v5168_v20  ;;  %v5170_v47 = vpop.f32.mrb[17].mxu0  ;;  %v7960_v14 = vld [vmem:[%s8642_s11 + $0x9] sm:$0xff] }
 0x463   : > { %5620 = vst [vmem:[%s11628_s12 + $0xb0] sm:$0xff] %v5588_v2  ;;  %v5557_v10 = vadd.f32 %v7954_v52, %v5525_v32  ;;  %v5456_v7 = vadd.f32 %v5394_v62, %v12032_v61 }
 0x464   : > { %v5173_v9 = vpop.f32.mrb[18].mxu0 }
 0x465   : > { %v5589_v45 = vmax.f32 %v5557_v10, 0.0  ;;  %v5526_v26 = vadd.f32 %v11617_v58, %v5456_v7  ;;  %v5399_v42 = vadd.f32 %v11580_v22, %v5173_v9  ;;  %v5175_v44 = vpop.f32.mrb[19].mxu0  ;;  %v12038_v7 = vld [vmem:[#allocation36_spill] sm:$0xff] }
 0x467   : > { %5621 = vst [vmem:[%s11628_s12 + $0xb8] sm:$0xff] %v5589_v45  ;;  %v5558_v15 = vadd.f32 %v7955_v63, %v5526_v26  ;;  %v5457_v49 = vadd.f32 %v5399_v42, %v12033_v13 }
 0x468   : > { %v5178_v27 = vpop.f32.mrb[20].mxu0 }
 0x469   : > { %v5590_v25 = vmax.f32 %v5558_v15, 0.0  ;;  %v5527_v57 = vadd.f32 %v11617_v58, %v5457_v49  ;;  %v5404_v40 = vadd.f32 %v11591_v4, %v5178_v27  ;;  %v5180_v29 = vpop.f32.mrb[21].mxu0 }
 0x46b   : > { %5622 = vst [vmem:[%s11628_s12 + $0xc0] sm:$0xff] %v5590_v25  ;;  %v5559_v55 = vadd.f32 %v7956_v51, %v5527_v57  ;;  %v5458_v22 = vadd.f32 %v5404_v40, %v12034_v6 }
 0x46c   : > { %v5183_v41 = vpop.f32.mrb[22].mxu0 }
 0x46d   : > { %v5591_v53 = vmax.f32 %v5559_v55, 0.0  ;;  %v5528_v21 = vadd.f32 %v11617_v58, %v5458_v22  ;;  %v5409_v33 = vadd.f32 %v11588_v35, %v5183_v41  ;;  %v5185_v59 = vpop.f32.mrb[23].mxu0 }
 0x46f   : > { %5623 = vst [vmem:[%s11628_s12 + $0xc8] sm:$0xff] %v5591_v53  ;;  %v5560_v23 = vadd.f32 %v7957_v18, %v5528_v21  ;;  %v5459_v4 = vadd.f32 %v5409_v33, %v12035_v56 }
 0x470   : > { %v5188_v3 = vpop.f32.mrb[24].mxu0 }
 0x471   : > { %v5592_v12 = vmax.f32 %v5560_v23, 0.0  ;;  %v5529_v28 = vadd.f32 %v11617_v58, %v5459_v4  ;;  %v5414_v19 = vadd.f32 %v11599_v43, %v5188_v3  ;;  %v5190_v36 = vpop.f32.mrb[25].mxu0 }
 0x473   : > { %5624 = vst [vmem:[%s11628_s12 + $0xd0] sm:$0xff] %v5592_v12  ;;  %v5561_v11 = vadd.f32 %v7958_v39, %v5529_v28  ;;  %v5460_v35 = vadd.f32 %v5414_v19, %v11586_v30 }
 0x474   : > { %v5193_v46 = vpop.f32.mrb[26].mxu0 }
 0x475   : > { %v5593_v16 = vmax.f32 %v5561_v11, 0.0  ;;  %v5530_v31 = vadd.f32 %v11617_v58, %v5460_v35  ;;  %v5419_v1 = vadd.f32 %v12036_v38, %v5193_v46  ;;  %v5195_v50 = vpop.f32.mrb[27].mxu0 }
 0x477   : > { %5625 = vst [vmem:[%s11628_s12 + $0xd8] sm:$0xff] %v5593_v16  ;;  %v5562_v60 = vadd.f32 %v7959_v8, %v5530_v31  ;;  %v5461_v43 = vadd.f32 %v5419_v1, %v12037_v24 }
 0x478   : > { %v5198_v5 = vpop.f32.mrb[28].mxu0 }
 0x479   : > { %v5594_v34 = vmax.f32 %v5562_v60, 0.0  ;;  %v5531_v17 = vadd.f32 %v11617_v58, %v5461_v43  ;;  %v5424_v30 = vadd.f32 %v11607_v0, %v5198_v5  ;;  %v5200_v37 = vpop.f32.mrb[29].mxu0  ;;  %v7961_v0 = vld [vmem:[%s8642_s11 + $0x19] sm:$0xff] }
 0x47b   : > { %5626 = vst [vmem:[%s11628_s12 + $0xe0] sm:$0xff] %v5594_v34  ;;  %v5563_v20 = vadd.f32 %v7960_v14, %v5531_v17  ;;  %v5462_v2 = vadd.f32 %v5424_v30, %v11602_v48  ;;  %v7962_v48 = vld [vmem:[%s8642_s11 + $0x21] sm:$0xff]  ;;  %s8045_s11 = smov [#allocation4]  }
 0x47c   : > { %v5203_v32 = vpop.f32.mrb[30].mxu0  ;;  %s7967_s13 = sshll.u32 %s8045_s11, 4  ;;  %s7968_s13 = int_to_ptr.vmem [resolvable:$false] %s7967_s13 }
 0x47d   : > { %v5595_v62 = vmax.f32 %v5563_v20, 0.0  ;;  %v5532_v47 = vadd.f32 %v11617_v58, %v5462_v2  ;;  %v5429_v52 = vadd.f32 %v11604_v54, %v5203_v32  ;;  %v5205_v10 = vpop.f32.mrb[31].mxu0  ;;  %s7969_s28 = scalar_lea.vmem %s7968_s13, 8192  ;;  %p7970_p1 = scmp.lt.s32.totalorder %s11788_s14, %s7968_s13 }
 0x47e   : > { %p7971_p2 = scmp.lt.s32.totalorder %s7969_s28, %s7963_s24 }
 0x47f   : > { %5627 = vst [vmem:[%s11628_s12 + $0xe8] sm:$0xff] %v5595_v62  ;;  %v5564_v61 = vadd.f32 %v7961_v0, %v5532_v47  ;;  %v5463_v9 = vadd.f32 %v5429_v52, %v12038_v7 }
 0x480   : > { %p7972_p3 = por %p7971_p2, %p7970_p1 }
 0x481   : > { %v5596_v45 = vmax.f32 %v5564_v61, 0.0  ;;  %v5533_v26 = vadd.f32 %v11617_v58, %v5463_v9 }
 0x482   : > { %p7973_p5 = pnand %p7972_p3, %p7966_p0 }
 0x483   : > { %5628 = vst [vmem:[%s11628_s12 + $0xf0] sm:$0xff] %v5596_v45  ;;  %v5565_v42 = vadd.f32 %v7962_v48, %v5533_v26 }
 0x485   : > { %v5597_v54 = vmax.f32 %v5565_v42, 0.0 }
 0x487   : > { %5629 = vst [vmem:[%s11628_s12 + $0xf8] sm:$0xff] %v5597_v54 }
 0x488   : > { %7976 = shalt.err (!%p7973_p5)
}
 0x489   : > { %s7977_s20 = scalar_lea.hbm %s11786_s18, 4096  ;;  %s7981_s8 = scalar_lea.hbm %s11845_s6, 8192 }
 0x48a   : > { %p7978_p6 = scmp.ne.s32.totalorder %s11786_s18, %s7977_s20  ;;  %p7982_p10 = scmp.lt.u32.totalorder %s11786_s18, %s11845_s6 }
 0x48b   : > { %p7983_p11 = scmp.lt.u32.totalorder %s7981_s8, %s7977_s20  ;;  %p7985_p13 = scmp.lt.u32.totalorder %s7977_s20, %s11786_s18 }
 0x48c   : > { %p7979_p7 = pnand %p7978_p6, %p8123_p4 }
 0x48d   : > { %p7984_p12 = por %p7983_p11, %p7982_p10 }
 0x48e   : > { %p7980_p9 = pneg %p7979_p7 }
 0x48f   : > { %p7986_p0 = por %p7985_p13, %p7984_p12 }
 0x491   : > { %p7987_p1 = pnand %p7986_p0, %p7980_p9 }
 0x493   : > { %7990 = shalt.err (!%p7987_p1)
}
 0x494   : > { %s8046_s15 = smov 128   ;;  %s8047_s17 = smov 8  }
 0x495   : > { %7830 = dma.vmem_to_hbm [thread:$0]  (%p8123_p4), %s11788_s14, 4096, %s11786_s18, %s11793_s19, %s8046_s15, %s8046_s15, %s8047_s17  }
 0x496 PF: > { %p7837_p2 = scmp.ge.s32.totalorder %s8041_s26, 2  ;;  %s5662_s24 = sand.u32 1, %s8021_s21  }
 0x497   : > { %s5663_s11 = scalar_lea.sflag [#allocation5], %s5662_s24 }
 0x498   : > { %p7833_p3 = pnand %p7837_p2, %p8130_p8 }
 0x49a   : > { %8016 = dma.done.wait (!%p7833_p3), %s5663_s11, 4096  }
 0x49b   : > { %8018 = vsyncadd (!%p7833_p3), %s5663_s11, 4294963200  ;;  %s19_s26 = sadd.s32 1, %s8041_s26   ;;  %s12039_s21 = smov %s8025_s22 }
 0x49c   : > { %p16_p5 = scmp.ge.s32.totalorder %s19_s26, 4   ;;  %s12040_s22 = smov %s8029_s23 }
 0x49d   : > { %s12041_s23 = smov %s8136_s10  ;;  %s12042_s24 = smov %s8037_s25 }
 0x49e   : > { %s12043_s25 = smov %s12045_s29  ;;  %18 = sbr.rel (!%p16_p5) target bundleno = 4 (0x4), region = 94 }
 0x4a5   :  { %5668 = vsyncpa [#allocation5], 1 }
 0x4a6   :  { %5670 = vsyncpa [#allocation5 + $0x1], 1 }

</bundles_post_ra>
